<compile_context>
chip_gen: v6e
topology: v6e:2x2x1
jax: 0.10.0
libtpu: 0.0.40
codegen_flags: <defaults>
</compile_context>

<pallas_src>
import jax
import jax.numpy as jnp
from jax.experimental import pallas as pl
from jax.experimental.pallas import tpu as pltpu


def _round_up(x, m):
    return (x + m - 1) // m * m


def _pick_row_tile(h):
    for th in (32, 16, 8):
        if h % th == 0:
            return th
    return 8  # pad H up to a multiple of 8 (<= 7 wasted rows)


def _make_kernel(TH, Wp):
    L = TH * Wp

    def kernel(x_ref, w_ref, b_ref, o_ref):
        # x_ref: (1, (Hp+2)*Wp, Cin) bf16  whole zero-padded image, spatial flattened
        # w_ref: (3, 3, Cin, TC)     bf16  fused Key(+Value) weights for this Cout tile
        # b_ref: (1, TC)             f32
        # o_ref: (1, TH*Wp, TC)      output row/Cout tile (padded width)
        r = pl.program_id(2)
        row0 = r * TH

        # Three ky row slabs: aligned dynamic sublane slices of the resident
        # image (start is a multiple of Wp, Wp % 16 == 0) -> no relayout copies.
        slabs = []
        for ky in range(3):
            start = pl.multiple_of((row0 + ky) * Wp, Wp)
            slabs.append(x_ref[0, pl.ds(start, L), :])          # (L, Cin)

        acc = None
        for kx in range(3):
            # Pure sum-of-dots chain per kx (single accumulation chain; on v7x
            # Mosaic can keep it resident in the MXU result buffer).
            part = None
            for ky in range(3):
                d = jnp.dot(slabs[ky], w_ref[ky, kx],
                            preferred_element_type=jnp.float32)
                part = d if part is None else part + d
            if kx:
                # Shift rows up by kx so tap kx lines up with tap 0:
                # shifted[p] = part[p + kx].  The wrapped tail only lands in
                # padded output columns that the wrapper drops.
                # (pltpu.roll(part, -kx, 0) is the zero-copy XLU equivalent.)
                part = jnp.concatenate([part[kx:, :], part[:kx, :]], axis=0)
            acc = part if acc is None else acc + part

        # Bias add + cast fused into the single output store.
        o_ref[0] = (acc + b_ref[...]).astype(o_ref.dtype)

    return kernel


def _fused_conv3x3(x_nchw, w_hwio, bias2d):
    """Fused 3x3 / pad=1 / stride=1 conv over channel-padded fused weights.

    x_nchw : (N, Cin, H, W) float32
    w_hwio : (3, 3, Cin, Cout_p) bfloat16, Cout_p % 128 == 0
    bias2d : (1, Cout_p) float32
    Returns the NHWC output on the padded spatial grid: (N, Hp, Wp, Cout_p).
    """
    N, Cin, H, W = x_nchw.shape
    Cout_p = w_hwio.shape[-1]
    out_dtype = x_nchw.dtype
    out_bytes = jnp.dtype(out_dtype).itemsize

    # ---- tile policy -------------------------------------------------------
    try:  # v5e: 4x128^2 MXU + single vst slot -> prefer 128-wide Cout tiles.
        is_v5e = "v5 lite" in jax.devices()[0].device_kind.lower()
    except Exception:  # pragma: no cover
        is_v5e = False
    TC = 128 if (is_v5e or Cout_p % 256 != 0) else 256
    TH = _pick_row_tile(H)
    Hp = _round_up(H, TH)
    Wp = _round_up(W + 2, 16)   # bf16 sublane tile -> aligned flat row slices

    def img_bytes(hp):
        return (hp + 2) * Wp * Cin * 2

    def footprint(th, tc, hp, img_bufs):
        img = img_bufs * img_bytes(hp)          # resident padded image
        wgt = 2 * 9 * Cin * tc * 2              # weights, double-buffered
        bia = 2 * tc * 4
        out = 2 * th * Wp * tc * out_bytes      # output tile, double-buffered
        acc = 4 * th * Wp * tc * 4              # f32 partial-sum intermediates
        return img + wgt + bia + out + acc

    # Single-buffer the image block when it is big enough to matter (its block
    # index only changes on the outermost batch axis, so double-buffering it
    # buys nothing and doubles its VMEM share — important on v7x's 64 MiB).
    def img_buffers(hp):
        return 1 if img_bytes(hp) >= (8 << 20) else 2

    VMEM_BUDGET = 56 * 1024 * 1024
    if footprint(TH, TC, Hp, img_buffers(Hp)) > VMEM_BUDGET and TC > 128:
        TC = 128
    while footprint(TH, TC, Hp, img_buffers(Hp)) > VMEM_BUDGET and TH > 8:
        TH = max(8, TH // 2)
        Hp = _round_up(H, TH)
    vmem_limit = int(min(100 * 1024 * 1024,
                         max(32 * 1024 * 1024,
                             footprint(TH, TC, Hp, img_buffers(Hp)) * 5 // 4)))

    n_rows = Hp // TH
    n_cout = Cout_p // TC

    # ---- input prep: NCHW -> NHWC, bf16 cast, zero pad, flatten spatial ----
    # (one fused XLA pass; the final reshape is free)
    x_nhwc = jnp.transpose(x_nchw, (0, 2, 3, 1)).astype(jnp.bfloat16)
    x_pad = jnp.pad(x_nhwc, ((0, 0), (1, Hp - H + 1), (1, Wp - W - 1), (0, 0)))
    x_flat = x_pad.reshape(N, (Hp + 2) * Wp, Cin)

    image_mode = pl.Buffered(1) if img_buffers(Hp) == 1 else None
    kernel = _make_kernel(TH, Wp)

    out_flat = pl.pallas_call(
        kernel,
        out_shape=jax.ShapeDtypeStruct((N, Hp * Wp, Cout_p), out_dtype),
        grid_spec=pltpu.PrefetchScalarGridSpec(
            num_scalar_prefetch=0,
            grid=(N, n_cout, n_rows),
            in_specs=[
                # Whole padded image, resident per batch item.
                pl.BlockSpec((1, (Hp + 2) * Wp, Cin),
                             lambda n, j, r: (n, 0, 0),
                             pipeline_mode=image_mode),
                pl.BlockSpec((3, 3, Cin, TC), lambda n, j, r: (0, 0, 0, j)),
                pl.BlockSpec((1, TC), lambda n, j, r: (0, j)),
            ],
            out_specs=pl.BlockSpec((1, TH * Wp, TC), lambda n, j, r: (n, r, j)),
        ),
        compiler_params=pltpu.CompilerParams(
            dimension_semantics=("parallel", "parallel", "parallel"),
            vmem_limit_bytes=vmem_limit),
    )(x_flat, w_hwio, bias2d)

    return out_flat.reshape(N, Hp, Wp, Cout_p)


def _key_value_forward(x_nchw, w_hwio, bias2d, keydim, valdim, val_pass):
    _, _, H, W = x_nchw.shape
    out = _fused_conv3x3(x_nchw, w_hwio, bias2d)
    # Channel split + padded-row/col drop + NHWC->NCHW: one fused pass per output.
    key = jnp.transpose(out[:, :H, :W, :keydim], (0, 3, 1, 2))
    if val_pass:
        return key, x_nchw
    val = jnp.transpose(out[:, :H, :W, keydim:keydim + valdim], (0, 3, 1, 2))
    return key, val


class KeyValuePallas:
    """JAX/Pallas equivalent of the PyTorch KeyValue module (fused Key+Value conv)."""

    def __init__(self, indim, keydim, valdim, val_pass, key=None):
        self.keydim = keydim
        self.valdim = valdim
        self.val_pass = val_pass
        if key is None:
            key = jax.random.PRNGKey(0)
        k1, k2, k3, k4 = jax.random.split(key, 4)
        # PyTorch Conv2d default init: U(-1/sqrt(fan_in), +1/sqrt(fan_in)).
        fan_in = indim * 9
        bound = 1.0 / (fan_in ** 0.5)
        self.key_w = jax.random.uniform(k1, (keydim, indim, 3, 3),
                                        minval=-bound, maxval=bound, dtype=jnp.float32)
        self.key_b = jax.random.uniform(k2, (keydim,),
                                        minval=-bound, maxval=bound, dtype=jnp.float32)
        if not val_pass:
            self.val_w = jax.random.uniform(k3, (valdim, indim, 3, 3),
                                            minval=-bound, maxval=bound, dtype=jnp.float32)
            self.val_b = jax.random.uniform(k4, (valdim,),
                                            minval=-bound, maxval=bound, dtype=jnp.float32)
            w_oihw = jnp.concatenate([self.key_w, self.val_w], axis=0)
            b = jnp.concatenate([self.key_b, self.val_b], axis=0)
        else:
            w_oihw = self.key_w
            b = self.key_b
        # Fused Cout zero-padded to a multiple of 128 so output tiles are always
        # lane-dense; OIHW->HWIO transpose + bf16 cast done ONCE at init.
        cout = w_oihw.shape[0]
        cout_p = _round_up(cout, 128)
        w_hwio = jnp.transpose(w_oihw, (2, 3, 1, 0)).astype(jnp.bfloat16)
        self._w_hwio = jnp.pad(w_hwio, ((0, 0), (0, 0), (0, 0), (0, cout_p - cout)))
        self._b2d = jnp.pad(b, (0, cout_p - cout)).reshape(1, cout_p).astype(jnp.float32)
        self._fwd = jax.jit(_key_value_forward, static_argnums=(3, 4, 5))

    def __call__(self, x_nchw):
        return self._fwd(x_nchw, self._w_hwio, self._b2d,
                         self.keydim, self.valdim, self.val_pass)


def _conv_ref(x_nchw, w_oihw, bias):
    """Pure-JAX reference with matching precision (bf16 operands, f32 accumulate)."""
    out = jax.lax.conv_general_dilated(
        x_nchw.astype(jnp.bfloat16), w_oihw.astype(jnp.bfloat16),
        window_strides=(1, 1), padding=((1, 1), (1, 1)),
        dimension_numbers=("NCHW", "OIHW", "NCHW"),
        preferred_element_type=jnp.float32)
    return out + bias[None, :, None, None]


if __name__ == "__main__":
    # Small shapes consistent with the module: batch=2, indim=4, 16x16 spatial.
    N, Cin, H, W = 2, 4, 16, 16
    keydim, valdim = 8, 8

    root = jax.random.PRNGKey(0)
    xkey, mkey = jax.random.split(root)
    x = jax.random.normal(xkey, (N, Cin, H, W), dtype=jnp.float32)

    # Case 1: val_pass=False -> Key and Value convs run fused in ONE Pallas call.
    mod = KeyValuePallas(Cin, keydim, valdim, val_pass=False, key=mkey)
    key_out, val_out = mod(x)
    key_out = jax.block_until_ready(key_out)
    val_out = jax.block_until_ready(val_out)

    key_ref = _conv_ref(x, mod.key_w, mod.key_b)
    val_ref = _conv_ref(x, mod.val_w, mod.val_b)
    assert key_out.shape == (N, keydim, H, W)
    assert val_out.shape == (N, valdim, H, W)
    assert jnp.allclose(key_out, key_ref, atol=2e-3, rtol=2e-3)
    assert jnp.allclose(val_out, val_ref, atol=2e-3, rtol=2e-3)

    # Case 2: val_pass=True -> value is the identity passthrough, only Key conv runs.
    mod_p = KeyValuePallas(Cin, keydim, valdim, val_pass=True, key=mkey)
    key2, val2 = mod_p(x)
    key2 = jax.block_until_ready(key2)
    val2 = jax.block_until_ready(val2)
    assert key2.shape == (N, keydim, H, W)
    assert jnp.array_equal(val2, x)
    key2_ref = _conv_ref(x, mod_p.key_w, mod_p.key_b)
    assert jnp.allclose(key2, key2_ref, atol=2e-3, rtol=2e-3)

    print("KERNEL_OK")
</pallas_src>

<mosaic_0001>
module attributes {stable_mosaic.version = 11 : i64} {
  func.func @kernel(%arg0: i32, %arg1: i32, %arg2: i32, %arg3: memref<1x576x4xbf16, #tpu.memory_space<vmem>>, %arg4: memref<3x3x4x128xbf16, #tpu.memory_space<vmem>>, %arg5: memref<1x128xf32, #tpu.memory_space<vmem>>, %arg6: memref<1x512x128xf32, #tpu.memory_space<vmem>>) attributes {dimension_semantics = [#tpu.dimension_semantics<parallel>, #tpu.dimension_semantics<parallel>, #tpu.dimension_semantics<parallel>], iteration_bounds = array<i64: 2, 1, 1>, scalar_prefetch = 0 : i64, scratch_operands = 0 : i64, tpu.core_type = #tpu.core_type<tc>, window_params = [{transform_indices = @transform_0, window_bounds = array<i64: 1, 576, 4>}, {transform_indices = @transform_1, window_bounds = array<i64: 3, 3, 4, 128>}, {transform_indices = @transform_2, window_bounds = array<i64: 1, 128>}, {transform_indices = @transform_3, window_bounds = array<i64: 1, 512, 128>}]} {
    %c16_i32 = arith.constant 16 : i32
    %0 = arith.muli %arg2, %c16_i32 : i32
    %c0_i32 = arith.constant 0 : i32
    %1 = arith.addi %0, %c0_i32 : i32
    %c32_i32 = arith.constant 32 : i32
    %2 = arith.muli %1, %c32_i32 : i32
    %3 = tpu.assume_multiple %2, 32 : i32
    %c0 = arith.constant 0 : index
    %4 = arith.index_cast %3 : i32 to index
    %c0_0 = arith.constant 0 : index
    %5 = vector.load %arg3[%c0, %4, %c0_0] : memref<1x576x4xbf16, #tpu.memory_space<vmem>>, vector<1x512x4xbf16>
    %6 = vector.shape_cast %5 : vector<1x512x4xbf16> to vector<512x4xbf16>
    %c1_i32 = arith.constant 1 : i32
    %7 = arith.addi %0, %c1_i32 : i32
    %c32_i32_1 = arith.constant 32 : i32
    %8 = arith.muli %7, %c32_i32_1 : i32
    %9 = tpu.assume_multiple %8, 32 : i32
    %c0_2 = arith.constant 0 : index
    %10 = arith.index_cast %9 : i32 to index
    %c0_3 = arith.constant 0 : index
    %11 = vector.load %arg3[%c0_2, %10, %c0_3] : memref<1x576x4xbf16, #tpu.memory_space<vmem>>, vector<1x512x4xbf16>
    %12 = vector.shape_cast %11 : vector<1x512x4xbf16> to vector<512x4xbf16>
    %c2_i32 = arith.constant 2 : i32
    %13 = arith.addi %0, %c2_i32 : i32
    %c32_i32_4 = arith.constant 32 : i32
    %14 = arith.muli %13, %c32_i32_4 : i32
    %15 = tpu.assume_multiple %14, 32 : i32
    %c0_5 = arith.constant 0 : index
    %16 = arith.index_cast %15 : i32 to index
    %c0_6 = arith.constant 0 : index
    %17 = vector.load %arg3[%c0_5, %16, %c0_6] : memref<1x576x4xbf16, #tpu.memory_space<vmem>>, vector<1x512x4xbf16>
    %18 = vector.shape_cast %17 : vector<1x512x4xbf16> to vector<512x4xbf16>
    %c0_7 = arith.constant 0 : index
    %c0_8 = arith.constant 0 : index
    %c0_9 = arith.constant 0 : index
    %c0_10 = arith.constant 0 : index
    %19 = vector.load %arg4[%c0_7, %c0_8, %c0_9, %c0_10] : memref<3x3x4x128xbf16, #tpu.memory_space<vmem>>, vector<1x1x4x128xbf16>
    %20 = vector.shape_cast %19 : vector<1x1x4x128xbf16> to vector<4x128xbf16>
    %cst = arith.constant dense<0.000000e+00> : vector<512x128xf32>
    %21 = tpu.matmul %6, %20, %cst {dimension_numbers = #tpu.dot_dimension_numbers<[1], [0], [0], [1], [0, 0, 1, 1], [], []>} : vector<512x4xbf16>, vector<4x128xbf16>, vector<512x128xf32> -> vector<512x128xf32>
    %c1 = arith.constant 1 : index
    %c0_11 = arith.constant 0 : index
    %c0_12 = arith.constant 0 : index
    %c0_13 = arith.constant 0 : index
    %22 = vector.load %arg4[%c1, %c0_11, %c0_12, %c0_13] : memref<3x3x4x128xbf16, #tpu.memory_space<vmem>>, vector<1x1x4x128xbf16>
    %23 = vector.shape_cast %22 : vector<1x1x4x128xbf16> to vector<4x128xbf16>
    %cst_14 = arith.constant dense<0.000000e+00> : vector<512x128xf32>
    %24 = tpu.matmul %12, %23, %cst_14 {dimension_numbers = #tpu.dot_dimension_numbers<[1], [0], [0], [1], [0, 0, 1, 1], [], []>} : vector<512x4xbf16>, vector<4x128xbf16>, vector<512x128xf32> -> vector<512x128xf32>
    %25 = arith.addf %21, %24 : vector<512x128xf32>
    %c2 = arith.constant 2 : index
    %c0_15 = arith.constant 0 : index
    %c0_16 = arith.constant 0 : index
    %c0_17 = arith.constant 0 : index
    %26 = vector.load %arg4[%c2, %c0_15, %c0_16, %c0_17] : memref<3x3x4x128xbf16, #tpu.memory_space<vmem>>, vector<1x1x4x128xbf16>
    %27 = vector.shape_cast %26 : vector<1x1x4x128xbf16> to vector<4x128xbf16>
    %cst_18 = arith.constant dense<0.000000e+00> : vector<512x128xf32>
    %28 = tpu.matmul %18, %27, %cst_18 {dimension_numbers = #tpu.dot_dimension_numbers<[1], [0], [0], [1], [0, 0, 1, 1], [], []>} : vector<512x4xbf16>, vector<4x128xbf16>, vector<512x128xf32> -> vector<512x128xf32>
    %29 = arith.addf %25, %28 : vector<512x128xf32>
    %c0_19 = arith.constant 0 : index
    %c1_20 = arith.constant 1 : index
    %c0_21 = arith.constant 0 : index
    %c0_22 = arith.constant 0 : index
    %30 = vector.load %arg4[%c0_19, %c1_20, %c0_21, %c0_22] : memref<3x3x4x128xbf16, #tpu.memory_space<vmem>>, vector<1x1x4x128xbf16>
    %31 = vector.shape_cast %30 : vector<1x1x4x128xbf16> to vector<4x128xbf16>
    %cst_23 = arith.constant dense<0.000000e+00> : vector<512x128xf32>
    %32 = tpu.matmul %6, %31, %cst_23 {dimension_numbers = #tpu.dot_dimension_numbers<[1], [0], [0], [1], [0, 0, 1, 1], [], []>} : vector<512x4xbf16>, vector<4x128xbf16>, vector<512x128xf32> -> vector<512x128xf32>
    %c1_24 = arith.constant 1 : index
    %c1_25 = arith.constant 1 : index
    %c0_26 = arith.constant 0 : index
    %c0_27 = arith.constant 0 : index
    %33 = vector.load %arg4[%c1_24, %c1_25, %c0_26, %c0_27] : memref<3x3x4x128xbf16, #tpu.memory_space<vmem>>, vector<1x1x4x128xbf16>
    %34 = vector.shape_cast %33 : vector<1x1x4x128xbf16> to vector<4x128xbf16>
    %cst_28 = arith.constant dense<0.000000e+00> : vector<512x128xf32>
    %35 = tpu.matmul %12, %34, %cst_28 {dimension_numbers = #tpu.dot_dimension_numbers<[1], [0], [0], [1], [0, 0, 1, 1], [], []>} : vector<512x4xbf16>, vector<4x128xbf16>, vector<512x128xf32> -> vector<512x128xf32>
    %36 = arith.addf %32, %35 : vector<512x128xf32>
    %c2_29 = arith.constant 2 : index
    %c1_30 = arith.constant 1 : index
    %c0_31 = arith.constant 0 : index
    %c0_32 = arith.constant 0 : index
    %37 = vector.load %arg4[%c2_29, %c1_30, %c0_31, %c0_32] : memref<3x3x4x128xbf16, #tpu.memory_space<vmem>>, vector<1x1x4x128xbf16>
    %38 = vector.shape_cast %37 : vector<1x1x4x128xbf16> to vector<4x128xbf16>
    %cst_33 = arith.constant dense<0.000000e+00> : vector<512x128xf32>
    %39 = tpu.matmul %18, %38, %cst_33 {dimension_numbers = #tpu.dot_dimension_numbers<[1], [0], [0], [1], [0, 0, 1, 1], [], []>} : vector<512x4xbf16>, vector<4x128xbf16>, vector<512x128xf32> -> vector<512x128xf32>
    %40 = arith.addf %36, %39 : vector<512x128xf32>
    %41 = vector.extract_strided_slice %40 {offsets = [1, 0], sizes = [511, 128], strides = [1, 1]} : vector<512x128xf32> to vector<511x128xf32>
    %42 = vector.extract_strided_slice %40 {offsets = [0, 0], sizes = [1, 128], strides = [1, 1]} : vector<512x128xf32> to vector<1x128xf32>
    %43 = tpu.concatenate %41, %42 in 0 : vector<511x128xf32>, vector<1x128xf32> -> vector<512x128xf32>
    %44 = arith.addf %29, %43 : vector<512x128xf32>
    %c0_34 = arith.constant 0 : index
    %c2_35 = arith.constant 2 : index
    %c0_36 = arith.constant 0 : index
    %c0_37 = arith.constant 0 : index
    %45 = vector.load %arg4[%c0_34, %c2_35, %c0_36, %c0_37] : memref<3x3x4x128xbf16, #tpu.memory_space<vmem>>, vector<1x1x4x128xbf16>
    %46 = vector.shape_cast %45 : vector<1x1x4x128xbf16> to vector<4x128xbf16>
    %cst_38 = arith.constant dense<0.000000e+00> : vector<512x128xf32>
    %47 = tpu.matmul %6, %46, %cst_38 {dimension_numbers = #tpu.dot_dimension_numbers<[1], [0], [0], [1], [0, 0, 1, 1], [], []>} : vector<512x4xbf16>, vector<4x128xbf16>, vector<512x128xf32> -> vector<512x128xf32>
    %c1_39 = arith.constant 1 : index
    %c2_40 = arith.constant 2 : index
    %c0_41 = arith.constant 0 : index
    %c0_42 = arith.constant 0 : index
    %48 = vector.load %arg4[%c1_39, %c2_40, %c0_41, %c0_42] : memref<3x3x4x128xbf16, #tpu.memory_space<vmem>>, vector<1x1x4x128xbf16>
    %49 = vector.shape_cast %48 : vector<1x1x4x128xbf16> to vector<4x128xbf16>
    %cst_43 = arith.constant dense<0.000000e+00> : vector<512x128xf32>
    %50 = tpu.matmul %12, %49, %cst_43 {dimension_numbers = #tpu.dot_dimension_numbers<[1], [0], [0], [1], [0, 0, 1, 1], [], []>} : vector<512x4xbf16>, vector<4x128xbf16>, vector<512x128xf32> -> vector<512x128xf32>
    %51 = arith.addf %47, %50 : vector<512x128xf32>
    %c2_44 = arith.constant 2 : index
    %c2_45 = arith.constant 2 : index
    %c0_46 = arith.constant 0 : index
    %c0_47 = arith.constant 0 : index
    %52 = vector.load %arg4[%c2_44, %c2_45, %c0_46, %c0_47] : memref<3x3x4x128xbf16, #tpu.memory_space<vmem>>, vector<1x1x4x128xbf16>
    %53 = vector.shape_cast %52 : vector<1x1x4x128xbf16> to vector<4x128xbf16>
    %cst_48 = arith.constant dense<0.000000e+00> : vector<512x128xf32>
    %54 = tpu.matmul %18, %53, %cst_48 {dimension_numbers = #tpu.dot_dimension_numbers<[1], [0], [0], [1], [0, 0, 1, 1], [], []>} : vector<512x4xbf16>, vector<4x128xbf16>, vector<512x128xf32> -> vector<512x128xf32>
    %55 = arith.addf %51, %54 : vector<512x128xf32>
    %56 = vector.extract_strided_slice %55 {offsets = [2, 0], sizes = [510, 128], strides = [1, 1]} : vector<512x128xf32> to vector<510x128xf32>
    %57 = vector.extract_strided_slice %55 {offsets = [0, 0], sizes = [2, 128], strides = [1, 1]} : vector<512x128xf32> to vector<2x128xf32>
    %58 = tpu.concatenate %56, %57 in 0 : vector<510x128xf32>, vector<2x128xf32> -> vector<512x128xf32>
    %59 = arith.addf %44, %58 : vector<512x128xf32>
    %c0_49 = arith.constant 0 : index
    %c0_50 = arith.constant 0 : index
    %60 = vector.load %arg5[%c0_49, %c0_50] : memref<1x128xf32, #tpu.memory_space<vmem>>, vector<1x128xf32>
    %61 = vector.broadcast %60 : vector<1x128xf32> to vector<512x128xf32>
    %62 = arith.addf %59, %61 : vector<512x128xf32>
    %c0_51 = arith.constant 0 : index
    %c0_52 = arith.constant 0 : index
    %c0_53 = arith.constant 0 : index
    %63 = vector.load %arg6[%c0_51, %c0_52, %c0_53] : memref<1x512x128xf32, #tpu.memory_space<vmem>>, vector<1x512x128xf32>
    %64 = vector.shape_cast %63 : vector<1x512x128xf32> to vector<512x128xf32>
    %65 = vector.shape_cast %62 : vector<512x128xf32> to vector<1x512x128xf32>
    tpu.vector_store %arg6[%c0_51, %c0_52, %c0_53], %65 {strides = array<i32>} : memref<1x512x128xf32, #tpu.memory_space<vmem>>, vector<1x512x128xf32>,
    return
  }
  func.func @transform_0(%arg0: i32, %arg1: i32, %arg2: i32) -> (i32, i32, i32) {
    %c0_i32 = arith.constant 0 : i32
    %c0_i32_0 = arith.constant 0 : i32
    %c0_i32_1 = arith.constant 0 : i32
    return %arg0, %c0_i32, %c0_i32_0 : i32, i32, i32
  }
  func.func @transform_1(%arg0: i32, %arg1: i32, %arg2: i32) -> (i32, i32, i32, i32) {
    %c0_i32 = arith.constant 0 : i32
    %c0_i32_0 = arith.constant 0 : i32
    %c0_i32_1 = arith.constant 0 : i32
    %c0_i32_2 = arith.constant 0 : i32
    return %c0_i32, %c0_i32_0, %c0_i32_1, %arg1 : i32, i32, i32, i32
  }
  func.func @transform_2(%arg0: i32, %arg1: i32, %arg2: i32) -> (i32, i32) {
    %c0_i32 = arith.constant 0 : i32
    %c0_i32_0 = arith.constant 0 : i32
    return %c0_i32, %arg1 : i32, i32
  }
  func.func @transform_3(%arg0: i32, %arg1: i32, %arg2: i32) -> (i32, i32, i32) {
    %c0_i32 = arith.constant 0 : i32
    return %arg0, %arg2, %arg1 : i32, i32, i32
  }
}

</mosaic_0001>

<bundles_post_ra>
// kernel: _key_value_forward.1
= control target key start
LH: loop header
LB: loop body
LE: loop exit
PB: predicated region body
PF: predicated region fallthrough
CT: control target
= control target key end

     0   :  { %s6663_s12 = smov 0   ;;  %s6665_s13 = smov 0   ;;  %s8868_s0 = inlined_call_operand.vmem [shape: bf16[2,576,4], index: 0, kind: input, shape index: {}]   ;;  %s8869_s1 = inlined_call_operand.vmem [shape: bf16[3,3,4,128], index: 1, kind: input, shape index: {}]   ;;  %s8870_s2 = inlined_call_operand.vmem [shape: f32[1,128], index: 2, kind: input, shape index: {}]   ;;  %s8871_s3 = inlined_call_operand.vmem [shape: f32[2,512,128], index: 3, kind: output, shape index: {}]  }
   0x1   :  { %s6667_s14 = smov 0  }
   0x2 LB: > { %s32_s15 = sadd.s32 1, %s6637_s13  ;;  %p4970_p0 = scmp.ge.s32.totalorder %s6641_s14, 1  ;;  %s6641_s14 = sphi %s6667_s14, %s13_s14   ;;  %s6637_s13 = sphi %s6665_s13, %s9388_s13   ;;  %s6633_s12 = sphi %s6663_s12, %s9387_s12  }
   0x3   : > { %p34_p1 = scmp.ge.s32.totalorder %s32_s15, 2  ;;  %p177_p2 = scmp.lt.s32.totalorder %s6641_s14, 3 }
   0x5   : > { %s9390_s15 = smov (%p34_p1, %s32_s15), 0  ;;  %p178_p3 = pnand %p4970_p0, %p177_p2 }
   0x7   : > { %181 = sbr.rel (%p178_p3) target bundleno = 800 (0x320), region = 32 }
   0xc   : > { %v5102_v0 = vld [vmem:[%s8869_s1 + $0x6] sm:$0x3]  ;;  %vm711_vm0 = vcmask 1041408   ;;  %p215_p4 = scmp.lt.s32.totalorder %s6633_s12, 1  ;;  %v451_v2 = vld [vmem:[%s8869_s1] sm:$0x3] }
   0xd   : > { %6392 = vmatprep.subr.msk.bf16.mxu1 %vm711_vm0, %v5102_v0  ;;  %6391 = vmatprep.subr.msk.bf16.mxu0 %vm711_vm0, %v5102_v0  ;;  %v713_v1 = vsel %vm711_vm0, %v5102_v0, 0  ;;  %v5231_v3 = vld [vmem:[%s8869_s1 + $0xc] sm:$0x3]  ;;  %vm614_vm1 = vcmask 31744   ;;  %v6718_v8 = vld [vmem:[%s8869_s1 + $0x8] sm:$0x3] }
   0xe   : > { %6390 = vmatpush3.bf16.msra.mxu1 %v713_v1  ;;  %5796 = vmatpush3.bf16.msra.mxu0 %v713_v1  ;;  %s9392_s12 = smov (!%p215_p4, %s6633_s12), 1  ;;  %v1811_v7 = vsel %vm711_vm0, %v5231_v3, 0  ;;  %v1261_v10 = vsel %vm711_vm0, %v451_v2, 0  ;;  %v6729_v11 = vld [vmem:[%s8869_s1 + $0x2] sm:$0x3]  ;;  %v2171_v46 = vsel %vm711_vm0, %v6718_v8, 0 }
   0xf   : > { %6393 = vmatprep.subr.msk.bf16.mxu1 %vm711_vm0, %v451_v2  ;;  %6394 = vmatprep.subr.msk.bf16.mxu0 %vm711_vm0, %v5231_v3  ;;  %s6401_s22 = smul.u32 288, %s9392_s12  ;;  %v2463_v44 = vsel %vm711_vm0, %v6729_v11, 0  ;;  %v6979_v61 = vld [vmem:[%s8869_s1 + $0xe] sm:$0x3]  ;;  %v6984_v62 = vld [vmem:[%s8869_s1 + $0xa] sm:$0x3] }
  0x10   : > { %vm3176_vm2 = vcmask 1046528   ;;  %vm4444_vm3 = vcmask 1045504   ;;  %s5497_s11 = sshll.u32 %s9392_s12, 9 }
  0x11   : > { %s6701_s25 = scalar_lea.vmem %s8868_s0, %s6401_s22  ;;  %s8546_s12 = scalar_lea.vmem %s8871_s3, %s5497_s11 }
  0x12   : > { %v6704_v4 = vld [vmem:[%s6701_s25 + $0x10] sm:$0xff]   ;;  %v6712_v6 = vld [vmem:[%s6701_s25 + $0x18] sm:$0xff]   ;;  %v6734_v12 = vld [vmem:[%s6701_s25 + $0x20] sm:$0xff]  }
  0x13   : > { %v6707_v5 = vld [vmem:[%s6701_s25 + $0x90] sm:$0xff]   ;;  %5797 = vmatprep.mubr.msk.bf16.mxu0 %vm614_vm1, %v6704_v4  ;;  %v6723_v9 = vld [vmem:[%s6701_s25 + $0x98] sm:$0xff]   ;;  %v6739_v13 = vld [vmem:[%s6701_s25 + $0xa0] sm:$0xff]  }
  0x14   : > { %5829 = vmatprep.mubr.msk.bf16.mxu1 %vm614_vm1, %v6707_v5  ;;  %5798 = vmatmul.mubr.msk.bf16.vlgmr.msra.gmra.mxu0 %vm614_vm1, %v6712_v6  ;;  %v6746_v14 = vld [vmem:[%s6701_s25 + $0x28] sm:$0xff]   ;;  %v6756_v16 = vld [vmem:[%s6701_s25 + $0x30] sm:$0xff]   ;;  %v6770_v18 = vld [vmem:[%s6701_s25 + $0x38] sm:$0xff]  }
  0x15   : > { %5830 = vmatmul.mubr.msk.bf16.vlgmr.msra.gmra.mxu1 %vm614_vm1, %v6723_v9  ;;  %5928 = vmatpush3.bf16.msra.mxu0 %v1811_v7  ;;  %v6751_v15 = vld [vmem:[%s6701_s25 + $0xa8] sm:$0xff]   ;;  %v6759_v17 = vld [vmem:[%s6701_s25 + $0xb0] sm:$0xff]   ;;  %v6773_v19 = vld [vmem:[%s6701_s25 + $0xb8] sm:$0xff]  }
  0x16   : > { %5862 = vmatpush3.bf16.msra.mxu1 %v1261_v10  ;;  %5801 = vmatprep.mubr.msk.bf16.mxu0 %vm614_vm1, %v6734_v12  ;;  %v6776_v20 = vld [vmem:[%s6701_s25 + $0x40] sm:$0xff]   ;;  %v6790_v22 = vld [vmem:[%s6701_s25 + $0x48] sm:$0xff]   ;;  %v6796_v24 = vld [vmem:[%s6701_s25 + $0x50] sm:$0xff]  }
  0x17   : > { %5833 = vmatprep.mubr.msk.bf16.mxu1 %vm614_vm1, %v6739_v13  ;;  %6395 = vmatprep.subr.msk.bf16.mxu1 %vm711_vm0, %v6718_v8  ;;  %v6779_v21 = vld [vmem:[%s6701_s25 + $0xc0] sm:$0xff]   ;;  %v6793_v23 = vld [vmem:[%s6701_s25 + $0xc8] sm:$0xff]   ;;  %v6799_v25 = vld [vmem:[%s6701_s25 + $0xd0] sm:$0xff]  }
  0x18   : > { %6396 = vmatprep.subr.msk.bf16.mxu0 %vm711_vm0, %v6729_v11  ;;  %v6810_v26 = vld [vmem:[%s6701_s25 + $0x58] sm:$0xff]   ;;  %v6816_v28 = vld [vmem:[%s6701_s25 + $0x60] sm:$0xff]   ;;  %v6830_v30 = vld [vmem:[%s6701_s25 + $0x68] sm:$0xff]  }
  0x19   : > { %v6813_v27 = vld [vmem:[%s6701_s25 + $0xd8] sm:$0xff]   ;;  %v6819_v29 = vld [vmem:[%s6701_s25 + $0xe0] sm:$0xff]   ;;  %v6833_v31 = vld [vmem:[%s6701_s25 + $0xe8] sm:$0xff]  }
  0x1a   : > { %8907 = vst [vmem:[#allocation2_spill] sm:$0xff] %v6833_v31  ;;  %v6836_v32 = vld [vmem:[%s6701_s25 + $0x70] sm:$0xff]   ;;  %v6850_v34 = vld [vmem:[%s6701_s25 + $0x78] sm:$0xff]   ;;  %v6856_v36 = vld [vmem:[%s6701_s25 + $0x80] sm:$0xff]  }
  0x1b   : > { %v6839_v33 = vld [vmem:[%s6701_s25 + $0xf0] sm:$0xff]   ;;  %v6853_v35 = vld [vmem:[%s6701_s25 + $0xf8] sm:$0xff]   ;;  %v6859_v37 = vld [vmem:[%s6701_s25 + $0x100] sm:$0xff]  }
  0x1c   : > { %5802 = vmatmul.mubr.msk.bf16.gmra.mxu0 %vm614_vm1, %v6746_v14  ;;  %8908 = vst [vmem:[#allocation3_spill] sm:$0xff] %v6839_v33  ;;  %8909 = vst [vmem:[#allocation4_spill] sm:$0xff] %v6853_v35  ;;  %v6870_v38 = vld [vmem:[%s6701_s25 + $0x88] sm:$0xff]   ;;  %v6876_v40 = vld [vmem:[%s6701_s25 + $0x20] sm:$0xff]  }
  0x1d   : > { %5834 = vmatmul.mubr.msk.bf16.gmra.mxu1 %vm614_vm1, %v6751_v15  ;;  %5805 = vmatprep.mubr.msk.bf16.mxu0 %vm614_vm1, %v6756_v16  ;;  %8910 = vst [vmem:[#allocation5_spill] sm:$0xff] %v6859_v37  ;;  %v6873_v39 = vld [vmem:[%s6701_s25 + $0x108] sm:$0xff]   ;;  %8912 = vst [vmem:[#allocation7_spill] sm:$0xff] %v6876_v40  ;;  %v6879_v41 = vld [vmem:[%s6701_s25] sm:$0xff]  }
  0x1e   : > { %5837 = vmatprep.mubr.msk.bf16.mxu1 %vm614_vm1, %v6759_v17  ;;  %8911 = vst [vmem:[#allocation6_spill] sm:$0xff] %v6873_v39  ;;  %v6890_v42 = vld [vmem:[%s6701_s25 + $0x28] sm:$0xff]   ;;  %v6898_v45 = vld [vmem:[%s6701_s25 + $0x10] sm:$0xff]   ;;  %v6914_v48 = vld [vmem:[%s6701_s25 + $0x18] sm:$0xff]  }
  0x1f   : > { %8913 = vst [vmem:[#allocation8_spill] sm:$0xff] %v6890_v42  ;;  %v6893_v43 = vld [vmem:[%s6701_s25 + $0x8] sm:$0xff]   ;;  %v6903_v47 = vld [vmem:[%s6701_s25 + $0x30] sm:$0xff]   ;;  %v6917_v49 = vld [vmem:[%s6701_s25 + $0x38] sm:$0xff]  }
  0x20   : > { %8914 = vst [vmem:[#allocation9_spill] sm:$0xff] %v6903_v47  ;;  %8915 = vst [vmem:[#allocation10_spill] sm:$0xff] %v6917_v49  ;;  %v6920_v50 = vld [vmem:[%s6701_s25 + $0x40] sm:$0xff]   ;;  %v6934_v52 = vld [vmem:[%s6701_s25 + $0x28] sm:$0xff]  }
  0x21   : > { %8916 = vst [vmem:[#allocation11_spill] sm:$0xff] %v6920_v50  ;;  %v6923_v51 = vld [vmem:[%s6701_s25 + $0x20] sm:$0xff]   ;;  %v6937_v53 = vld [vmem:[%s6701_s25 + $0x48] sm:$0xff]   ;;  %v6940_v54 = vld [vmem:[%s6701_s25 + $0x50] sm:$0xff]  }
  0x22   : > { %8917 = vst [vmem:[#allocation12_spill] sm:$0xff] %v6937_v53  ;;  %8918 = vst [vmem:[#allocation13_spill] sm:$0xff] %v6940_v54  ;;  %v6943_v55 = vld [vmem:[%s6701_s25 + $0x30] sm:$0xff]   ;;  %v6954_v56 = vld [vmem:[%s6701_s25 + $0x38] sm:$0xff]  }
  0x23   : > { %v6957_v57 = vld [vmem:[%s6701_s25 + $0x58] sm:$0xff]   ;;  %v6960_v58 = vld [vmem:[%s6701_s25 + $0x60] sm:$0xff]   ;;  %v6974_v60 = vld [vmem:[%s6701_s25 + $0x68] sm:$0xff]  }
  0x24   : > { %5806 = vmatmul.mubr.msk.bf16.gmra.mxu0 %vm614_vm1, %v6770_v18  ;;  %8919 = vst [vmem:[#allocation14_spill] sm:$0xff] %v6957_v57  ;;  %8920 = vst [vmem:[#allocation15_spill] sm:$0xff] %v6960_v58  ;;  %v6963_v59 = vld [vmem:[%s6701_s25 + $0x40] sm:$0xff]   ;;  %v6987_v63 = vld [vmem:[%s6701_s25 + $0x48] sm:$0xff]  }
  0x25   : > { %5838 = vmatmul.mubr.msk.bf16.gmra.mxu1 %vm614_vm1, %v6773_v19  ;;  %5809 = vmatprep.mubr.msk.bf16.mxu0 %vm614_vm1, %v6776_v20  ;;  %8921 = vst [vmem:[#allocation16_spill] sm:$0xff] %v6974_v60  ;;  %v6990_v0 = vld [vmem:[%s6701_s25 + $0x70] sm:$0xff]   ;;  %v7008_v2 = vld [vmem:[%s6701_s25 + $0x78] sm:$0xff]   ;;  %v7014_v7 = vld [vmem:[%s6701_s25 + $0x80] sm:$0xff]  }
  0x26   : > { %5841 = vmatprep.mubr.msk.bf16.mxu1 %vm614_vm1, %v6779_v21  ;;  %8922 = vst [vmem:[#allocation17_spill] sm:$0xff] %v6990_v0  ;;  %v6997_v1 = vld [vmem:[%s6701_s25 + $0x50] sm:$0xff]   ;;  %8923 = vst [vmem:[#allocation18_spill] sm:$0xff] %v7008_v2  ;;  %v7011_v3 = vld [vmem:[%s6701_s25 + $0x58] sm:$0xff]  }
  0x27   : > { %8924 = vst [vmem:[#allocation19_spill] sm:$0xff] %v7014_v7  ;;  %v7017_v8 = vld [vmem:[%s6701_s25 + $0x60] sm:$0xff]   ;;  %v7028_v10 = vld [vmem:[%s6701_s25 + $0x88] sm:$0xff]  }
  0x28   : > { %8925 = vst [vmem:[#allocation20_spill] sm:$0xff] %v7028_v10  ;;  %v7031_v11 = vld [vmem:[%s6701_s25 + $0x68] sm:$0xff]  }
  0x2c   : > { %5810 = vmatmul.mubr.msk.bf16.gmra.mxu0 %vm614_vm1, %v6790_v22 }
  0x2d   : > { %5842 = vmatmul.mubr.msk.bf16.gmra.mxu1 %vm614_vm1, %v6793_v23  ;;  %5813 = vmatprep.mubr.msk.bf16.mxu0 %vm614_vm1, %v6796_v24 }
  0x2e   : > { %5845 = vmatprep.mubr.msk.bf16.mxu1 %vm614_vm1, %v6799_v25 }
  0x34   : > { %5814 = vmatmul.mubr.msk.bf16.gmra.mxu0 %vm614_vm1, %v6810_v26 }
  0x35   : > { %5846 = vmatmul.mubr.msk.bf16.gmra.mxu1 %vm614_vm1, %v6813_v27  ;;  %5817 = vmatprep.mubr.msk.bf16.mxu0 %vm614_vm1, %v6816_v28 }
  0x36   : > { %5849 = vmatprep.mubr.msk.bf16.mxu1 %vm614_vm1, %v6819_v29 }
  0x3c   : > { %5818 = vmatmul.mubr.msk.bf16.gmra.mxu0 %vm614_vm1, %v6830_v30 }
  0x3d   : > { %5850 = vmatmul.mubr.msk.bf16.gmra.mxu1 %vm614_vm1, %v6833_v31  ;;  %5821 = vmatprep.mubr.msk.bf16.mxu0 %vm614_vm1, %v6836_v32  ;;  %v7175_v31 = vld [vmem:[%s6701_s25 + $0xf0] sm:$0xff]  }
  0x3e   : > { %5853 = vmatprep.mubr.msk.bf16.mxu1 %vm614_vm1, %v6839_v33  ;;  %v6519_v33 = vld [vmem:[%s6701_s25 + $0x110] sm:$0xff]   ;;  %8935 = vst [vmem:[#allocation30_spill] sm:$0xff] %v7175_v31 }
  0x44   : > { %5822 = vmatmul.mubr.msk.bf16.gmra.mxu0 %vm614_vm1, %v6850_v34 }
  0x45   : > { %5854 = vmatmul.mubr.msk.bf16.gmra.mxu1 %vm614_vm1, %v6853_v35  ;;  %5825 = vmatprep.mubr.msk.bf16.mxu0 %vm614_vm1, %v6856_v36  ;;  %v7161_v35 = vld [vmem:[%s6701_s25 + $0xe0] sm:$0xff]  }
  0x46   : > { %5857 = vmatprep.mubr.msk.bf16.mxu1 %vm614_vm1, %v6859_v37  ;;  %v6515_v37 = vld [vmem:[%s6701_s25 + $0x100] sm:$0xff]  }
  0x4c   : > { %5826 = vmatmul.mubr.msk.bf16.gmra.mxu0 %vm614_vm1, %v6870_v38 }
  0x4d   : > { %5858 = vmatmul.mubr.msk.bf16.gmra.mxu1 %vm614_vm1, %v6873_v39  ;;  %5929 = vmatprep.mubr.msk.bf16.mxu0 %vm614_vm1, %v6876_v40  ;;  %v6511_v40 = vld [vmem:[%s6701_s25 + $0xf0] sm:$0xff]  }
  0x4e   : > { %5863 = vmatprep.mubr.msk.bf16.mxu1 %vm614_vm1, %v6879_v41  ;;  %v7147_v39 = vld [vmem:[%s6701_s25 + $0xd0] sm:$0xff]  }
  0x54   : > { %5930 = vmatmul.mubr.msk.bf16.vlgmr.msra.gmra.mxu0 %vm614_vm1, %v6890_v42  ;;  %v7133_v42 = vld [vmem:[%s6701_s25 + $0xc0] sm:$0xff]  }
  0x55   : > { %5864 = vmatmul.mubr.msk.bf16.vlgmr.msra.gmra.mxu1 %vm614_vm1, %v6893_v43  ;;  %6060 = vmatpush3.bf16.msra.mxu0 %v2463_v44  ;;  %v7034_v44 = vld [vmem:[%s6701_s25 + $0x90] sm:$0xff]  }
  0x56   : > { %5994 = vmatpush3.bf16.msra.mxu1 %v2171_v46  ;;  %5867 = vmatprep.mubr.msk.bf16.mxu1 %vm614_vm1, %v6898_v45  ;;  %8926 = vst [vmem:[#allocation21_spill] sm:$0xff] %v7034_v44  ;;  %v7037_v46 = vld [vmem:[%s6701_s25 + $0x70] sm:$0xff]  }
  0x57   : > { %5933 = vmatprep.mubr.msk.bf16.mxu0 %vm614_vm1, %v6903_v47  ;;  %6397 = vmatprep.subr.msk.bf16.mxu1 %vm711_vm0, %v6979_v61  ;;  %v6507_v47 = vld [vmem:[%s6701_s25 + $0xe0] sm:$0xff]  }
  0x58   : > { %6398 = vmatprep.subr.msk.bf16.mxu0 %vm711_vm0, %v6984_v62 }
  0x5c   : > { %5934 = vmatmul.mubr.msk.bf16.gmra.mxu0 %vm614_vm1, %v6917_v49  ;;  %v7117_v49 = vld [vmem:[%s6701_s25 + $0xb0] sm:$0xff]  }
  0x5d   : > { %5868 = vmatmul.mubr.msk.bf16.gmra.mxu1 %vm614_vm1, %v6914_v48  ;;  %5937 = vmatprep.mubr.msk.bf16.mxu0 %vm614_vm1, %v6920_v50  ;;  %v7114_v50 = vld [vmem:[%s6701_s25 + $0xd0] sm:$0xff]  }
  0x5e   : > { %5871 = vmatprep.mubr.msk.bf16.mxu1 %vm614_vm1, %v6923_v51  ;;  %8934 = vst [vmem:[#allocation29_spill] sm:$0xff] %v7114_v50 }
  0x64   : > { %5938 = vmatmul.mubr.msk.bf16.gmra.mxu0 %vm614_vm1, %v6937_v53  ;;  %v7097_v53 = vld [vmem:[%s6701_s25 + $0xa0] sm:$0xff]  }
  0x65   : > { %5872 = vmatmul.mubr.msk.bf16.gmra.mxu1 %vm614_vm1, %v6934_v52  ;;  %5941 = vmatprep.mubr.msk.bf16.mxu0 %vm614_vm1, %v6940_v54  ;;  %v7094_v54 = vld [vmem:[%s6701_s25 + $0xc0] sm:$0xff]  }
  0x66   : > { %5875 = vmatprep.mubr.msk.bf16.mxu1 %vm614_vm1, %v6943_v55  ;;  %8932 = vst [vmem:[#allocation27_spill] sm:$0xff] %v7094_v54 }
  0x6c   : > { %5942 = vmatmul.mubr.msk.bf16.gmra.mxu0 %vm614_vm1, %v6957_v57  ;;  %v7077_v57 = vld [vmem:[%s6701_s25 + $0x90] sm:$0xff]  }
  0x6d   : > { %5876 = vmatmul.mubr.msk.bf16.gmra.mxu1 %vm614_vm1, %v6954_v56  ;;  %5945 = vmatprep.mubr.msk.bf16.mxu0 %vm614_vm1, %v6960_v58  ;;  %v7074_v58 = vld [vmem:[%s6701_s25 + $0xb0] sm:$0xff]  }
  0x6e   : > { %5879 = vmatprep.mubr.msk.bf16.mxu1 %vm614_vm1, %v6963_v59  ;;  %8930 = vst [vmem:[#allocation25_spill] sm:$0xff] %v7074_v58 }
  0x74   : > { %5946 = vmatmul.mubr.msk.bf16.gmra.mxu0 %vm614_vm1, %v6974_v60  ;;  %v7057_v60 = vld [vmem:[%s6701_s25 + $0x80] sm:$0xff]  }
  0x75   : > { %5880 = vmatmul.mubr.msk.bf16.gmra.mxu1 %vm614_vm1, %v6987_v63  ;;  %5949 = vmatprep.mubr.msk.bf16.mxu0 %vm614_vm1, %v6990_v0  ;;  %v7054_v0 = vld [vmem:[%s6701_s25 + $0xa0] sm:$0xff]  }
  0x76   : > { %5883 = vmatprep.mubr.msk.bf16.mxu1 %vm614_vm1, %v6997_v1  ;;  %8928 = vst [vmem:[#allocation23_spill] sm:$0xff] %v7054_v0 }
  0x7c   : > { %5950 = vmatmul.mubr.msk.bf16.gmra.mxu0 %vm614_vm1, %v7008_v2  ;;  %v7051_v2 = vld [vmem:[%s6701_s25 + $0x78] sm:$0xff]  }
  0x7d   : > { %5884 = vmatmul.mubr.msk.bf16.gmra.mxu1 %vm614_vm1, %v7011_v3  ;;  %5953 = vmatprep.mubr.msk.bf16.mxu0 %vm614_vm1, %v7014_v7  ;;  %v7048_v7 = vld [vmem:[%s6701_s25 + $0x98] sm:$0xff]  }
  0x7e   : > { %5887 = vmatprep.mubr.msk.bf16.mxu1 %vm614_vm1, %v7017_v8  ;;  %8927 = vst [vmem:[#allocation22_spill] sm:$0xff] %v7048_v7 }
  0x84   : > { %5954 = vmatmul.mubr.msk.bf16.gmra.mxu0 %vm614_vm1, %v7028_v10  ;;  %v7071_v10 = vld [vmem:[%s6701_s25 + $0x88] sm:$0xff]  }
  0x85   : > { %5888 = vmatmul.mubr.msk.bf16.gmra.mxu1 %vm614_vm1, %v7031_v11  ;;  %5957 = vmatprep.mubr.msk.bf16.mxu0 %vm614_vm1, %v7034_v44  ;;  %v7068_v44 = vld [vmem:[%s6701_s25 + $0xa8] sm:$0xff]  }
  0x86   : > { %5891 = vmatprep.mubr.msk.bf16.mxu1 %vm614_vm1, %v7037_v46  ;;  %8929 = vst [vmem:[#allocation24_spill] sm:$0xff] %v7068_v44 }
  0x8c   : > { %5958 = vmatmul.mubr.msk.bf16.gmra.mxu0 %vm614_vm1, %v7048_v7  ;;  %v7091_v7 = vld [vmem:[%s6701_s25 + $0x98] sm:$0xff]  }
  0x8d   : > { %5892 = vmatmul.mubr.msk.bf16.gmra.mxu1 %vm614_vm1, %v7051_v2  ;;  %5961 = vmatprep.mubr.msk.bf16.mxu0 %vm614_vm1, %v7054_v0  ;;  %v7088_v0 = vld [vmem:[%s6701_s25 + $0xb8] sm:$0xff]  }
  0x8e   : > { %5895 = vmatprep.mubr.msk.bf16.mxu1 %vm614_vm1, %v7057_v60  ;;  %8931 = vst [vmem:[#allocation26_spill] sm:$0xff] %v7088_v0 }
  0x94   : > { %5962 = vmatmul.mubr.msk.bf16.gmra.mxu0 %vm614_vm1, %v7068_v44  ;;  %v7111_v44 = vld [vmem:[%s6701_s25 + $0xa8] sm:$0xff]  }
  0x95   : > { %5896 = vmatmul.mubr.msk.bf16.gmra.mxu1 %vm614_vm1, %v7071_v10  ;;  %5965 = vmatprep.mubr.msk.bf16.mxu0 %vm614_vm1, %v7074_v58  ;;  %v7108_v58 = vld [vmem:[%s6701_s25 + $0xc8] sm:$0xff]  }
  0x96   : > { %5899 = vmatprep.mubr.msk.bf16.mxu1 %vm614_vm1, %v7077_v57  ;;  %8933 = vst [vmem:[#allocation28_spill] sm:$0xff] %v7108_v58 }
  0x9c   : > { %5966 = vmatmul.mubr.msk.bf16.gmra.mxu0 %vm614_vm1, %v7088_v0  ;;  %v7129_v0 = vld [vmem:[%s6701_s25 + $0xb8] sm:$0xff]  }
  0x9d   : > { %5900 = vmatmul.mubr.msk.bf16.gmra.mxu1 %vm614_vm1, %v7091_v7  ;;  %5969 = vmatprep.mubr.msk.bf16.mxu0 %vm614_vm1, %v7094_v54  ;;  %v6505_v54 = vld [vmem:[%s6701_s25 + $0xd8] sm:$0xff]  }
  0x9e   : > { %5903 = vmatprep.mubr.msk.bf16.mxu1 %vm614_vm1, %v7097_v53 }
  0xa4   : > { %5970 = vmatmul.mubr.msk.bf16.gmra.mxu0 %vm614_vm1, %v7108_v58  ;;  %v7143_v58 = vld [vmem:[%s6701_s25 + $0xc8] sm:$0xff]  }
  0xa5   : > { %5904 = vmatmul.mubr.msk.bf16.gmra.mxu1 %vm614_vm1, %v7111_v44  ;;  %5973 = vmatprep.mubr.msk.bf16.mxu0 %vm614_vm1, %v7114_v50  ;;  %v6509_v50 = vld [vmem:[%s6701_s25 + $0xe8] sm:$0xff]  }
  0xa6   : > { %5907 = vmatprep.mubr.msk.bf16.mxu1 %vm614_vm1, %v7117_v49 }
  0xac   : > { %5974 = vmatmul.mubr.msk.bf16.gmra.mxu0 %vm614_vm1, %v6505_v54  ;;  %v7157_v54 = vld [vmem:[%s6701_s25 + $0xd8] sm:$0xff]  }
  0xad   : > { %5908 = vmatmul.mubr.msk.bf16.gmra.mxu1 %vm614_vm1, %v7129_v0  ;;  %5977 = vmatprep.mubr.msk.bf16.mxu0 %vm614_vm1, %v6507_v47  ;;  %v6513_v47 = vld [vmem:[%s6701_s25 + $0xf8] sm:$0xff]  }
  0xae   : > { %5911 = vmatprep.mubr.msk.bf16.mxu1 %vm614_vm1, %v7133_v42 }
  0xb4   : > { %5978 = vmatmul.mubr.msk.bf16.gmra.mxu0 %vm614_vm1, %v6509_v50  ;;  %v7171_v50 = vld [vmem:[%s6701_s25 + $0xe8] sm:$0xff]  }
  0xb5   : > { %5912 = vmatmul.mubr.msk.bf16.gmra.mxu1 %vm614_vm1, %v7143_v58  ;;  %5981 = vmatprep.mubr.msk.bf16.mxu0 %vm614_vm1, %v6511_v40  ;;  %v6517_v40 = vld [vmem:[%s6701_s25 + $0x108] sm:$0xff]  }
  0xb6   : > { %5915 = vmatprep.mubr.msk.bf16.mxu1 %vm614_vm1, %v7147_v39 }
  0xbc   : > { %5982 = vmatmul.mubr.msk.bf16.gmra.mxu0 %vm614_vm1, %v6513_v47  ;;  %v7185_v47 = vld [vmem:[%s6701_s25 + $0xf8] sm:$0xff]  }
  0xbd   : > { %5916 = vmatmul.mubr.msk.bf16.gmra.mxu1 %vm614_vm1, %v7157_v54  ;;  %5985 = vmatprep.mubr.msk.bf16.mxu0 %vm614_vm1, %v6515_v37  ;;  %v6521_v37 = vld [vmem:[%s6701_s25 + $0x118] sm:$0xff]  }
  0xbe   : > { %5919 = vmatprep.mubr.msk.bf16.mxu1 %vm614_vm1, %v7161_v35 }
  0xc4   : > { %5986 = vmatmul.mubr.msk.bf16.gmra.mxu0 %vm614_vm1, %v6517_v40  ;;  %v2757_v40 = vsel %vm711_vm0, %v6979_v61, 0 }
  0xc5   : > { %5920 = vmatmul.mubr.msk.bf16.gmra.mxu1 %vm614_vm1, %v7171_v50  ;;  %5989 = vmatprep.mubr.msk.bf16.mxu0 %vm614_vm1, %v6519_v33  ;;  %v3439_v33 = vsel %vm711_vm0, %v6984_v62, 0 }
  0xc6   : > { %5923 = vmatprep.mubr.msk.bf16.mxu1 %vm614_vm1, %v7175_v31 }
  0xcc   : > { %5990 = vmatmul.mubr.msk.bf16.gmra.mxu0 %vm614_vm1, %v6521_v37 }
  0xcd   : > { %5924 = vmatmul.mubr.msk.bf16.gmra.mxu1 %vm614_vm1, %v7185_v47  ;;  %6061 = vmatprep.mubr.msk.bf16.mxu0 %vm614_vm1, %v6879_v41 }
  0xce   : > { %5995 = vmatprep.mubr.msk.bf16.mxu1 %vm614_vm1, %v6704_v4  ;;  %v7213_v4 = vld [vmem:[%s8869_s1 + $0x4] sm:$0x3] }
  0xcf   : > { %8937 = vst [vmem:[#allocation32_spill] sm:$0xff] %v7213_v4 }
  0xd4   : > { %v7198_v31 = vpop.f32.mrf.mxu0  ;;  %6062 = vmatmul.mubr.msk.bf16.vlgmr.msra.gmra.mxu0 %vm614_vm1, %v6893_v43  ;;  %v7226_v43 = vld [vmem:[%s8869_s1 + $0x10] sm:$0x3] }
  0xd5   : > { %v7202_v37 = vpop.f32.mrf.mxu1  ;;  %5996 = vmatmul.mubr.msk.bf16.vlgmr.msra.gmra.mxu1 %vm614_vm1, %v6712_v6  ;;  %6192 = vmatpush3.bf16.msra.mxu0 %v3439_v33  ;;  %8939 = vst [vmem:[#allocation34_spill] sm:$0xff] %v7226_v43 }
  0xd6   : > { %8936 = vst [vmem:[#allocation31_spill] sm:$0xff] %v7202_v37  ;;  %6126 = vmatpush3.bf16.msra.mxu1 %v2757_v40  ;;  %v7206_v41 = vpop.f32.mrf.mxu0  ;;  %5999 = vmatprep.mubr.msk.bf16.mxu1 %vm614_vm1, %v6734_v12 }
  0xd7   : > { %v7215_v61 = vpop.f32.mrf.mxu1  ;;  %6065 = vmatprep.mubr.msk.bf16.mxu0 %vm614_vm1, %v6898_v45  ;;  %6399 = vmatprep.subr.msk.bf16.mxu1 %vm711_vm0, %v7213_v4 }
  0xd8   : > { %8938 = vst [vmem:[#allocation33_spill] sm:$0xff] %v7215_v61  ;;  %v7221_v6 = vpop.f32.mrf.mxu0  ;;  %6400 = vmatprep.subr.msk.bf16.mxu0 %vm711_vm0, %v7226_v43 }
  0xd9   : > { %v7228_v12 = vpop.f32.mrf.mxu1 }
  0xda   : > { %8940 = vst [vmem:[#allocation35_spill] sm:$0xff] %v7228_v12  ;;  %v7232_v62 = vpop.f32.mrf.mxu0 }
  0xdb   : > { %v7234_v33 = vpop.f32.mrf.mxu1 }
  0xdc   : > { %8941 = vst [vmem:[#allocation36_spill] sm:$0xff] %v7234_v33  ;;  %v7236_v45 = vpop.f32.mrf.mxu0  ;;  %6066 = vmatmul.mubr.msk.bf16.gmra.mxu0 %vm614_vm1, %v6914_v48 }
  0xdd   : > { %v7240_v40 = vpop.f32.mrf.mxu1  ;;  %6000 = vmatmul.mubr.msk.bf16.gmra.mxu1 %vm614_vm1, %v6746_v14  ;;  %6069 = vmatprep.mubr.msk.bf16.mxu0 %vm614_vm1, %v6923_v51 }
  0xde   : > { %8942 = vst [vmem:[#allocation37_spill] sm:$0xff] %v7240_v40  ;;  %v7246_v12 = vpop.f32.mrf.mxu0  ;;  %6003 = vmatprep.mubr.msk.bf16.mxu1 %vm614_vm1, %v6756_v16 }
  0xdf   : > { %v7250_v61 = vpop.f32.mrf.mxu1 }
  0xe0   : > { %8943 = vst [vmem:[#allocation38_spill] sm:$0xff] %v7250_v61  ;;  %v7252_v33 = vpop.f32.mrf.mxu0 }
  0xe1   : > { %v7254_v37 = vpop.f32.mrf.mxu1 }
  0xe2   : > { %8944 = vst [vmem:[#allocation39_spill] sm:$0xff] %v7254_v37  ;;  %v7256_v48 = vpop.f32.mrf.mxu0 }
  0xe3   : > { %v7258_v40 = vpop.f32.mrf.mxu1 }
  0xe4   : > { %8945 = vst [vmem:[#allocation40_spill] sm:$0xff] %v7258_v40  ;;  %v7260_v4 = vpop.f32.mrf.mxu0  ;;  %6070 = vmatmul.mubr.msk.bf16.gmra.mxu0 %vm614_vm1, %v6934_v52 }
  0xe5   : > { %v7264_v14 = vpop.f32.mrf.mxu1  ;;  %6004 = vmatmul.mubr.msk.bf16.gmra.mxu1 %vm614_vm1, %v6770_v18  ;;  %6073 = vmatprep.mubr.msk.bf16.mxu0 %vm614_vm1, %v6943_v55 }
  0xe6   : > { %8946 = vst [vmem:[#allocation41_spill] sm:$0xff] %v7264_v14  ;;  %v7270_v16 = vpop.f32.mrf.mxu0  ;;  %6007 = vmatprep.mubr.msk.bf16.mxu1 %vm614_vm1, %v6776_v20 }
  0xe7   : > { %v7274_v51 = vpop.f32.mrf.mxu1 }
  0xe8   : > { %8947 = vst [vmem:[#allocation42_spill] sm:$0xff] %v7274_v51  ;;  %v7276_v40 = vpop.f32.mrf.mxu0 }
  0xe9   : > { %v7278_v37 = vpop.f32.mrf.mxu1 }
  0xea   : > { %8948 = vst [vmem:[#allocation43_spill] sm:$0xff] %v7278_v37  ;;  %v7280_v52 = vpop.f32.mrf.mxu0 }
  0xeb   : > { %v7282_v14 = vpop.f32.mrf.mxu1 }
  0xec   : > { %8949 = vst [vmem:[#allocation44_spill] sm:$0xff] %v7282_v14  ;;  %v7284_v61 = vpop.f32.mrf.mxu0  ;;  %6074 = vmatmul.mubr.msk.bf16.gmra.mxu0 %vm614_vm1, %v6954_v56 }
  0xed   : > { %v7288_v18 = vpop.f32.mrf.mxu1  ;;  %6008 = vmatmul.mubr.msk.bf16.gmra.mxu1 %vm614_vm1, %v6790_v22  ;;  %6077 = vmatprep.mubr.msk.bf16.mxu0 %vm614_vm1, %v6963_v59 }
  0xee   : > { %8950 = vst [vmem:[#allocation45_spill] sm:$0xff] %v7288_v18  ;;  %v7294_v20 = vpop.f32.mrf.mxu0  ;;  %6011 = vmatprep.mubr.msk.bf16.mxu1 %vm614_vm1, %v6796_v24 }
  0xef   : > { %v7298_v55 = vpop.f32.mrf.mxu1 }
  0xf0   : > { %8951 = vst [vmem:[#allocation46_spill] sm:$0xff] %v7298_v55  ;;  %v7300_v14 = vpop.f32.mrf.mxu0 }
  0xf1   : > { %v7302_v37 = vpop.f32.mrf.mxu1 }
  0xf2   : > { %8952 = vst [vmem:[#allocation47_spill] sm:$0xff] %v7302_v37  ;;  %v7304_v56 = vpop.f32.mrf.mxu0 }
  0xf3   : > { %v7306_v18 = vpop.f32.mrf.mxu1 }
  0xf4   : > { %8953 = vst [vmem:[#allocation48_spill] sm:$0xff] %v7306_v18  ;;  %v7308_v51 = vpop.f32.mrf.mxu0  ;;  %6078 = vmatmul.mubr.msk.bf16.gmra.mxu0 %vm614_vm1, %v6987_v63 }
  0xf5   : > { %v7312_v22 = vpop.f32.mrf.mxu1  ;;  %6012 = vmatmul.mubr.msk.bf16.gmra.mxu1 %vm614_vm1, %v6810_v26  ;;  %6081 = vmatprep.mubr.msk.bf16.mxu0 %vm614_vm1, %v6997_v1 }
  0xf6   : > { %8954 = vst [vmem:[#allocation49_spill] sm:$0xff] %v7312_v22  ;;  %v7318_v24 = vpop.f32.mrf.mxu0  ;;  %6015 = vmatprep.mubr.msk.bf16.mxu1 %vm614_vm1, %v6816_v28 }
  0xf7   : > { %v7322_v59 = vpop.f32.mrf.mxu1 }
  0xf8   : > { %8955 = vst [vmem:[#allocation50_spill] sm:$0xff] %v7322_v59  ;;  %v7324_v18 = vpop.f32.mrf.mxu0 }
  0xf9   : > { %v7326_v37 = vpop.f32.mrf.mxu1 }
  0xfa   : > { %8956 = vst [vmem:[#allocation51_spill] sm:$0xff] %v7326_v37  ;;  %v7328_v63 = vpop.f32.mrf.mxu0 }
  0xfb   : > { %v7330_v22 = vpop.f32.mrf.mxu1 }
  0xfc   : > { %8957 = vst [vmem:[#allocation52_spill] sm:$0xff] %v7330_v22  ;;  %v7332_v55 = vpop.f32.mrf.mxu0  ;;  %6082 = vmatmul.mubr.msk.bf16.gmra.mxu0 %vm614_vm1, %v7011_v3 }
  0xfd   : > { %v7336_v26 = vpop.f32.mrf.mxu1  ;;  %6016 = vmatmul.mubr.msk.bf16.gmra.mxu1 %vm614_vm1, %v6830_v30  ;;  %6085 = vmatprep.mubr.msk.bf16.mxu0 %vm614_vm1, %v7017_v8 }
  0xfe   : > { %8958 = vst [vmem:[#allocation53_spill] sm:$0xff] %v7336_v26  ;;  %v7342_v28 = vpop.f32.mrf.mxu0  ;;  %6019 = vmatprep.mubr.msk.bf16.mxu1 %vm614_vm1, %v6836_v32 }
  0xff   : > { %v7346_v1 = vpop.f32.mrf.mxu1 }
 0x100   : > { %8959 = vst [vmem:[#allocation54_spill] sm:$0xff] %v7346_v1  ;;  %v7348_v22 = vpop.f32.mrf.mxu0 }
 0x101   : > { %v7350_v37 = vpop.f32.mrf.mxu1 }
 0x102   : > { %8960 = vst [vmem:[#allocation55_spill] sm:$0xff] %v7350_v37  ;;  %v7352_v3 = vpop.f32.mrf.mxu0 }
 0x103   : > { %v7354_v26 = vpop.f32.mrf.mxu1 }
 0x104   : > { %8961 = vst [vmem:[#allocation56_spill] sm:$0xff] %v7354_v26  ;;  %v7356_v59 = vpop.f32.mrf.mxu0  ;;  %6086 = vmatmul.mubr.msk.bf16.gmra.mxu0 %vm614_vm1, %v7031_v11 }
 0x105   : > { %v7360_v30 = vpop.f32.mrf.mxu1  ;;  %6020 = vmatmul.mubr.msk.bf16.gmra.mxu1 %vm614_vm1, %v6850_v34  ;;  %6089 = vmatprep.mubr.msk.bf16.mxu0 %vm614_vm1, %v7037_v46 }
 0x106   : > { %8962 = vst [vmem:[#allocation57_spill] sm:$0xff] %v7360_v30  ;;  %v7366_v32 = vpop.f32.mrf.mxu0  ;;  %6023 = vmatprep.mubr.msk.bf16.mxu1 %vm614_vm1, %v6856_v36 }
 0x107   : > { %v7370_v8 = vpop.f32.mrf.mxu1 }
 0x108   : > { %8963 = vst [vmem:[#allocation58_spill] sm:$0xff] %v7370_v8  ;;  %v7372_v26 = vpop.f32.mrf.mxu0 }
 0x109   : > { %v7374_v37 = vpop.f32.mrf.mxu1 }
 0x10a   : > { %8964 = vst [vmem:[#allocation59_spill] sm:$0xff] %v7374_v37  ;;  %v7376_v11 = vpop.f32.mrf.mxu0 }
 0x10b   : > { %v7378_v30 = vpop.f32.mrf.mxu1 }
 0x10c   : > { %8965 = vst [vmem:[#allocation60_spill] sm:$0xff] %v7378_v30  ;;  %v7380_v1 = vpop.f32.mrf.mxu0  ;;  %6090 = vmatmul.mubr.msk.bf16.gmra.mxu0 %vm614_vm1, %v7051_v2 }
 0x10d   : > { %v7384_v34 = vpop.f32.mrf.mxu1  ;;  %6024 = vmatmul.mubr.msk.bf16.gmra.mxu1 %vm614_vm1, %v6870_v38  ;;  %6093 = vmatprep.mubr.msk.bf16.mxu0 %vm614_vm1, %v7057_v60 }
 0x10e   : > { %8966 = vst [vmem:[#allocation61_spill] sm:$0xff] %v7384_v34  ;;  %v7390_v36 = vpop.f32.mrf.mxu0  ;;  %6027 = vmatprep.mubr.msk.bf16.mxu1 %vm614_vm1, %v6707_v5 }
 0x10f   : > { %8967 = vst [vmem:[#allocation62_spill] sm:$0xff] %v7390_v36  ;;  %v7394_v46 = vpop.f32.mrf.mxu1 }
 0x110   : > { %8968 = vst [vmem:[#allocation63_spill] sm:$0xff] %v7394_v46  ;;  %v7396_v30 = vpop.f32.mrf.mxu0 }
 0x111   : > { %8969 = vst [vmem:[#allocation64_spill] sm:$0xff] %v7396_v30  ;;  %v7398_v37 = vpop.f32.mrf.mxu1 }
 0x112   : > { %8970 = vst [vmem:[#allocation65_spill] sm:$0xff] %v7398_v37  ;;  %v7400_v2 = vpop.f32.mrf.mxu0 }
 0x113   : > { %8971 = vst [vmem:[#allocation66_spill] sm:$0xff] %v7400_v2  ;;  %v7402_v34 = vpop.f32.mrf.mxu1 }
 0x114   : > { %8972 = vst [vmem:[#allocation67_spill] sm:$0xff] %v7402_v34  ;;  %v5931_v8 = vpop.f32.mrf.mxu0  ;;  %6094 = vmatmul.mubr.msk.bf16.gmra.mxu0 %vm614_vm1, %v7071_v10 }
 0x115   : > { %v5865_v38 = vpop.f32.mrf.mxu1  ;;  %6028 = vmatmul.mubr.msk.bf16.gmra.mxu1 %vm614_vm1, %v6723_v9  ;;  %6097 = vmatprep.mubr.msk.bf16.mxu0 %vm614_vm1, %v7077_v57 }
 0x116   : > { %v1306_v5 = vadd.f32 %v5865_v38, %v7198_v31  ;;  %v1847_v60 = vpop.f32.mrf.mxu0  ;;  %6031 = vmatprep.mubr.msk.bf16.mxu1 %vm614_vm1, %v6739_v13 }
 0x117   : > { %v1297_v37 = vpop.f32.mrf.mxu1 }
 0x118   : > { %v7413_v46 = vadd.f32 %v5931_v8, %v1306_v5  ;;  %v1298_v34 = vadd.f32 %v1297_v37, %v7206_v41  ;;  %v5932_v2 = vpop.f32.mrf.mxu0 }
 0x119   : > { %v5866_v10 = vpop.f32.mrf.mxu1 }
 0x11a   : > { %v7416_v43 = vadd.f32 %v1847_v60, %v1298_v34  ;;  %v1309_v9 = vadd.f32 %v5866_v10, %v7221_v6  ;;  %v1850_v30 = vpop.f32.mrf.mxu0 }
 0x11b   : > { %v1300_v36 = vpop.f32.mrf.mxu1 }
 0x11c   : > { %v7419_v57 = vadd.f32 %v5932_v2, %v1309_v9  ;;  %v1301_v31 = vadd.f32 %v1300_v36, %v7232_v62  ;;  %v5935_v38 = vpop.f32.mrf.mxu0  ;;  %6098 = vmatmul.mubr.msk.bf16.gmra.mxu0 %vm614_vm1, %v7091_v7 }
 0x11d   : > { %v5869_v13 = vpop.f32.mrf.mxu1  ;;  %6032 = vmatmul.mubr.msk.bf16.gmra.mxu1 %vm614_vm1, %v6751_v15  ;;  %6101 = vmatprep.mubr.msk.bf16.mxu0 %vm614_vm1, %v7097_v53 }
 0x11e   : > { %v7428_v37 = vadd.f32 %v1850_v30, %v1301_v31  ;;  %v1322_v41 = vadd.f32 %v5869_v13, %v7236_v45  ;;  %v1863_v6 = vpop.f32.mrf.mxu0  ;;  %6035 = vmatprep.mubr.msk.bf16.mxu1 %vm614_vm1, %v6759_v17 }
 0x11f   : > { %v1313_v62 = vpop.f32.mrf.mxu1 }
 0x120   : > { %v7433_v8 = vadd.f32 %v5935_v38, %v1322_v41  ;;  %v1314_v7 = vadd.f32 %v1313_v62, %v7246_v12  ;;  %v5936_v34 = vpop.f32.mrf.mxu0 }
 0x121   : > { %v5870_v36 = vpop.f32.mrf.mxu1 }
 0x122   : > { %v7436_v2 = vadd.f32 %v1863_v6, %v1314_v7  ;;  %v1325_v15 = vadd.f32 %v5870_v36, %v7252_v33  ;;  %v1866_v53 = vpop.f32.mrf.mxu0 }
 0x123   : > { %v1316_v30 = vpop.f32.mrf.mxu1 }
 0x124   : > { %v7439_v5 = vadd.f32 %v5936_v34, %v1325_v15  ;;  %v1317_v45 = vadd.f32 %v1316_v30, %v7256_v48  ;;  %v5939_v60 = vpop.f32.mrf.mxu0  ;;  %6102 = vmatmul.mubr.msk.bf16.gmra.mxu0 %vm614_vm1, %v7111_v44 }
 0x125   : > { %v5873_v17 = vpop.f32.mrf.mxu1  ;;  %6036 = vmatmul.mubr.msk.bf16.gmra.mxu1 %vm614_vm1, %v6773_v19  ;;  %6105 = vmatprep.mubr.msk.bf16.mxu0 %vm614_vm1, %v7117_v49 }
 0x126   : > { %v7448_v12 = vadd.f32 %v1866_v53, %v1317_v45  ;;  %v1338_v33 = vadd.f32 %v5873_v17, %v7260_v4  ;;  %v1879_v10 = vpop.f32.mrf.mxu0  ;;  %6039 = vmatprep.mubr.msk.bf16.mxu1 %vm614_vm1, %v6779_v21 }
 0x127   : > { %v1329_v48 = vpop.f32.mrf.mxu1 }
 0x128   : > { %v7453_v9 = vadd.f32 %v5939_v60, %v1338_v33  ;;  %v1330_v44 = vadd.f32 %v1329_v48, %v7270_v16  ;;  %v5940_v31 = vpop.f32.mrf.mxu0 }
 0x129   : > { %v5874_v38 = vpop.f32.mrf.mxu1 }
 0x12a   : > { %v7456_v13 = vadd.f32 %v1879_v10, %v1330_v44  ;;  %v1341_v19 = vadd.f32 %v5874_v38, %v7276_v40  ;;  %v1882_v49 = vpop.f32.mrf.mxu0 }
 0x12b   : > { %v1332_v41 = vpop.f32.mrf.mxu1 }
 0x12c   : > { %v7459_v6 = vadd.f32 %v5940_v31, %v1341_v19  ;;  %v1333_v4 = vadd.f32 %v1332_v41, %v7280_v52  ;;  %v5943_v62 = vpop.f32.mrf.mxu0  ;;  %6106 = vmatmul.mubr.msk.bf16.gmra.mxu0 %vm614_vm1, %v7129_v0 }
 0x12d   : > { %v5877_v21 = vpop.f32.mrf.mxu1  ;;  %6040 = vmatmul.mubr.msk.bf16.gmra.mxu1 %vm614_vm1, %v6793_v23  ;;  %6109 = vmatprep.mubr.msk.bf16.mxu0 %vm614_vm1, %v7133_v42 }
 0x12e   : > { %v7468_v16 = vadd.f32 %v1882_v49, %v1333_v4  ;;  %v1354_v40 = vadd.f32 %v5877_v21, %v7284_v61  ;;  %v1895_v7 = vpop.f32.mrf.mxu0  ;;  %6043 = vmatprep.mubr.msk.bf16.mxu1 %vm614_vm1, %v6799_v25  ;;  %v8974_v49 = vld [vmem:[#allocation2_spill] sm:$0xff]  ;;  %v8975_v4 = vld [vmem:[#allocation3_spill] sm:$0xff] }
 0x12f   : > { %v1345_v52 = vpop.f32.mrf.mxu1 }
 0x130   : > { %v7473_v34 = vadd.f32 %v5943_v62, %v1354_v40  ;;  %v1346_v0 = vadd.f32 %v1345_v52, %v7294_v20  ;;  %v5944_v36 = vpop.f32.mrf.mxu0 }
 0x131   : > { %v5878_v15 = vpop.f32.mrf.mxu1 }
 0x132   : > { %v7476_v53 = vadd.f32 %v1895_v7, %v1346_v0  ;;  %v1357_v23 = vadd.f32 %v5878_v15, %v7300_v14  ;;  %v1898_v42 = vpop.f32.mrf.mxu0 }
 0x133   : > { %v1348_v30 = vpop.f32.mrf.mxu1 }
 0x134   : > { %v7479_v45 = vadd.f32 %v5944_v36, %v1357_v23  ;;  %v1349_v61 = vadd.f32 %v1348_v30, %v7304_v56  ;;  %v5947_v60 = vpop.f32.mrf.mxu0  ;;  %6110 = vmatmul.mubr.msk.bf16.gmra.mxu0 %vm614_vm1, %v7143_v58 }
 0x135   : > { %v5881_v25 = vpop.f32.mrf.mxu1  ;;  %6044 = vmatmul.mubr.msk.bf16.gmra.mxu1 %vm614_vm1, %v6813_v27  ;;  %6113 = vmatprep.mubr.msk.bf16.mxu0 %vm614_vm1, %v7147_v39 }
 0x136   : > { %v7488_v20 = vadd.f32 %v1898_v42, %v1349_v61  ;;  %v1370_v14 = vadd.f32 %v5881_v25, %v7308_v51  ;;  %v1911_v17 = vpop.f32.mrf.mxu0  ;;  %6047 = vmatprep.mubr.msk.bf16.mxu1 %vm614_vm1, %v6819_v29  ;;  %v8979_v42 = vld [vmem:[#allocation4_spill] sm:$0xff] }
 0x137   : > { %v1361_v56 = vpop.f32.mrf.mxu1 }
 0x138   : > { %v7493_v33 = vadd.f32 %v5947_v60, %v1370_v14  ;;  %v1362_v58 = vadd.f32 %v1361_v56, %v7318_v24  ;;  %v5948_v10 = vpop.f32.mrf.mxu0  ;;  %v8982_v60 = vld [vmem:[#allocation5_spill] sm:$0xff] }
 0x139   : > { %v5882_v48 = vpop.f32.mrf.mxu1 }
 0x13a   : > { %v7496_v44 = vadd.f32 %v1911_v17, %v1362_v58  ;;  %v1373_v27 = vadd.f32 %v5882_v48, %v7324_v18  ;;  %v1914_v39 = vpop.f32.mrf.mxu0 }
 0x13b   : > { %v1364_v31 = vpop.f32.mrf.mxu1 }
 0x13c   : > { %v7499_v38 = vadd.f32 %v5948_v10, %v1373_v27  ;;  %v1365_v51 = vadd.f32 %v1364_v31, %v7328_v63  ;;  %v5951_v19 = vpop.f32.mrf.mxu0  ;;  %6114 = vmatmul.mubr.msk.bf16.gmra.mxu0 %vm614_vm1, %v7157_v54 }
 0x13d   : > { %v5885_v29 = vpop.f32.mrf.mxu1  ;;  %6048 = vmatmul.mubr.msk.bf16.gmra.mxu1 %vm614_vm1, %v8974_v49  ;;  %6117 = vmatprep.mubr.msk.bf16.mxu0 %vm614_vm1, %v7161_v35  ;;  %v8988_v49 = vld [vmem:[#allocation7_spill] sm:$0xff] }
 0x13e   : > { %8973 = vst [vmem:[#allocation68_spill] sm:$0xff] %v7499_v38  ;;  %v7508_v24 = vadd.f32 %v1914_v39, %v1365_v51  ;;  %v1386_v18 = vadd.f32 %v5885_v29, %v7332_v55  ;;  %v1927_v41 = vpop.f32.mrf.mxu0  ;;  %6051 = vmatprep.mubr.msk.bf16.mxu1 %vm614_vm1, %v8975_v4  ;;  %v8986_v51 = vld [vmem:[#allocation6_spill] sm:$0xff]  ;;  %v7867_v38 = vld [vmem:[%s6701_s25 + $0x118] sm:$0xff]  }
 0x13f   : > { %v1377_v63 = vpop.f32.mrf.mxu1 }
 0x140   : > { %v7513_v62 = vadd.f32 %v5951_v19, %v1386_v18  ;;  %v1378_v54 = vadd.f32 %v1377_v63, %v7342_v28  ;;  %v5952_v21 = vpop.f32.mrf.mxu0  ;;  %v8980_v28 = vld [vmem:[#allocation30_spill] sm:$0xff] }
 0x141   : > { %v5886_v40 = vpop.f32.mrf.mxu1 }
 0x142   : > { %8976 = vst [vmem:[#allocation2_spill] sm:$0xff] %v7513_v62  ;;  %v7516_v7 = vadd.f32 %v1927_v41, %v1378_v54  ;;  %v1389_v52 = vadd.f32 %v5886_v40, %v7348_v22  ;;  %v1930_v35 = vpop.f32.mrf.mxu0  ;;  %v6561_v62 = vld [vmem:[%s6701_s25 + $0x108] sm:$0xff]  }
 0x143   : > { %v1380_v0 = vpop.f32.mrf.mxu1 }
 0x144   : > { %8977 = vst [vmem:[#allocation3_spill] sm:$0xff] %v7516_v7  ;;  %v7519_v36 = vadd.f32 %v5952_v21, %v1389_v52  ;;  %v1381_v55 = vadd.f32 %v1380_v0, %v7352_v3  ;;  %v5955_v15 = vpop.f32.mrf.mxu0  ;;  %6118 = vmatmul.mubr.msk.bf16.gmra.mxu0 %vm614_vm1, %v7171_v50  ;;  %v8992_v21 = vld [vmem:[#allocation64_spill] sm:$0xff] }
 0x145   : > { %v5889_v23 = vpop.f32.mrf.mxu1  ;;  %6052 = vmatmul.mubr.msk.bf16.gmra.mxu1 %vm614_vm1, %v8979_v42  ;;  %6121 = vmatprep.mubr.msk.bf16.mxu0 %vm614_vm1, %v8980_v28  ;;  %v8996_v42 = vld [vmem:[#allocation66_spill] sm:$0xff] }
 0x146   : > { %8978 = vst [vmem:[#allocation69_spill] sm:$0xff] %v7519_v36  ;;  %v7528_v30 = vadd.f32 %v1930_v35, %v1381_v55  ;;  %v1402_v22 = vadd.f32 %v5889_v23, %v7356_v59  ;;  %v1943_v61 = vpop.f32.mrf.mxu0  ;;  %6055 = vmatprep.mubr.msk.bf16.mxu1 %vm614_vm1, %v8982_v60  ;;  %v8993_v35 = vld [vmem:[#allocation34_spill] sm:$0xff]  ;;  %v8994_v55 = vld [vmem:[#allocation32_spill] sm:$0xff] }
 0x147   : > { %v1393_v3 = vpop.f32.mrf.mxu1 }
 0x148   : > { %8981 = vst [vmem:[#allocation4_spill] sm:$0xff] %v7528_v30  ;;  %v7533_v25 = vadd.f32 %v5955_v15, %v1402_v22  ;;  %v1394_v50 = vadd.f32 %v1393_v3, %v7366_v32  ;;  %v5956_v14 = vpop.f32.mrf.mxu0  ;;  %v6522_v32 = vld [vmem:[%s6701_s25 + $0x10] sm:$0xff]   ;;  %v3731_v15 = vsel %vm711_vm0, %v8994_v55, 0 }
 0x149   : > { %v5890_v17 = vpop.f32.mrf.mxu1  ;;  %v8997_v3 = vld [vmem:[#allocation8_spill] sm:$0xff] }
 0x14a   : > { %8983 = vst [vmem:[#allocation30_spill] sm:$0xff] %v7533_v25  ;;  %v7536_v56 = vadd.f32 %v1943_v61, %v1394_v50  ;;  %v1405_v58 = vadd.f32 %v5890_v17, %v7372_v26  ;;  %v1946_v10 = vpop.f32.mrf.mxu0  ;;  %v6523_v61 = vld [vmem:[%s6701_s25 + $0x18] sm:$0xff]   ;;  %v7845_v25 = vld [vmem:[%s6701_s25 + $0x108] sm:$0xff]  }
 0x14b   : > { %v1396_v48 = vpop.f32.mrf.mxu1 }
 0x14c   : > { %8984 = vst [vmem:[#allocation5_spill] sm:$0xff] %v7536_v56  ;;  %v7539_v27 = vadd.f32 %v5956_v14, %v1405_v58  ;;  %v1397_v59 = vadd.f32 %v1396_v48, %v7376_v11  ;;  %v5959_v39 = vpop.f32.mrf.mxu0  ;;  %6122 = vmatmul.mubr.msk.bf16.gmra.mxu0 %vm614_vm1, %v7185_v47  ;;  %v8990_v47 = vld [vmem:[#allocation62_spill] sm:$0xff]  ;;  %v8999_v14 = vld [vmem:[#allocation31_spill] sm:$0xff] }
 0x14d   : > { %v5893_v31 = vpop.f32.mrf.mxu1  ;;  %6056 = vmatmul.mubr.msk.bf16.gmra.mxu1 %vm614_vm1, %v8986_v51  ;;  %6193 = vmatprep.mubr.msk.bf16.mxu0 %vm614_vm1, %v6522_v32 }
 0x14e   : > { %8985 = vst [vmem:[#allocation70_spill] sm:$0xff] %v7539_v27  ;;  %v7548_v19 = vadd.f32 %v1946_v10, %v1397_v59  ;;  %v1418_v26 = vadd.f32 %v5893_v31, %v7380_v1  ;;  %v1959_v29 = vpop.f32.mrf.mxu0  ;;  %6127 = vmatprep.mubr.msk.bf16.mxu1 %vm614_vm1, %v8988_v49  ;;  %v4025_v1 = vsel %vm711_vm0, %v8993_v35, 0  ;;  %v9000_v10 = vld [vmem:[#allocation9_spill] sm:$0xff]  ;;  %v6524_v59 = vld [vmem:[%s6701_s25 + $0x20] sm:$0xff]   ;;  %v9004_v49 = vld [vmem:[#allocation35_spill] sm:$0xff] }
 0x14f   : > { %v1409_v11 = vpop.f32.mrf.mxu1  ;;  %v9002_v31 = vld [vmem:[#allocation33_spill] sm:$0xff] }
 0x150   : > { %8987 = vst [vmem:[#allocation6_spill] sm:$0xff] %v7548_v19  ;;  %v7553_v18 = vadd.f32 %v5959_v39, %v1418_v26  ;;  %v1410_v41 = vadd.f32 %v1409_v11, %v8990_v47  ;;  %v5960_v4 = vpop.f32.mrf.mxu0  ;;  %v6557_v19 = vld [vmem:[%s6701_s25 + $0xf8] sm:$0xff]  }
 0x151   : > { %v5894_v63 = vpop.f32.mrf.mxu1 }
 0x152   : > { %8989 = vst [vmem:[#allocation7_spill] sm:$0xff] %v7553_v18  ;;  %v7556_v54 = vadd.f32 %v1959_v29, %v1410_v41  ;;  %v1421_v40 = vadd.f32 %v5894_v63, %v8992_v21  ;;  %v1962_v52 = vpop.f32.mrf.mxu0  ;;  %v9006_v63 = vld [vmem:[#allocation36_spill] sm:$0xff] }
 0x153   : > { %v1412_v0 = vpop.f32.mrf.mxu1 }
 0x154   : > { %8991 = vst [vmem:[#allocation62_spill] sm:$0xff] %v7556_v54  ;;  %v7563_v23 = vadd.f32 %v5960_v4, %v1421_v40  ;;  %v1413_v28 = vadd.f32 %v1412_v0, %v8996_v42  ;;  %v5963_v22 = vpop.f32.mrf.mxu0  ;;  %6194 = vmatmul.mubr.msk.bf16.vlgmr.msra.gmra.mxu0 %vm614_vm1, %v6523_v61  ;;  %v6526_v0 = vld [vmem:[%s6701_s25 + $0x30] sm:$0xff]  }
 0x155   : > { %v5897_v60 = vpop.f32.mrf.mxu1  ;;  %6128 = vmatmul.mubr.msk.bf16.vlgmr.msra.gmra.mxu1 %vm614_vm1, %v8997_v3  ;;  %6324 = vmatpush3.bf16.msra.mxu0 %v4025_v1  ;;  %v9007_v1 = vld [vmem:[#allocation10_spill] sm:$0xff] }
 0x156   : > { %8995 = vst [vmem:[#allocation64_spill] sm:$0xff] %v7563_v23  ;;  %v7570_v50 = vadd.f32 %v1962_v52, %v1413_v28  ;;  %v1434_v17 = vadd.f32 %v5897_v60, %v8999_v14  ;;  %6258 = vmatpush3.bf16.msra.mxu1 %v3731_v15  ;;  %v1975_v58 = vpop.f32.mrf.mxu0  ;;  %6131 = vmatprep.mubr.msk.bf16.mxu1 %vm614_vm1, %v9000_v10  ;;  %v6525_v52 = vld [vmem:[%s6701_s25 + $0x28] sm:$0xff]   ;;  %v9009_v15 = vld [vmem:[#allocation37_spill] sm:$0xff]  ;;  %v9012_v3 = vld [vmem:[#allocation38_spill] sm:$0xff] }
 0x157   : > { %v1425_v48 = vpop.f32.mrf.mxu1  ;;  %6197 = vmatprep.mubr.msk.bf16.mxu0 %vm614_vm1, %v6524_v59 }
 0x158   : > { %8998 = vst [vmem:[#allocation34_spill] sm:$0xff] %v7570_v50  ;;  %v7577_v39 = vadd.f32 %v5963_v22, %v1434_v17  ;;  %v1426_v51 = vadd.f32 %v1425_v48, %v9002_v31  ;;  %v5964_v32 = vpop.f32.mrf.mxu0  ;;  %v9010_v22 = vld [vmem:[#allocation11_spill] sm:$0xff]  ;;  %v7823_v50 = vld [vmem:[%s6701_s25 + $0xf8] sm:$0xff]  }
 0x159   : > { %v5898_v26 = vpop.f32.mrf.mxu1  ;;  %v9014_v48 = vld [vmem:[#allocation39_spill] sm:$0xff] }
 0x15a   : > { %9001 = vst [vmem:[#allocation32_spill] sm:$0xff] %v7577_v39  ;;  %v7580_v29 = vadd.f32 %v1975_v58, %v1426_v51  ;;  %v1437_v11 = vadd.f32 %v5898_v26, %v9004_v49  ;;  %v1978_v47 = vpop.f32.mrf.mxu0  ;;  %v9016_v26 = vld [vmem:[#allocation40_spill] sm:$0xff]  ;;  %v6553_v39 = vld [vmem:[%s6701_s25 + $0xe8] sm:$0xff]  }
 0x15b   : > { %v1428_v41 = vpop.f32.mrf.mxu1 }
 0x15c   : > { %9003 = vst [vmem:[#allocation66_spill] sm:$0xff] %v7580_v29  ;;  %v7583_v4 = vadd.f32 %v5964_v32, %v1437_v11  ;;  %v1429_v21 = vadd.f32 %v1428_v41, %v9006_v63  ;;  %v5967_v40 = vpop.f32.mrf.mxu0  ;;  %6198 = vmatmul.mubr.msk.bf16.gmra.mxu0 %vm614_vm1, %v6525_v52  ;;  %v9017_v63 = vld [vmem:[#allocation12_spill] sm:$0xff]  ;;  %v9019_v52 = vld [vmem:[#allocation41_spill] sm:$0xff] }
 0x15d   : > { %v5901_v35 = vpop.f32.mrf.mxu1  ;;  %6132 = vmatmul.mubr.msk.bf16.gmra.mxu1 %vm614_vm1, %v9007_v1  ;;  %6201 = vmatprep.mubr.msk.bf16.mxu0 %vm614_vm1, %v6526_v0  ;;  %v9020_v0 = vld [vmem:[#allocation13_spill] sm:$0xff] }
 0x15e   : > { %9005 = vst [vmem:[#allocation8_spill] sm:$0xff] %v7583_v4  ;;  %v7592_v55 = vadd.f32 %v1978_v47, %v1429_v21  ;;  %v1450_v42 = vadd.f32 %v5901_v35, %v9009_v15  ;;  %v1991_v28 = vpop.f32.mrf.mxu0  ;;  %6135 = vmatprep.mubr.msk.bf16.mxu1 %vm614_vm1, %v9010_v22  ;;  %v6527_v47 = vld [vmem:[%s6701_s25 + $0x38] sm:$0xff]   ;;  %v6528_v21 = vld [vmem:[%s6701_s25 + $0x40] sm:$0xff]  }
 0x15f   : > { %v1441_v61 = vpop.f32.mrf.mxu1 }
 0x160   : > { %9008 = vst [vmem:[#allocation31_spill] sm:$0xff] %v7592_v55  ;;  %v7597_v60 = vadd.f32 %v5967_v40, %v1450_v42  ;;  %v1442_v14 = vadd.f32 %v1441_v61, %v9012_v3  ;;  %v5968_v17 = vpop.f32.mrf.mxu0 }
 0x161   : > { %v5902_v58 = vpop.f32.mrf.mxu1 }
 0x162   : > { %9011 = vst [vmem:[#allocation9_spill] sm:$0xff] %v7597_v60  ;;  %v7600_v10 = vadd.f32 %v1991_v28, %v1442_v14  ;;  %v1453_v59 = vadd.f32 %v5902_v58, %v9014_v48  ;;  %v1994_v31 = vpop.f32.mrf.mxu0  ;;  %v9022_v28 = vld [vmem:[#allocation42_spill] sm:$0xff]  ;;  %v7801_v60 = vld [vmem:[%s6701_s25 + $0xe8] sm:$0xff]  }
 0x163   : > { %v1444_v51 = vpop.f32.mrf.mxu1 }
 0x164   : > { %9013 = vst [vmem:[#allocation33_spill] sm:$0xff] %v7600_v10  ;;  %v7603_v32 = vadd.f32 %v5968_v17, %v1453_v59  ;;  %v1445_v49 = vadd.f32 %v1444_v51, %v9016_v26  ;;  %v5971_v11 = vpop.f32.mrf.mxu0  ;;  %6202 = vmatmul.mubr.msk.bf16.gmra.mxu0 %vm614_vm1, %v6527_v47  ;;  %v9024_v17 = vld [vmem:[#allocation43_spill] sm:$0xff]  ;;  %v9026_v51 = vld [vmem:[#allocation44_spill] sm:$0xff] }
 0x165   : > { %v5905_v41 = vpop.f32.mrf.mxu1  ;;  %6136 = vmatmul.mubr.msk.bf16.gmra.mxu1 %vm614_vm1, %v9017_v63  ;;  %6205 = vmatprep.mubr.msk.bf16.mxu0 %vm614_vm1, %v6528_v21  ;;  %v6529_v47 = vld [vmem:[%s6701_s25 + $0x48] sm:$0xff]   ;;  %v6530_v63 = vld [vmem:[%s6701_s25 + $0x50] sm:$0xff]  }
 0x166   : > { %9015 = vst [vmem:[#allocation35_spill] sm:$0xff] %v7603_v32  ;;  %v7612_v40 = vadd.f32 %v1994_v31, %v1445_v49  ;;  %v1466_v35 = vadd.f32 %v5905_v41, %v9019_v52  ;;  %v2007_v1 = vpop.f32.mrf.mxu0  ;;  %6139 = vmatprep.mubr.msk.bf16.mxu1 %vm614_vm1, %v9020_v0  ;;  %v9027_v41 = vld [vmem:[#allocation14_spill] sm:$0xff]  ;;  %v9029_v52 = vld [vmem:[#allocation45_spill] sm:$0xff]  ;;  %v9030_v0 = vld [vmem:[#allocation15_spill] sm:$0xff] }
 0x167   : > { %v1457_v15 = vpop.f32.mrf.mxu1 }
 0x168   : > { %9018 = vst [vmem:[#allocation36_spill] sm:$0xff] %v7612_v40  ;;  %v7617_v42 = vadd.f32 %v5971_v11, %v1466_v35  ;;  %v1458_v22 = vadd.f32 %v1457_v15, %v9022_v28  ;;  %v5972_v61 = vpop.f32.mrf.mxu0  ;;  %v6549_v40 = vld [vmem:[%s6701_s25 + $0xd8] sm:$0xff]  }
 0x169   : > { %v5906_v3 = vpop.f32.mrf.mxu1 }
 0x16a   : > { %9021 = vst [vmem:[#allocation10_spill] sm:$0xff] %v7617_v42  ;;  %v7620_v14 = vadd.f32 %v2007_v1, %v1458_v22  ;;  %v1469_v58 = vadd.f32 %v5906_v3, %v9024_v17  ;;  %v2010_v48 = vpop.f32.mrf.mxu0  ;;  %v9032_v22 = vld [vmem:[#allocation46_spill] sm:$0xff] }
 0x16b   : > { %v1460_v59 = vpop.f32.mrf.mxu1 }
 0x16c   : > { %9023 = vst [vmem:[#allocation37_spill] sm:$0xff] %v7620_v14  ;;  %v7623_v31 = vadd.f32 %v5972_v61, %v1469_v58  ;;  %v1461_v26 = vadd.f32 %v1460_v59, %v9026_v51  ;;  %v5975_v49 = vpop.f32.mrf.mxu0  ;;  %6206 = vmatmul.mubr.msk.bf16.gmra.mxu0 %vm614_vm1, %v6529_v47  ;;  %v9034_v59 = vld [vmem:[#allocation47_spill] sm:$0xff]  ;;  %v7779_v14 = vld [vmem:[%s6701_s25 + $0xd8] sm:$0xff]  }
 0x16d   : > { %v5909_v11 = vpop.f32.mrf.mxu1  ;;  %6140 = vmatmul.mubr.msk.bf16.gmra.mxu1 %vm614_vm1, %v9027_v41  ;;  %6209 = vmatprep.mubr.msk.bf16.mxu0 %vm614_vm1, %v6530_v63 }
 0x16e   : > { %9025 = vst [vmem:[#allocation11_spill] sm:$0xff] %v7623_v31  ;;  %v7632_v21 = vadd.f32 %v2010_v48, %v1461_v26  ;;  %v1482_v35 = vadd.f32 %v5909_v11, %v9029_v52  ;;  %v2023_v1 = vpop.f32.mrf.mxu0  ;;  %6143 = vmatprep.mubr.msk.bf16.mxu1 %vm614_vm1, %v9030_v0  ;;  %v9036_v11 = vld [vmem:[#allocation48_spill] sm:$0xff]  ;;  %v6531_v52 = vld [vmem:[%s6701_s25 + $0x58] sm:$0xff]   ;;  %v6532_v0 = vld [vmem:[%s6701_s25 + $0x60] sm:$0xff]  }
 0x16f   : > { %v1473_v15 = vpop.f32.mrf.mxu1 }
 0x170   : > { %9028 = vst [vmem:[#allocation38_spill] sm:$0xff] %v7632_v21  ;;  %v7637_v28 = vadd.f32 %v5975_v49, %v1482_v35  ;;  %v1474_v61 = vadd.f32 %v1473_v15, %v9032_v22  ;;  %v5976_v3 = vpop.f32.mrf.mxu0  ;;  %v9037_v35 = vld [vmem:[#allocation16_spill] sm:$0xff]  ;;  %v9039_v15 = vld [vmem:[#allocation49_spill] sm:$0xff] }
 0x171   : > { %v5910_v17 = vpop.f32.mrf.mxu1 }
 0x172   : > { %9031 = vst [vmem:[#allocation39_spill] sm:$0xff] %v7637_v28  ;;  %v7640_v58 = vadd.f32 %v2023_v1, %v1474_v61  ;;  %v1485_v48 = vadd.f32 %v5910_v17, %v9034_v59  ;;  %v2026_v51 = vpop.f32.mrf.mxu0 }
 0x173   : > { %v1476_v26 = vpop.f32.mrf.mxu1 }
 0x174   : > { %9033 = vst [vmem:[#allocation40_spill] sm:$0xff] %v7640_v58  ;;  %v7643_v47 = vadd.f32 %v5976_v3, %v1485_v48  ;;  %v1477_v41 = vadd.f32 %v1476_v26, %v9036_v11  ;;  %v5979_v63 = vpop.f32.mrf.mxu0  ;;  %6210 = vmatmul.mubr.msk.bf16.gmra.mxu0 %vm614_vm1, %v6531_v52  ;;  %v9040_v3 = vld [vmem:[#allocation17_spill] sm:$0xff]  ;;  %v9042_v48 = vld [vmem:[#allocation50_spill] sm:$0xff] }
 0x175   : > { %v5913_v49 = vpop.f32.mrf.mxu1  ;;  %6144 = vmatmul.mubr.msk.bf16.gmra.mxu1 %vm614_vm1, %v9037_v35  ;;  %6213 = vmatprep.mubr.msk.bf16.mxu0 %vm614_vm1, %v6532_v0  ;;  %v9044_v0 = vld [vmem:[#allocation51_spill] sm:$0xff] }
 0x176   : > { %9035 = vst [vmem:[#allocation12_spill] sm:$0xff] %v7643_v47  ;;  %v7652_v1 = vadd.f32 %v2026_v51, %v1477_v41  ;;  %v1498_v22 = vadd.f32 %v5913_v49, %v9039_v15  ;;  %v2039_v61 = vpop.f32.mrf.mxu0  ;;  %6147 = vmatprep.mubr.msk.bf16.mxu1 %vm614_vm1, %v9040_v3  ;;  %v9046_v49 = vld [vmem:[#allocation52_spill] sm:$0xff]  ;;  %v6533_v3 = vld [vmem:[%s6701_s25 + $0x68] sm:$0xff]  }
 0x177   : > { %v1489_v17 = vpop.f32.mrf.mxu1 }
 0x178   : > { %9038 = vst [vmem:[#allocation41_spill] sm:$0xff] %v7652_v1  ;;  %v7657_v59 = vadd.f32 %v5979_v63, %v1498_v22  ;;  %v1490_v26 = vadd.f32 %v1489_v17, %v9042_v48  ;;  %v5980_v11 = vpop.f32.mrf.mxu0  ;;  %v9047_v22 = vld [vmem:[#allocation18_spill] sm:$0xff]  ;;  %v6534_v17 = vld [vmem:[%s6701_s25 + $0x70] sm:$0xff]   ;;  %v9049_v48 = vld [vmem:[#allocation53_spill] sm:$0xff] }
 0x179   : > { %v5914_v52 = vpop.f32.mrf.mxu1 }
 0x17a   : > { %9041 = vst [vmem:[#allocation13_spill] sm:$0xff] %v7657_v59  ;;  %v7660_v35 = vadd.f32 %v2039_v61, %v1490_v26  ;;  %v1501_v51 = vadd.f32 %v5914_v52, %v9044_v0  ;;  %v2042_v41 = vpop.f32.mrf.mxu0  ;;  %v9050_v52 = vld [vmem:[#allocation19_spill] sm:$0xff] }
 0x17b   : > { %v1492_v47 = vpop.f32.mrf.mxu1 }
 0x17c   : > { %9043 = vst [vmem:[#allocation42_spill] sm:$0xff] %v7660_v35  ;;  %v7663_v1 = vadd.f32 %v5980_v11, %v1501_v51  ;;  %v1493_v15 = vadd.f32 %v1492_v47, %v9046_v49  ;;  %v5983_v58 = vpop.f32.mrf.mxu0  ;;  %6214 = vmatmul.mubr.msk.bf16.gmra.mxu0 %vm614_vm1, %v6533_v3  ;;  %v9052_v51 = vld [vmem:[#allocation54_spill] sm:$0xff] }
 0x17d   : > { %v5917_v63 = vpop.f32.mrf.mxu1  ;;  %6148 = vmatmul.mubr.msk.bf16.gmra.mxu1 %vm614_vm1, %v9047_v22  ;;  %6217 = vmatprep.mubr.msk.bf16.mxu0 %vm614_vm1, %v6534_v17  ;;  %v9054_v17 = vld [vmem:[#allocation55_spill] sm:$0xff] }
 0x17e   : > { %9045 = vst [vmem:[#allocation43_spill] sm:$0xff] %v7663_v1  ;;  %v7672_v61 = vadd.f32 %v2042_v41, %v1493_v15  ;;  %v1514_v26 = vadd.f32 %v5917_v63, %v9049_v48  ;;  %v2055_v11 = vpop.f32.mrf.mxu0  ;;  %6151 = vmatprep.mubr.msk.bf16.mxu1 %vm614_vm1, %v9050_v52  ;;  %v9056_v63 = vld [vmem:[#allocation56_spill] sm:$0xff]  ;;  %v6535_v52 = vld [vmem:[%s6701_s25 + $0x78] sm:$0xff]  }
 0x17f   : > { %v1505_v47 = vpop.f32.mrf.mxu1  ;;  %9089 = vst [vmem:[#allocation56_spill] sm:$0xff] %v7867_v38 }
 0x180   : > { %9048 = vst [vmem:[#allocation44_spill] sm:$0xff] %v7672_v61  ;;  %v7677_v0 = vadd.f32 %v5983_v58, %v1514_v26  ;;  %v1506_v49 = vadd.f32 %v1505_v47, %v9052_v51  ;;  %v5984_v3 = vpop.f32.mrf.mxu0  ;;  %v9057_v26 = vld [vmem:[#allocation20_spill] sm:$0xff]  ;;  %v6536_v47 = vld [vmem:[%s6701_s25 + $0x80] sm:$0xff]   ;;  %v9059_v51 = vld [vmem:[#allocation57_spill] sm:$0xff] }
 0x181   : > { %v5918_v22 = vpop.f32.mrf.mxu1 }
 0x182   : > { %9051 = vst [vmem:[#allocation14_spill] sm:$0xff] %v7677_v0  ;;  %v7680_v1 = vadd.f32 %v2055_v11, %v1506_v49  ;;  %v1517_v41 = vadd.f32 %v5918_v22, %v9054_v17  ;;  %v2058_v15 = vpop.f32.mrf.mxu0  ;;  %v9060_v22 = vld [vmem:[#allocation21_spill] sm:$0xff] }
 0x183   : > { %v1508_v61 = vpop.f32.mrf.mxu1 }
 0x184   : > { %9053 = vst [vmem:[#allocation45_spill] sm:$0xff] %v7680_v1  ;;  %v7683_v35 = vadd.f32 %v5984_v3, %v1517_v41  ;;  %v1509_v48 = vadd.f32 %v1508_v61, %v9056_v63  ;;  %v5987_v59 = vpop.f32.mrf.mxu0  ;;  %6218 = vmatmul.mubr.msk.bf16.gmra.mxu0 %vm614_vm1, %v6535_v52  ;;  %v9062_v41 = vld [vmem:[#allocation58_spill] sm:$0xff] }
 0x185   : > { %v5921_v58 = vpop.f32.mrf.mxu1  ;;  %6152 = vmatmul.mubr.msk.bf16.gmra.mxu1 %vm614_vm1, %v9057_v26  ;;  %6221 = vmatprep.mubr.msk.bf16.mxu0 %vm614_vm1, %v6536_v47  ;;  %v9064_v47 = vld [vmem:[#allocation59_spill] sm:$0xff] }
 0x186   : > { %9055 = vst [vmem:[#allocation15_spill] sm:$0xff] %v7683_v35  ;;  %v7692_v11 = vadd.f32 %v2058_v15, %v1509_v48  ;;  %v1530_v49 = vadd.f32 %v5921_v58, %v9059_v51  ;;  %v2071_v3 = vpop.f32.mrf.mxu0  ;;  %6155 = vmatprep.mubr.msk.bf16.mxu1 %vm614_vm1, %v9060_v22  ;;  %v9066_v58 = vld [vmem:[#allocation60_spill] sm:$0xff]  ;;  %v6537_v22 = vld [vmem:[%s6701_s25 + $0x88] sm:$0xff]  }
 0x187   : > { %v1521_v61 = vpop.f32.mrf.mxu1 }
 0x188   : > { %9058 = vst [vmem:[#allocation46_spill] sm:$0xff] %v7692_v11  ;;  %v7697_v17 = vadd.f32 %v5987_v59, %v1530_v49  ;;  %v1522_v63 = vadd.f32 %v1521_v61, %v9062_v41  ;;  %v5988_v52 = vpop.f32.mrf.mxu0  ;;  %v9067_v49 = vld [vmem:[#allocation22_spill] sm:$0xff]  ;;  %v6538_v61 = vld [vmem:[%s6701_s25 + $0x90] sm:$0xff]   ;;  %v9069_v41 = vld [vmem:[#allocation61_spill] sm:$0xff] }
 0x189   : > { %v5922_v26 = vpop.f32.mrf.mxu1 }
 0x18a   : > { %9061 = vst [vmem:[#allocation47_spill] sm:$0xff] %v7697_v17  ;;  %v7700_v35 = vadd.f32 %v2071_v3, %v1522_v63  ;;  %v1533_v15 = vadd.f32 %v5922_v26, %v9064_v47  ;;  %v2074_v48 = vpop.f32.mrf.mxu0  ;;  %v9070_v26 = vld [vmem:[#allocation23_spill] sm:$0xff] }
 0x18b   : > { %v1524_v11 = vpop.f32.mrf.mxu1 }
 0x18c   : > { %9063 = vst [vmem:[#allocation48_spill] sm:$0xff] %v7700_v35  ;;  %v7703_v1 = vadd.f32 %v5988_v52, %v1533_v15  ;;  %v1525_v51 = vadd.f32 %v1524_v11, %v9066_v58  ;;  %v5991_v0 = vpop.f32.mrf.mxu0  ;;  %6222 = vmatmul.mubr.msk.bf16.gmra.mxu0 %vm614_vm1, %v6537_v22  ;;  %v9072_v15 = vld [vmem:[#allocation63_spill] sm:$0xff] }
 0x18d   : > { %v5925_v59 = vpop.f32.mrf.mxu1  ;;  %6156 = vmatmul.mubr.msk.bf16.gmra.mxu1 %vm614_vm1, %v9067_v49  ;;  %6225 = vmatprep.mubr.msk.bf16.mxu0 %vm614_vm1, %v6538_v61  ;;  %v9074_v61 = vld [vmem:[#allocation65_spill] sm:$0xff] }
 0x18e   : > { %9065 = vst [vmem:[#allocation16_spill] sm:$0xff] %v7703_v1  ;;  %v7712_v3 = vadd.f32 %v2074_v48, %v1525_v51  ;;  %v1546_v63 = vadd.f32 %v5925_v59, %v9069_v41  ;;  %v2087_v52 = vpop.f32.mrf.mxu0  ;;  %6159 = vmatprep.mubr.msk.bf16.mxu1 %vm614_vm1, %v9070_v26  ;;  %v9076_v59 = vld [vmem:[#allocation67_spill] sm:$0xff]  ;;  %v6539_v26 = vld [vmem:[%s6701_s25 + $0x98] sm:$0xff]  }
 0x18f   : > { %v1537_v11 = vpop.f32.mrf.mxu1 }
 0x190   : > { %9068 = vst [vmem:[#allocation49_spill] sm:$0xff] %v7712_v3  ;;  %v7717_v47 = vadd.f32 %v5991_v0, %v1546_v63  ;;  %v1538_v58 = vadd.f32 %v1537_v11, %v9072_v15  ;;  %v5992_v22 = vpop.f32.mrf.mxu0  ;;  %v9077_v63 = vld [vmem:[#allocation24_spill] sm:$0xff]  ;;  %v6540_v11 = vld [vmem:[%s6701_s25 + $0xa0] sm:$0xff]  }
 0x191   : > { %v5926_v49 = vpop.f32.mrf.mxu1 }
 0x192   : > { %9071 = vst [vmem:[#allocation17_spill] sm:$0xff] %v7717_v47  ;;  %v7720_v1 = vadd.f32 %v2087_v52, %v1538_v58  ;;  %v1549_v48 = vadd.f32 %v5926_v49, %v9074_v61  ;;  %v2090_v51 = vpop.f32.mrf.mxu0 }
 0x193   : > { %v1540_v3 = vpop.f32.mrf.mxu1 }
 0x194   : > { %9073 = vst [vmem:[#allocation50_spill] sm:$0xff] %v7720_v1  ;;  %v7723_v35 = vadd.f32 %v5992_v22, %v1549_v48  ;;  %v1541_v41 = vadd.f32 %v1540_v3, %v9076_v59  ;;  %v6063_v17 = vpop.f32.mrf.mxu0  ;;  %6226 = vmatmul.mubr.msk.bf16.gmra.mxu0 %vm614_vm1, %v6539_v26  ;;  %v9079_v22 = vld [vmem:[#allocation25_spill] sm:$0xff] }
 0x195   : > { %v5997_v0 = vpop.f32.mrf.mxu1  ;;  %6160 = vmatmul.mubr.msk.bf16.gmra.mxu1 %vm614_vm1, %v9077_v63  ;;  %6229 = vmatprep.mubr.msk.bf16.mxu0 %vm614_vm1, %v6540_v11  ;;  %v6542_v11 = vld [vmem:[%s6701_s25 + $0xb0] sm:$0xff]  }
 0x196   : > { %9075 = vst [vmem:[#allocation51_spill] sm:$0xff] %v7723_v35  ;;  %v7732_v52 = vadd.f32 %v2090_v51, %v1541_v41  ;;  %v7734_v15 = vadd.f32 %v6063_v17, %v5997_v0  ;;  %v2499_v58 = vpop.f32.mrf.mxu0  ;;  %6163 = vmatprep.mubr.msk.bf16.mxu1 %vm614_vm1, %v9079_v22  ;;  %v6541_v41 = vld [vmem:[%s6701_s25 + $0xa8] sm:$0xff]   ;;  %v9080_v0 = vld [vmem:[#allocation26_spill] sm:$0xff] }
 0x197   : > { %v2207_v3 = vpop.f32.mrf.mxu1 }
 0x198   : > { %9078 = vst [vmem:[#allocation52_spill] sm:$0xff] %v7732_v52  ;;  %v7738_v49 = vadd.f32 %v2499_v58, %v2207_v3  ;;  %v6064_v61 = vpop.f32.mrf.mxu0  ;;  %v9081_v3 = vld [vmem:[#allocation27_spill] sm:$0xff] }
 0x199   : > { %v5998_v48 = vpop.f32.mrf.mxu1 }
 0x19a   : > { %v7740_v59 = vadd.f32 %v6064_v61, %v5998_v48  ;;  %v2502_v26 = vpop.f32.mrf.mxu0 }
 0x19b   : > { %v2210_v63 = vpop.f32.mrf.mxu1 }
 0x19c   : > { %v7742_v1 = vadd.f32 %v2502_v26, %v2210_v63  ;;  %v6067_v51 = vpop.f32.mrf.mxu0  ;;  %6230 = vmatmul.mubr.msk.bf16.gmra.mxu0 %vm614_vm1, %v6541_v41 }
 0x19d   : > { %v6001_v17 = vpop.f32.mrf.mxu1  ;;  %6164 = vmatmul.mubr.msk.bf16.gmra.mxu1 %vm614_vm1, %v9080_v0  ;;  %6233 = vmatprep.mubr.msk.bf16.mxu0 %vm614_vm1, %v6542_v11  ;;  %v6543_v11 = vld [vmem:[%s6701_s25 + $0xb8] sm:$0xff]  }
 0x19e   : > { %v7750_v58 = vadd.f32 %v6067_v51, %v6001_v17  ;;  %v2515_v22 = vpop.f32.mrf.mxu0  ;;  %6167 = vmatprep.mubr.msk.bf16.mxu1 %vm614_vm1, %v9081_v3  ;;  %v9082_v17 = vld [vmem:[#allocation28_spill] sm:$0xff]  ;;  %v6544_v3 = vld [vmem:[%s6701_s25 + $0xc0] sm:$0xff]  }
 0x19f   : > { %v2223_v61 = vpop.f32.mrf.mxu1 }
 0x1a0   : > { %v7754_v48 = vadd.f32 %v2515_v22, %v2223_v61  ;;  %v6068_v26 = vpop.f32.mrf.mxu0 }
 0x1a1   : > { %v6002_v63 = vpop.f32.mrf.mxu1 }
 0x1a2   : > { %v7756_v41 = vadd.f32 %v6068_v26, %v6002_v63  ;;  %v2518_v52 = vpop.f32.mrf.mxu0  ;;  %v9083_v26 = vld [vmem:[#allocation29_spill] sm:$0xff] }
 0x1a3   : > { %v2226_v35 = vpop.f32.mrf.mxu1 }
 0x1a4   : > { %v7758_v0 = vadd.f32 %v2518_v52, %v2226_v35  ;;  %v6071_v47 = vpop.f32.mrf.mxu0  ;;  %6234 = vmatmul.mubr.msk.bf16.gmra.mxu0 %vm614_vm1, %v6543_v11 }
 0x1a5   : > { %v6005_v51 = vpop.f32.mrf.mxu1  ;;  %6168 = vmatmul.mubr.msk.bf16.gmra.mxu1 %vm614_vm1, %v9082_v17  ;;  %6237 = vmatprep.mubr.msk.bf16.mxu0 %vm614_vm1, %v6544_v3 }
 0x1a6   : > { %v7766_v22 = vadd.f32 %v6071_v47, %v6005_v51  ;;  %v2531_v61 = vpop.f32.mrf.mxu0  ;;  %6171 = vmatprep.mubr.msk.bf16.mxu1 %vm614_vm1, %v9083_v26  ;;  %v6545_v47 = vld [vmem:[%s6701_s25 + $0xc8] sm:$0xff]  }
 0x1a7   : > { %v2239_v35 = vpop.f32.mrf.mxu1 }
 0x1a8   : > { %v7770_v52 = vadd.f32 %v2531_v61, %v2239_v35  ;;  %v6072_v63 = vpop.f32.mrf.mxu0  ;;  %v6547_v61 = vld [vmem:[%s6701_s25 + $0xd0] sm:$0xff]  }
 0x1a9   : > { %v6006_v11 = vpop.f32.mrf.mxu1 }
 0x1aa   : > { %v7772_v28 = vadd.f32 %v6072_v63, %v6006_v11  ;;  %v2534_v17 = vpop.f32.mrf.mxu0 }
 0x1ab   : > { %v2242_v31 = vpop.f32.mrf.mxu1 }
 0x1ac   : > { %v7774_v21 = vadd.f32 %v2534_v17, %v2242_v31  ;;  %v6075_v3 = vpop.f32.mrf.mxu0  ;;  %6238 = vmatmul.mubr.msk.bf16.gmra.mxu0 %vm614_vm1, %v6545_v47  ;;  %v7788_v31 = vld [vmem:[%s6701_s25 + $0xe0] sm:$0xff]  }
 0x1ad   : > { %v6009_v51 = vpop.f32.mrf.mxu1  ;;  %6172 = vmatmul.mubr.msk.bf16.gmra.mxu1 %vm614_vm1, %v7779_v14  ;;  %6241 = vmatprep.mubr.msk.bf16.mxu0 %vm614_vm1, %v6547_v61 }
 0x1ae   : > { %v7785_v26 = vadd.f32 %v6075_v3, %v6009_v51  ;;  %v2547_v35 = vpop.f32.mrf.mxu0  ;;  %6175 = vmatprep.mubr.msk.bf16.mxu1 %vm614_vm1, %v7788_v31 }
 0x1af   : > { %v2255_v63 = vpop.f32.mrf.mxu1 }
 0x1b0   : > { %v7792_v11 = vadd.f32 %v2547_v35, %v2255_v63  ;;  %v6076_v17 = vpop.f32.mrf.mxu0  ;;  %v6551_v35 = vld [vmem:[%s6701_s25 + $0xe0] sm:$0xff]  }
 0x1b1   : > { %v6010_v47 = vpop.f32.mrf.mxu1 }
 0x1b2   : > { %v7794_v42 = vadd.f32 %v6076_v17, %v6010_v47  ;;  %v2550_v32 = vpop.f32.mrf.mxu0 }
 0x1b3   : > { %v2258_v61 = vpop.f32.mrf.mxu1 }
 0x1b4   : > { %v7796_v3 = vadd.f32 %v2550_v32, %v2258_v61  ;;  %v6079_v51 = vpop.f32.mrf.mxu0  ;;  %6242 = vmatmul.mubr.msk.bf16.gmra.mxu0 %vm614_vm1, %v6549_v40  ;;  %v7810_v32 = vld [vmem:[%s6701_s25 + $0xf0] sm:$0xff]  }
 0x1b5   : > { %v6013_v10 = vpop.f32.mrf.mxu1  ;;  %6176 = vmatmul.mubr.msk.bf16.gmra.mxu1 %vm614_vm1, %v7801_v60  ;;  %6245 = vmatprep.mubr.msk.bf16.mxu0 %vm614_vm1, %v6551_v35 }
 0x1b6   : > { %v7807_v63 = vadd.f32 %v6079_v51, %v6013_v10  ;;  %v2563_v17 = vpop.f32.mrf.mxu0  ;;  %6179 = vmatprep.mubr.msk.bf16.mxu1 %vm614_vm1, %v7810_v32 }
 0x1b7   : > { %v2271_v40 = vpop.f32.mrf.mxu1 }
 0x1b8   : > { %v7814_v47 = vadd.f32 %v2563_v17, %v2271_v40  ;;  %v6080_v61 = vpop.f32.mrf.mxu0  ;;  %v6555_v17 = vld [vmem:[%s6701_s25 + $0xf0] sm:$0xff]  }
 0x1b9   : > { %v6014_v4 = vpop.f32.mrf.mxu1 }
 0x1ba   : > { %v7816_v55 = vadd.f32 %v6080_v61, %v6014_v4  ;;  %v2566_v29 = vpop.f32.mrf.mxu0 }
 0x1bb   : > { %v2274_v35 = vpop.f32.mrf.mxu1 }
 0x1bc   : > { %v7818_v10 = vadd.f32 %v2566_v29, %v2274_v35  ;;  %v6083_v51 = vpop.f32.mrf.mxu0  ;;  %6246 = vmatmul.mubr.msk.bf16.gmra.mxu0 %vm614_vm1, %v6553_v39  ;;  %v7832_v29 = vld [vmem:[%s6701_s25 + $0x100] sm:$0xff]  }
 0x1bd   : > { %v6017_v23 = vpop.f32.mrf.mxu1  ;;  %6180 = vmatmul.mubr.msk.bf16.gmra.mxu1 %vm614_vm1, %v7823_v50  ;;  %6249 = vmatprep.mubr.msk.bf16.mxu0 %vm614_vm1, %v6555_v17 }
 0x1be   : > { %v7829_v4 = vadd.f32 %v6083_v51, %v6017_v23  ;;  %v2579_v40 = vpop.f32.mrf.mxu0  ;;  %6183 = vmatprep.mubr.msk.bf16.mxu1 %vm614_vm1, %v7832_v29 }
 0x1bf   : > { %v2287_v39 = vpop.f32.mrf.mxu1 }
 0x1c0   : > { %v7836_v61 = vadd.f32 %v2579_v40, %v2287_v39  ;;  %v6084_v35 = vpop.f32.mrf.mxu0  ;;  %v6559_v40 = vld [vmem:[%s6701_s25 + $0x100] sm:$0xff]  }
 0x1c1   : > { %v6018_v54 = vpop.f32.mrf.mxu1 }
 0x1c2   : > { %v7838_v18 = vadd.f32 %v6084_v35, %v6018_v54  ;;  %v2582_v27 = vpop.f32.mrf.mxu0 }
 0x1c3   : > { %v2290_v17 = vpop.f32.mrf.mxu1 }
 0x1c4   : > { %v7840_v23 = vadd.f32 %v2582_v27, %v2290_v17  ;;  %v6087_v51 = vpop.f32.mrf.mxu0  ;;  %6250 = vmatmul.mubr.msk.bf16.gmra.mxu0 %vm614_vm1, %v6557_v19  ;;  %v7854_v27 = vld [vmem:[%s6701_s25 + $0x110] sm:$0xff]  }
 0x1c5   : > { %v6021_v56 = vpop.f32.mrf.mxu1  ;;  %6184 = vmatmul.mubr.msk.bf16.gmra.mxu1 %vm614_vm1, %v7845_v25  ;;  %6253 = vmatprep.mubr.msk.bf16.mxu0 %vm614_vm1, %v6559_v40  ;;  %9085 = vst [vmem:[#allocation53_spill] sm:$0xff] %v7854_v27 }
 0x1c6   : > { %v7851_v54 = vadd.f32 %v6087_v51, %v6021_v56  ;;  %v2595_v39 = vpop.f32.mrf.mxu0  ;;  %6187 = vmatprep.mubr.msk.bf16.mxu1 %vm614_vm1, %v7854_v27 }
 0x1c7   : > { %v2303_v19 = vpop.f32.mrf.mxu1 }
 0x1c8   : > { %9084 = vst [vmem:[#allocation18_spill] sm:$0xff] %v7851_v54  ;;  %v7858_v35 = vadd.f32 %v2595_v39, %v2303_v19  ;;  %v6088_v17 = vpop.f32.mrf.mxu0  ;;  %v6563_v39 = vld [vmem:[%s6701_s25 + $0x20] sm:$0xff]  }
 0x1c9   : > { %v6022_v36 = vpop.f32.mrf.mxu1 }
 0x1ca   : > { %9086 = vst [vmem:[#allocation19_spill] sm:$0xff] %v7858_v35  ;;  %v7860_v30 = vadd.f32 %v6088_v17, %v6022_v36  ;;  %v2598_v7 = vpop.f32.mrf.mxu0 }
 0x1cb   : > { %v2306_v40 = vpop.f32.mrf.mxu1 }
 0x1cc   : > { %9087 = vst [vmem:[#allocation54_spill] sm:$0xff] %v7860_v30  ;;  %v7862_v56 = vadd.f32 %v2598_v7, %v2306_v40  ;;  %v6091_v51 = vpop.f32.mrf.mxu0  ;;  %6254 = vmatmul.mubr.msk.bf16.gmra.mxu0 %vm614_vm1, %v6561_v62  ;;  %v6564_v7 = vld [vmem:[%s6701_s25] sm:$0xff]  }
 0x1cd   : > { %v6025_v54 = vpop.f32.mrf.mxu1  ;;  %6188 = vmatmul.mubr.msk.bf16.gmra.mxu1 %vm614_vm1, %v7867_v38  ;;  %6325 = vmatprep.mubr.msk.bf16.mxu0 %vm614_vm1, %v6563_v39 }
 0x1ce   : > { %9088 = vst [vmem:[#allocation55_spill] sm:$0xff] %v7862_v56  ;;  %v7873_v36 = vadd.f32 %v6091_v51, %v6025_v54  ;;  %v2611_v19 = vpop.f32.mrf.mxu0  ;;  %6259 = vmatprep.mubr.msk.bf16.mxu1 %vm614_vm1, %v6564_v7  ;;  %v6565_v51 = vld [vmem:[%s6701_s25 + $0x28] sm:$0xff]  }
 0x1cf   : > { %v2319_v17 = vpop.f32.mrf.mxu1 }
 0x1d0   : > { %9090 = vst [vmem:[#allocation20_spill] sm:$0xff] %v7873_v36  ;;  %v7877_v62 = vadd.f32 %v2611_v19, %v2319_v17  ;;  %v6092_v40 = vpop.f32.mrf.mxu0  ;;  %v6566_v36 = vld [vmem:[%s6701_s25 + $0x8] sm:$0xff]   ;;  %v6567_v19 = vld [vmem:[%s6701_s25 + $0x30] sm:$0xff]  }
 0x1d1   : > { %v6026_v56 = vpop.f32.mrf.mxu1  ;;  %v6568_v17 = vld [vmem:[%s6701_s25 + $0x10] sm:$0xff]  }
 0x1d2   : > { %9091 = vst [vmem:[#allocation57_spill] sm:$0xff] %v7877_v62  ;;  %v7879_v30 = vadd.f32 %v6092_v40, %v6026_v56  ;;  %v2614_v38 = vpop.f32.mrf.mxu0 }
 0x1d3   : > { %v2322_v35 = vpop.f32.mrf.mxu1 }
 0x1d4   : > { %9092 = vst [vmem:[#allocation21_spill] sm:$0xff] %v7879_v30  ;;  %v7881_v27 = vadd.f32 %v2614_v38, %v2322_v35  ;;  %v6095_v54 = vpop.f32.mrf.mxu0  ;;  %6326 = vmatmul.mubr.msk.bf16.vlgmr.msra.gmra.mxu0 %vm614_vm1, %v6565_v51 }
 0x1d5   : > { %v6029_v39 = vpop.f32.mrf.mxu1  ;;  %6260 = vmatmul.mubr.msk.bf16.vlgmr.msra.gmra.mxu1 %vm614_vm1, %v6566_v36  ;;  %6329 = vmatprep.mubr.msk.bf16.mxu0 %vm614_vm1, %v6567_v19 }
 0x1d6   : > { %9093 = vst [vmem:[#allocation58_spill] sm:$0xff] %v7881_v27  ;;  %v7889_v7 = vadd.f32 %v6095_v54, %v6029_v39  ;;  %v2627_v56 = vpop.f32.mrf.mxu0  ;;  %6263 = vmatprep.mubr.msk.bf16.mxu1 %vm614_vm1, %v6568_v17  ;;  %v6569_v39 = vld [vmem:[%s6701_s25 + $0x38] sm:$0xff]  }
 0x1d7   : > { %v2335_v38 = vpop.f32.mrf.mxu1 }
 0x1d8   : > { %9094 = vst [vmem:[#allocation59_spill] sm:$0xff] %v7889_v7  ;;  %v7893_v35 = vadd.f32 %v2627_v56, %v2335_v38  ;;  %v6096_v40 = vpop.f32.mrf.mxu0  ;;  %v6570_v7 = vld [vmem:[%s6701_s25 + $0x18] sm:$0xff]   ;;  %v6571_v56 = vld [vmem:[%s6701_s25 + $0x40] sm:$0xff]  }
 0x1d9   : > { %v6030_v51 = vpop.f32.mrf.mxu1 }
 0x1da   : > { %9095 = vst [vmem:[#allocation60_spill] sm:$0xff] %v7893_v35  ;;  %v7895_v27 = vadd.f32 %v6096_v40, %v6030_v51  ;;  %v2630_v36 = vpop.f32.mrf.mxu0  ;;  %v6572_v40 = vld [vmem:[%s6701_s25 + $0x20] sm:$0xff]  }
 0x1db   : > { %v2338_v30 = vpop.f32.mrf.mxu1 }
 0x1dc   : > { %9096 = vst [vmem:[#allocation22_spill] sm:$0xff] %v7895_v27  ;;  %v7897_v62 = vadd.f32 %v2630_v36, %v2338_v30  ;;  %v6099_v54 = vpop.f32.mrf.mxu0  ;;  %6330 = vmatmul.mubr.msk.bf16.gmra.mxu0 %vm614_vm1, %v6569_v39 }
 0x1dd   : > { %v6033_v19 = vpop.f32.mrf.mxu1  ;;  %6264 = vmatmul.mubr.msk.bf16.gmra.mxu1 %vm614_vm1, %v6570_v7  ;;  %6333 = vmatprep.mubr.msk.bf16.mxu0 %vm614_vm1, %v6571_v56 }
 0x1de   : > { %9097 = vst [vmem:[#allocation61_spill] sm:$0xff] %v7897_v62  ;;  %v7905_v17 = vadd.f32 %v6099_v54, %v6033_v19  ;;  %v2643_v38 = vpop.f32.mrf.mxu0  ;;  %6267 = vmatprep.mubr.msk.bf16.mxu1 %vm614_vm1, %v6572_v40  ;;  %v6573_v19 = vld [vmem:[%s6701_s25 + $0x48] sm:$0xff]  }
 0x1df   : > { %v2351_v30 = vpop.f32.mrf.mxu1 }
 0x1e0   : > { %9098 = vst [vmem:[#allocation23_spill] sm:$0xff] %v7905_v17  ;;  %v7909_v51 = vadd.f32 %v2643_v38, %v2351_v30  ;;  %v6100_v36 = vpop.f32.mrf.mxu0  ;;  %v6574_v17 = vld [vmem:[%s6701_s25 + $0x28] sm:$0xff]   ;;  %v6575_v38 = vld [vmem:[%s6701_s25 + $0x50] sm:$0xff]  }
 0x1e1   : > { %v6034_v39 = vpop.f32.mrf.mxu1 }
 0x1e2   : > { %9099 = vst [vmem:[#allocation63_spill] sm:$0xff] %v7909_v51  ;;  %v7911_v62 = vadd.f32 %v6100_v36, %v6034_v39  ;;  %v2646_v7 = vpop.f32.mrf.mxu0  ;;  %v6576_v36 = vld [vmem:[%s6701_s25 + $0x30] sm:$0xff]  }
 0x1e3   : > { %v2354_v27 = vpop.f32.mrf.mxu1 }
 0x1e4   : > { %9100 = vst [vmem:[#allocation65_spill] sm:$0xff] %v7911_v62  ;;  %v7913_v35 = vadd.f32 %v2646_v7, %v2354_v27  ;;  %v6103_v54 = vpop.f32.mrf.mxu0  ;;  %6334 = vmatmul.mubr.msk.bf16.gmra.mxu0 %vm614_vm1, %v6573_v19 }
 0x1e5   : > { %v6037_v56 = vpop.f32.mrf.mxu1  ;;  %6268 = vmatmul.mubr.msk.bf16.gmra.mxu1 %vm614_vm1, %v6574_v17  ;;  %6337 = vmatprep.mubr.msk.bf16.mxu0 %vm614_vm1, %v6575_v38 }
 0x1e6   : > { %9101 = vst [vmem:[#allocation67_spill] sm:$0xff] %v7913_v35  ;;  %v7921_v40 = vadd.f32 %v6103_v54, %v6037_v56  ;;  %v2659_v30 = vpop.f32.mrf.mxu0  ;;  %6271 = vmatprep.mubr.msk.bf16.mxu1 %vm614_vm1, %v6576_v36  ;;  %v6577_v56 = vld [vmem:[%s6701_s25 + $0x58] sm:$0xff]  }
 0x1e7   : > { %v2367_v27 = vpop.f32.mrf.mxu1 }
 0x1e8   : > { %9102 = vst [vmem:[#allocation24_spill] sm:$0xff] %v7921_v40  ;;  %v7925_v39 = vadd.f32 %v2659_v30, %v2367_v27  ;;  %v6104_v7 = vpop.f32.mrf.mxu0  ;;  %v6578_v40 = vld [vmem:[%s6701_s25 + $0x38] sm:$0xff]   ;;  %v6579_v30 = vld [vmem:[%s6701_s25 + $0x60] sm:$0xff]  }
 0x1e9   : > { %v6038_v19 = vpop.f32.mrf.mxu1 }
 0x1ea   : > { %9103 = vst [vmem:[#allocation25_spill] sm:$0xff] %v7925_v39  ;;  %v7927_v35 = vadd.f32 %v6104_v7, %v6038_v19  ;;  %v2662_v17 = vpop.f32.mrf.mxu0  ;;  %v6580_v7 = vld [vmem:[%s6701_s25 + $0x40] sm:$0xff]  }
 0x1eb   : > { %v2370_v62 = vpop.f32.mrf.mxu1 }
 0x1ec   : > { %9104 = vst [vmem:[#allocation26_spill] sm:$0xff] %v7927_v35  ;;  %v7929_v51 = vadd.f32 %v2662_v17, %v2370_v62  ;;  %v6107_v54 = vpop.f32.mrf.mxu0  ;;  %6338 = vmatmul.mubr.msk.bf16.gmra.mxu0 %vm614_vm1, %v6577_v56 }
 0x1ed   : > { %v6041_v38 = vpop.f32.mrf.mxu1  ;;  %6272 = vmatmul.mubr.msk.bf16.gmra.mxu1 %vm614_vm1, %v6578_v40  ;;  %6341 = vmatprep.mubr.msk.bf16.mxu0 %vm614_vm1, %v6579_v30 }
 0x1ee   : > { %9105 = vst [vmem:[#allocation27_spill] sm:$0xff] %v7929_v51  ;;  %v7937_v36 = vadd.f32 %v6107_v54, %v6041_v38  ;;  %v2675_v27 = vpop.f32.mrf.mxu0  ;;  %6275 = vmatprep.mubr.msk.bf16.mxu1 %vm614_vm1, %v6580_v7  ;;  %v6581_v38 = vld [vmem:[%s6701_s25 + $0x68] sm:$0xff]  }
 0x1ef   : > { %v2383_v62 = vpop.f32.mrf.mxu1 }
 0x1f0   : > { %9106 = vst [vmem:[#allocation28_spill] sm:$0xff] %v7937_v36  ;;  %v7941_v19 = vadd.f32 %v2675_v27, %v2383_v62  ;;  %v6108_v17 = vpop.f32.mrf.mxu0  ;;  %v6582_v36 = vld [vmem:[%s6701_s25 + $0x48] sm:$0xff]   ;;  %v6583_v27 = vld [vmem:[%s6701_s25 + $0x70] sm:$0xff]  }
 0x1f1   : > { %v6042_v56 = vpop.f32.mrf.mxu1 }
 0x1f2   : > { %9107 = vst [vmem:[#allocation29_spill] sm:$0xff] %v7941_v19  ;;  %v7943_v51 = vadd.f32 %v6108_v17, %v6042_v56  ;;  %v2678_v40 = vpop.f32.mrf.mxu0  ;;  %v6584_v17 = vld [vmem:[%s6701_s25 + $0x50] sm:$0xff]  }
 0x1f3   : > { %v2386_v35 = vpop.f32.mrf.mxu1 }
 0x1f4   : > { %9108 = vst [vmem:[#allocation71_spill] sm:$0xff] %v7943_v51  ;;  %v7945_v39 = vadd.f32 %v2678_v40, %v2386_v35  ;;  %v6111_v54 = vpop.f32.mrf.mxu0  ;;  %6342 = vmatmul.mubr.msk.bf16.gmra.mxu0 %vm614_vm1, %v6581_v38 }
 0x1f5   : > { %v6045_v30 = vpop.f32.mrf.mxu1  ;;  %6276 = vmatmul.mubr.msk.bf16.gmra.mxu1 %vm614_vm1, %v6582_v36  ;;  %6345 = vmatprep.mubr.msk.bf16.mxu0 %vm614_vm1, %v6583_v27 }
 0x1f6   : > { %9109 = vst [vmem:[#allocation72_spill] sm:$0xff] %v7945_v39  ;;  %v7953_v7 = vadd.f32 %v6111_v54, %v6045_v30  ;;  %v2691_v62 = vpop.f32.mrf.mxu0  ;;  %6279 = vmatprep.mubr.msk.bf16.mxu1 %vm614_vm1, %v6584_v17  ;;  %v6585_v30 = vld [vmem:[%s6701_s25 + $0x78] sm:$0xff]  }
 0x1f7   : > { %v2399_v35 = vpop.f32.mrf.mxu1 }
 0x1f8   : > { %9110 = vst [vmem:[#allocation73_spill] sm:$0xff] %v7953_v7  ;;  %v7957_v56 = vadd.f32 %v2691_v62, %v2399_v35  ;;  %v6112_v40 = vpop.f32.mrf.mxu0  ;;  %v6586_v7 = vld [vmem:[%s6701_s25 + $0x58] sm:$0xff]   ;;  %v6587_v62 = vld [vmem:[%s6701_s25 + $0x80] sm:$0xff]  }
 0x1f9   : > { %v6046_v38 = vpop.f32.mrf.mxu1 }
 0x1fa   : > { %9111 = vst [vmem:[#allocation74_spill] sm:$0xff] %v7957_v56  ;;  %v7959_v39 = vadd.f32 %v6112_v40, %v6046_v38  ;;  %v2694_v36 = vpop.f32.mrf.mxu0  ;;  %v6588_v40 = vld [vmem:[%s6701_s25 + $0x60] sm:$0xff]  }
 0x1fb   : > { %v2402_v51 = vpop.f32.mrf.mxu1 }
 0x1fc   : > { %9112 = vst [vmem:[#allocation75_spill] sm:$0xff] %v7959_v39  ;;  %v7961_v19 = vadd.f32 %v2694_v36, %v2402_v51  ;;  %v6115_v54 = vpop.f32.mrf.mxu0  ;;  %6346 = vmatmul.mubr.msk.bf16.gmra.mxu0 %vm614_vm1, %v6585_v30 }
 0x1fd   : > { %v6049_v27 = vpop.f32.mrf.mxu1  ;;  %6280 = vmatmul.mubr.msk.bf16.gmra.mxu1 %vm614_vm1, %v6586_v7  ;;  %6349 = vmatprep.mubr.msk.bf16.mxu0 %vm614_vm1, %v6587_v62 }
 0x1fe   : > { %9113 = vst [vmem:[#allocation76_spill] sm:$0xff] %v7961_v19  ;;  %v7969_v17 = vadd.f32 %v6115_v54, %v6049_v27  ;;  %v2707_v35 = vpop.f32.mrf.mxu0  ;;  %6283 = vmatprep.mubr.msk.bf16.mxu1 %vm614_vm1, %v6588_v40  ;;  %v6589_v27 = vld [vmem:[%s6701_s25 + $0x88] sm:$0xff]  }
 0x1ff   : > { %v2415_v51 = vpop.f32.mrf.mxu1 }
 0x200   : > { %9114 = vst [vmem:[#allocation77_spill] sm:$0xff] %v7969_v17  ;;  %v7973_v38 = vadd.f32 %v2707_v35, %v2415_v51  ;;  %v6116_v36 = vpop.f32.mrf.mxu0  ;;  %v6590_v17 = vld [vmem:[%s6701_s25 + $0x68] sm:$0xff]   ;;  %v6591_v35 = vld [vmem:[%s6701_s25 + $0x90] sm:$0xff]  }
 0x201   : > { %v6050_v30 = vpop.f32.mrf.mxu1 }
 0x202   : > { %9115 = vst [vmem:[#allocation78_spill] sm:$0xff] %v7973_v38  ;;  %v7975_v19 = vadd.f32 %v6116_v36, %v6050_v30  ;;  %v2710_v7 = vpop.f32.mrf.mxu0  ;;  %v6592_v36 = vld [vmem:[%s6701_s25 + $0x70] sm:$0xff]  }
 0x203   : > { %v2418_v39 = vpop.f32.mrf.mxu1 }
 0x204   : > { %9116 = vst [vmem:[#allocation79_spill] sm:$0xff] %v7975_v19  ;;  %v7977_v56 = vadd.f32 %v2710_v7, %v2418_v39  ;;  %v6119_v54 = vpop.f32.mrf.mxu0  ;;  %6350 = vmatmul.mubr.msk.bf16.gmra.mxu0 %vm614_vm1, %v6589_v27 }
 0x205   : > { %v6053_v62 = vpop.f32.mrf.mxu1  ;;  %6284 = vmatmul.mubr.msk.bf16.gmra.mxu1 %vm614_vm1, %v6590_v17  ;;  %6353 = vmatprep.mubr.msk.bf16.mxu0 %vm614_vm1, %v6591_v35 }
 0x206   : > { %9117 = vst [vmem:[#allocation80_spill] sm:$0xff] %v7977_v56  ;;  %v7985_v40 = vadd.f32 %v6119_v54, %v6053_v62  ;;  %v2723_v51 = vpop.f32.mrf.mxu0  ;;  %6287 = vmatprep.mubr.msk.bf16.mxu1 %vm614_vm1, %v6592_v36  ;;  %v6593_v62 = vld [vmem:[%s6701_s25 + $0x98] sm:$0xff]  }
 0x207   : > { %v2431_v39 = vpop.f32.mrf.mxu1 }
 0x208   : > { %9118 = vst [vmem:[#allocation81_spill] sm:$0xff] %v7985_v40  ;;  %v7989_v30 = vadd.f32 %v2723_v51, %v2431_v39  ;;  %v6120_v7 = vpop.f32.mrf.mxu0  ;;  %v6594_v40 = vld [vmem:[%s6701_s25 + $0x78] sm:$0xff]   ;;  %v6595_v51 = vld [vmem:[%s6701_s25 + $0xa0] sm:$0xff]  }
 0x209   : > { %v6054_v27 = vpop.f32.mrf.mxu1 }
 0x20a   : > { %9119 = vst [vmem:[#allocation82_spill] sm:$0xff] %v7989_v30  ;;  %v7991_v56 = vadd.f32 %v6120_v7, %v6054_v27  ;;  %v2726_v17 = vpop.f32.mrf.mxu0  ;;  %v6596_v7 = vld [vmem:[%s6701_s25 + $0x80] sm:$0xff]  }
 0x20b   : > { %v2434_v19 = vpop.f32.mrf.mxu1 }
 0x20c   : > { %9120 = vst [vmem:[#allocation83_spill] sm:$0xff] %v7991_v56  ;;  %v7993_v38 = vadd.f32 %v2726_v17, %v2434_v19  ;;  %v6123_v54 = vpop.f32.mrf.mxu0  ;;  %6354 = vmatmul.mubr.msk.bf16.gmra.mxu0 %vm614_vm1, %v6593_v62 }
 0x20d   : > { %v6057_v35 = vpop.f32.mrf.mxu1  ;;  %6288 = vmatmul.mubr.msk.bf16.gmra.mxu1 %vm614_vm1, %v6594_v40  ;;  %6357 = vmatprep.mubr.msk.bf16.mxu0 %vm614_vm1, %v6595_v51 }
 0x20e   : > { %9121 = vst [vmem:[#allocation84_spill] sm:$0xff] %v7993_v38  ;;  %v8001_v36 = vadd.f32 %v6123_v54, %v6057_v35  ;;  %v2739_v39 = vpop.f32.mrf.mxu0  ;;  %6291 = vmatprep.mubr.msk.bf16.mxu1 %vm614_vm1, %v6596_v7  ;;  %v6597_v35 = vld [vmem:[%s6701_s25 + $0xa8] sm:$0xff]  }
 0x20f   : > { %v2447_v19 = vpop.f32.mrf.mxu1 }
 0x210   : > { %9122 = vst [vmem:[#allocation85_spill] sm:$0xff] %v8001_v36  ;;  %v8005_v27 = vadd.f32 %v2739_v39, %v2447_v19  ;;  %v6124_v17 = vpop.f32.mrf.mxu0  ;;  %v6598_v36 = vld [vmem:[%s6701_s25 + $0x88] sm:$0xff]   ;;  %v6599_v39 = vld [vmem:[%s6701_s25 + $0xb0] sm:$0xff]  }
 0x211   : > { %v6058_v62 = vpop.f32.mrf.mxu1 }
 0x212   : > { %v8007_v38 = vadd.f32 %v6124_v17, %v6058_v62  ;;  %v2742_v40 = vpop.f32.mrf.mxu0  ;;  %v6600_v17 = vld [vmem:[%s6701_s25 + $0x90] sm:$0xff]  }
 0x213   : > { %v2450_v56 = vpop.f32.mrf.mxu1 }
 0x214   : > { %v8009_v30 = vadd.f32 %v2742_v40, %v2450_v56  ;;  %v8011_v54 = vpop.f32.mrf.mxu0  ;;  %6358 = vmatmul.mubr.msk.bf16.gmra.mxu0 %vm614_vm1, %v6597_v35 }
 0x215   : > { %9124 = vst [vmem:[#allocation87_spill] sm:$0xff] %v8011_v54  ;;  %v6129_v51 = vpop.f32.mrf.mxu1  ;;  %6292 = vmatmul.mubr.msk.bf16.gmra.mxu1 %vm614_vm1, %v6598_v36  ;;  %6361 = vmatprep.mubr.msk.bf16.mxu0 %vm614_vm1, %v6599_v39 }
 0x216   : > { %9123 = vst [vmem:[#allocation86_spill] sm:$0xff] %v8009_v30  ;;  %v3050_v7 = vadd.f32 %v6129_v51, %v7734_v15  ;;  %v8020_v19 = vpop.f32.mrf.mxu0  ;;  %6295 = vmatprep.mubr.msk.bf16.mxu1 %vm614_vm1, %v6600_v17  ;;  %v6601_v30 = vld [vmem:[%s6701_s25 + $0xb8] sm:$0xff]  }
 0x217   : > { %9125 = vst [vmem:[#allocation88_spill] sm:$0xff] %v8020_v19  ;;  %v2793_v56 = vpop.f32.mrf.mxu1 }
 0x218   : > { %v8025_v62 = vadd.f32 %v2793_v56, %v7738_v49  ;;  %v8027_v40 = vpop.f32.mrf.mxu0  ;;  %v3180_v51 = vrot.slane %v3050_v7, 1  ;;  %v6602_v56 = vld [vmem:[%s6701_s25 + $0x98] sm:$0xff]  }
 0x219   : > { %9126 = vst [vmem:[#allocation89_spill] sm:$0xff] %v8027_v40  ;;  %v6130_v36 = vpop.f32.mrf.mxu1  ;;  %v6603_v40 = vld [vmem:[%s6701_s25 + $0xc0] sm:$0xff]  }
 0x21a   : > { %v3051_v35 = vadd.f32 %v6130_v36, %v7740_v59  ;;  %v8030_v39 = vpop.f32.mrf.mxu0  ;;  %v8905_v59 = vrot.slane %v8025_v62, 1 }
 0x21b   : > { %9127 = vst [vmem:[#allocation90_spill] sm:$0xff] %v8030_v39  ;;  %v2796_v15 = vpop.f32.mrf.mxu1 }
 0x21c   : > { %v3182_v19 = vrot.slane %v3051_v35, 1  ;;  %v3049_v17 = vadd.f32 %v2796_v15, %v7742_v1  ;;  %v8033_v54 = vpop.f32.mrf.mxu0  ;;  %6362 = vmatmul.mubr.msk.bf16.gmra.mxu0 %vm614_vm1, %v6601_v30  ;;  %v6604_v15 = vld [vmem:[%s6701_s25 + $0xa0] sm:$0xff]  }
 0x21d   : > { %9128 = vst [vmem:[#allocation91_spill] sm:$0xff] %v8033_v54  ;;  %v6133_v49 = vpop.f32.mrf.mxu1  ;;  %6296 = vmatmul.mubr.msk.bf16.gmra.mxu1 %vm614_vm1, %v6602_v56  ;;  %6365 = vmatprep.mubr.msk.bf16.mxu0 %vm614_vm1, %v6603_v40 }
 0x21e   : > { %v3183_v7 = vsel %vm3176_vm2, %v3180_v51, %v3182_v19  ;;  %v3178_v36 = vrot.slane %v3049_v17, 1  ;;  %v3054_v35 = vadd.f32 %v6133_v49, %v7750_v58  ;;  %v8044_v1 = vpop.f32.mrf.mxu0  ;;  %6299 = vmatprep.mubr.msk.bf16.mxu1 %vm614_vm1, %v6604_v15 }
 0x21f   : > { %v8049_v30 = vadd.f32 %v3183_v7, %v7413_v46  ;;  %v2809_v54 = vpop.f32.mrf.mxu1 }
 0x220   : > { %v3179_v40 = vsel %vm3176_vm2, %v8905_v59, %v3178_v36  ;;  %v3181_v56 = vsel %vm3176_vm2, %v3178_v36, %v3180_v51  ;;  %v3052_v17 = vadd.f32 %v2809_v54, %v7754_v48  ;;  %v8056_v39 = vpop.f32.mrf.mxu0  ;;  %v3188_v51 = vrot.slane %v3054_v35, 1 }
 0x221   : > { %9129 = vst [vmem:[#allocation92_spill] sm:$0xff] %v8049_v30  ;;  %v8059_v58 = vadd.f32 %v3179_v40, %v7416_v43  ;;  %v8062_v49 = vadd.f32 %v3181_v56, %v7428_v37  ;;  %v6134_v46 = vpop.f32.mrf.mxu1  ;;  %v6605_v40 = vld [vmem:[%s6701_s25 + $0xc8] sm:$0xff]  }
 0x222   : > { %v3184_v7 = vrot.slane %v3052_v17, 1  ;;  %v3055_v15 = vadd.f32 %v6134_v46, %v7756_v41  ;;  %v8065_v59 = vpop.f32.mrf.mxu0  ;;  %v6606_v41 = vld [vmem:[%s6701_s25 + $0xa8] sm:$0xff]   ;;  %v6607_v17 = vld [vmem:[%s6701_s25 + $0xd0] sm:$0xff]  }
 0x223   : > { %v2812_v30 = vpop.f32.mrf.mxu1  ;;  %v6608_v46 = vld [vmem:[%s6701_s25 + $0xb0] sm:$0xff]  }
 0x224   : > { %v3185_v48 = vsel %vm3176_vm2, %v3182_v19, %v3184_v7  ;;  %v3190_v54 = vrot.slane %v3055_v15, 1  ;;  %v3053_v43 = vadd.f32 %v2812_v30, %v7758_v0  ;;  %v8069_v36 = vpop.f32.mrf.mxu0  ;;  %6366 = vmatmul.mubr.msk.bf16.gmra.mxu0 %vm614_vm1, %v6605_v40 }
 0x225   : > { %v8074_v37 = vadd.f32 %v3185_v48, %v7419_v57  ;;  %v6137_v56 = vpop.f32.mrf.mxu1  ;;  %6300 = vmatmul.mubr.msk.bf16.gmra.mxu1 %vm614_vm1, %v6606_v41  ;;  %6369 = vmatprep.mubr.msk.bf16.mxu0 %vm614_vm1, %v6607_v17 }
 0x226   : > { %v3191_v19 = vsel %vm3176_vm2, %v3188_v51, %v3190_v54  ;;  %v3186_v35 = vrot.slane %v3053_v43, 1  ;;  %v3058_v0 = vadd.f32 %v6137_v56, %v7766_v22  ;;  %v8082_v30 = vpop.f32.mrf.mxu0  ;;  %6303 = vmatprep.mubr.msk.bf16.mxu1 %vm614_vm1, %v6608_v46 }
 0x227   : > { %v8087_v57 = vadd.f32 %v3191_v19, %v7433_v8  ;;  %v2825_v15 = vpop.f32.mrf.mxu1 }
 0x228   : > { %v3187_v48 = vsel %vm3176_vm2, %v3184_v7, %v3186_v35  ;;  %v3189_v40 = vsel %vm3176_vm2, %v3186_v35, %v3188_v51  ;;  %v3056_v41 = vadd.f32 %v2825_v15, %v7770_v52  ;;  %v8092_v17 = vpop.f32.mrf.mxu0  ;;  %v3196_v51 = vrot.slane %v3058_v0, 1 }
 0x229   : > { %9130 = vst [vmem:[#allocation93_spill] sm:$0xff] %v8092_v17  ;;  %v8095_v22 = vadd.f32 %v3187_v48, %v7436_v2  ;;  %v8098_v43 = vadd.f32 %v3189_v40, %v7448_v12  ;;  %v6138_v56 = vpop.f32.mrf.mxu1  ;;  %v6610_v40 = vld [vmem:[%s6701_s25 + $0xc0] sm:$0xff]  }
 0x22a   : > { %v3192_v46 = vrot.slane %v3056_v41, 1  ;;  %v3059_v8 = vadd.f32 %v6138_v56, %v7772_v28  ;;  %v8101_v19 = vpop.f32.mrf.mxu0  ;;  %v6609_v28 = vld [vmem:[%s6701_s25 + $0xb8] sm:$0xff]  }
 0x22b   : > { %v2828_v7 = vpop.f32.mrf.mxu1 }
 0x22c   : > { %v3193_v52 = vsel %vm3176_vm2, %v3190_v54, %v3192_v46  ;;  %v3198_v35 = vrot.slane %v3059_v8, 1  ;;  %v3057_v15 = vadd.f32 %v2828_v7, %v7774_v21  ;;  %v8105_v17 = vpop.f32.mrf.mxu0  ;;  %6370 = vmatmul.mubr.msk.bf16.gmra.mxu0 %vm614_vm1, %v7779_v14 }
 0x22d   : > { %v8110_v2 = vadd.f32 %v3193_v52, %v7439_v5  ;;  %v6141_v12 = vpop.f32.mrf.mxu1  ;;  %6304 = vmatmul.mubr.msk.bf16.gmra.mxu1 %vm614_vm1, %v6609_v28  ;;  %6373 = vmatprep.mubr.msk.bf16.mxu0 %vm614_vm1, %v7788_v31 }
 0x22e   : > { %v3199_v54 = vsel %vm3176_vm2, %v3196_v51, %v3198_v35  ;;  %v3194_v0 = vrot.slane %v3057_v15, 1  ;;  %v3062_v21 = vadd.f32 %v6141_v12, %v7785_v26  ;;  %v8118_v48 = vpop.f32.mrf.mxu0  ;;  %6307 = vmatprep.mubr.msk.bf16.mxu1 %vm614_vm1, %v6610_v40 }
 0x22f   : > { %v8123_v5 = vadd.f32 %v3199_v54, %v7453_v9  ;;  %v2841_v14 = vpop.f32.mrf.mxu1 }
 0x230   : > { %v3195_v41 = vsel %vm3176_vm2, %v3192_v46, %v3194_v0  ;;  %v3197_v56 = vsel %vm3176_vm2, %v3194_v0, %v3196_v51  ;;  %v3060_v31 = vadd.f32 %v2841_v14, %v7792_v11  ;;  %v8128_v8 = vpop.f32.mrf.mxu0  ;;  %v3204_v51 = vrot.slane %v3062_v21, 1  ;;  %v6612_v14 = vld [vmem:[%s6701_s25 + $0xd0] sm:$0xff]  }
 0x231   : > { %v8131_v26 = vadd.f32 %v3195_v41, %v7456_v13  ;;  %v8134_v7 = vadd.f32 %v3197_v56, %v7468_v16  ;;  %v6142_v52 = vpop.f32.mrf.mxu1 }
 0x232   : > { %v3200_v15 = vrot.slane %v3060_v31, 1  ;;  %v3063_v9 = vadd.f32 %v6142_v52, %v7794_v42  ;;  %v8137_v12 = vpop.f32.mrf.mxu0  ;;  %v6611_v42 = vld [vmem:[%s6701_s25 + $0xc8] sm:$0xff]  }
 0x233   : > { %v2844_v46 = vpop.f32.mrf.mxu1 }
 0x234   : > { %v3201_v11 = vsel %vm3176_vm2, %v3198_v35, %v3200_v15  ;;  %v3206_v28 = vrot.slane %v3063_v9, 1  ;;  %v3061_v54 = vadd.f32 %v2844_v46, %v7796_v3  ;;  %v8141_v0 = vpop.f32.mrf.mxu0  ;;  %6374 = vmatmul.mubr.msk.bf16.gmra.mxu0 %vm614_vm1, %v7801_v60 }
 0x235   : > { %v8146_v13 = vadd.f32 %v3201_v11, %v7459_v6  ;;  %v6145_v16 = vpop.f32.mrf.mxu1  ;;  %6308 = vmatmul.mubr.msk.bf16.gmra.mxu1 %vm614_vm1, %v6611_v42  ;;  %6377 = vmatprep.mubr.msk.bf16.mxu0 %vm614_vm1, %v7810_v32 }
 0x236   : > { %v3207_v35 = vsel %vm3176_vm2, %v3204_v51, %v3206_v28  ;;  %v3202_v21 = vrot.slane %v3061_v54, 1  ;;  %v3066_v3 = vadd.f32 %v6145_v16, %v7807_v63  ;;  %v8154_v40 = vpop.f32.mrf.mxu0  ;;  %6311 = vmatprep.mubr.msk.bf16.mxu1 %vm614_vm1, %v6612_v14 }
 0x237   : > { %v8159_v6 = vadd.f32 %v3207_v35, %v7473_v34  ;;  %v2857_v60 = vpop.f32.mrf.mxu1 }
 0x238   : > { %v3203_v41 = vsel %vm3176_vm2, %v3200_v15, %v3202_v21  ;;  %v3205_v56 = vsel %vm3176_vm2, %v3202_v21, %v3204_v51  ;;  %v3064_v32 = vadd.f32 %v2857_v60, %v7814_v47  ;;  %v8164_v31 = vpop.f32.mrf.mxu0  ;;  %v3212_v51 = vrot.slane %v3066_v3, 1  ;;  %v6614_v3 = vld [vmem:[%s6701_s25 + $0xe0] sm:$0xff]  }
 0x239   : > { %v8167_v63 = vadd.f32 %v3203_v41, %v7476_v53  ;;  %v8170_v52 = vadd.f32 %v3205_v56, %v7488_v20  ;;  %v6146_v9 = vpop.f32.mrf.mxu1 }
 0x23a   : > { %v3208_v46 = vrot.slane %v3064_v32, 1  ;;  %v3067_v34 = vadd.f32 %v6146_v9, %v7816_v55  ;;  %v8173_v11 = vpop.f32.mrf.mxu0  ;;  %v6613_v55 = vld [vmem:[%s6701_s25 + $0xd8] sm:$0xff]  }
 0x23b   : > { %v2860_v15 = vpop.f32.mrf.mxu1 }
 0x23c   : > { %v3209_v47 = vsel %vm3176_vm2, %v3206_v28, %v3208_v46  ;;  %v3214_v54 = vrot.slane %v3067_v34, 1  ;;  %v3065_v16 = vadd.f32 %v2860_v15, %v7818_v10  ;;  %v8177_v42 = vpop.f32.mrf.mxu0  ;;  %6378 = vmatmul.mubr.msk.bf16.gmra.mxu0 %vm614_vm1, %v7823_v50 }
 0x23d   : > { %v8182_v53 = vadd.f32 %v3209_v47, %v7479_v45  ;;  %v6149_v20 = vpop.f32.mrf.mxu1  ;;  %6312 = vmatmul.mubr.msk.bf16.gmra.mxu1 %vm614_vm1, %v6613_v55  ;;  %6381 = vmatprep.mubr.msk.bf16.mxu0 %vm614_vm1, %v7832_v29  ;;  %v9132_v55 = vld [vmem:[#allocation53_spill] sm:$0xff] }
 0x23e   : > { %v3215_v28 = vsel %vm3176_vm2, %v3212_v51, %v3214_v54  ;;  %v3210_v35 = vrot.slane %v3065_v16, 1  ;;  %v3070_v10 = vadd.f32 %v6149_v20, %v7829_v4  ;;  %v8190_v21 = vpop.f32.mrf.mxu0  ;;  %6315 = vmatprep.mubr.msk.bf16.mxu1 %vm614_vm1, %v6614_v3  ;;  %v6616_v3 = vld [vmem:[%s6701_s25 + $0xf0] sm:$0xff]  }
 0x23f   : > { %v8195_v45 = vadd.f32 %v3215_v28, %v7493_v33  ;;  %v2873_v50 = vpop.f32.mrf.mxu1 }
 0x240   : > { %v3211_v14 = vsel %vm3176_vm2, %v3208_v46, %v3210_v35  ;;  %v3213_v60 = vsel %vm3176_vm2, %v3210_v35, %v3212_v51  ;;  %v3068_v29 = vadd.f32 %v2873_v50, %v7836_v61  ;;  %v8200_v41 = vpop.f32.mrf.mxu0  ;;  %v3220_v15 = vrot.slane %v3070_v10, 1  ;;  %v9133_v35 = vld [vmem:[#allocation18_spill] sm:$0xff] }
 0x241   : > { %v8203_v4 = vadd.f32 %v3211_v14, %v7496_v44  ;;  %v8206_v56 = vadd.f32 %v3213_v60, %v7508_v24  ;;  %v6150_v32 = vpop.f32.mrf.mxu1  ;;  %v9131_v44 = vld [vmem:[#allocation68_spill] sm:$0xff] }
 0x242   : > { %v3216_v9 = vrot.slane %v3068_v29, 1  ;;  %v3071_v33 = vadd.f32 %v6150_v32, %v7838_v18  ;;  %v8209_v34 = vpop.f32.mrf.mxu0  ;;  %v6615_v18 = vld [vmem:[%s6701_s25 + $0xe8] sm:$0xff]  }
 0x243   : > { %v2876_v46 = vpop.f32.mrf.mxu1  ;;  %v9135_v32 = vld [vmem:[#allocation19_spill] sm:$0xff] }
 0x244   : > { %v3217_v61 = vsel %vm3176_vm2, %v3214_v54, %v3216_v9  ;;  %v3222_v51 = vrot.slane %v3071_v33, 1  ;;  %v3069_v47 = vadd.f32 %v2876_v46, %v7840_v23  ;;  %v8213_v16 = vpop.f32.mrf.mxu0  ;;  %6382 = vmatmul.mubr.msk.bf16.gmra.mxu0 %vm614_vm1, %v7845_v25  ;;  %v9134_v25 = vld [vmem:[#allocation2_spill] sm:$0xff] }
 0x245   : > { %v8218_v24 = vadd.f32 %v3217_v61, %v9131_v44  ;;  %v6153_v20 = vpop.f32.mrf.mxu1  ;;  %6316 = vmatmul.mubr.msk.bf16.gmra.mxu1 %vm614_vm1, %v6615_v18  ;;  %6385 = vmatprep.mubr.msk.bf16.mxu0 %vm614_vm1, %v9132_v55  ;;  %v9137_v61 = vld [vmem:[#allocation3_spill] sm:$0xff]  ;;  %v9139_v44 = vld [vmem:[#allocation4_spill] sm:$0xff] }
 0x246   : > { %v3223_v54 = vsel %vm3176_vm2, %v3220_v15, %v3222_v51  ;;  %v3218_v28 = vrot.slane %v3069_v47, 1  ;;  %v3074_v23 = vadd.f32 %v6153_v20, %v9133_v35  ;;  %v8226_v10 = vpop.f32.mrf.mxu0  ;;  %6319 = vmatprep.mubr.msk.bf16.mxu1 %vm614_vm1, %v6616_v3 }
 0x247   : > { %v8231_v50 = vadd.f32 %v3223_v54, %v9134_v25  ;;  %v2889_v14 = vpop.f32.mrf.mxu1  ;;  %v9141_v54 = vld [vmem:[#allocation54_spill] sm:$0xff] }
 0x248   : > { %v3219_v60 = vsel %vm3176_vm2, %v3216_v9, %v3218_v28  ;;  %v3221_v29 = vsel %vm3176_vm2, %v3218_v28, %v3220_v15  ;;  %v3072_v33 = vadd.f32 %v2889_v14, %v9135_v32  ;;  %v8236_v46 = vpop.f32.mrf.mxu0  ;;  %v3228_v25 = vrot.slane %v3074_v23, 1  ;;  %v9143_v14 = vld [vmem:[#allocation55_spill] sm:$0xff] }
 0x249   : > { %9136 = vst [vmem:[#allocation68_spill] sm:$0xff] %v8236_v46  ;;  %v8239_v47 = vadd.f32 %v3219_v60, %v9137_v61  ;;  %v8242_v20 = vadd.f32 %v3221_v29, %v9139_v44  ;;  %v6154_v18 = vpop.f32.mrf.mxu1  ;;  %v9145_v60 = vld [vmem:[#allocation56_spill] sm:$0xff]  ;;  %v9146_v29 = vld [vmem:[#allocation69_spill] sm:$0xff] }
 0x24a   : > { %v3224_v55 = vrot.slane %v3072_v33, 1  ;;  %v3075_v35 = vadd.f32 %v6154_v18, %v9141_v54  ;;  %v8245_v3 = vpop.f32.mrf.mxu0  ;;  %v6617_v44 = vld [vmem:[%s6701_s25 + $0xf8] sm:$0xff]   ;;  %v9148_v54 = vld [vmem:[#allocation20_spill] sm:$0xff] }
 0x24b   : > { %9138 = vst [vmem:[#allocation53_spill] sm:$0xff] %v8239_v47  ;;  %9140 = vst [vmem:[#allocation18_spill] sm:$0xff] %v8242_v20  ;;  %v2892_v9 = vpop.f32.mrf.mxu1 }
 0x24c   : > { %9142 = vst [vmem:[#allocation2_spill] sm:$0xff] %v8245_v3  ;;  %v3225_v15 = vsel %vm3176_vm2, %v3222_v51, %v3224_v55  ;;  %v3230_v28 = vrot.slane %v3075_v35, 1  ;;  %v3073_v32 = vadd.f32 %v2892_v9, %v9143_v14  ;;  %v8249_v46 = vpop.f32.mrf.mxu0  ;;  %6386 = vmatmul.mubr.msk.bf16.gmra.mxu0 %vm614_vm1, %v9145_v60  ;;  %v9150_v9 = vld [vmem:[#allocation30_spill] sm:$0xff] }
 0x24d   : > { %9144 = vst [vmem:[#allocation19_spill] sm:$0xff] %v8249_v46  ;;  %v8254_v61 = vadd.f32 %v3225_v15, %v9146_v29  ;;  %v6157_v33 = vpop.f32.mrf.mxu1  ;;  %6320 = vmatmul.mubr.msk.bf16.gmra.mxu1 %vm614_vm1, %v6617_v44  ;;  %v9152_v29 = vld [vmem:[#allocation57_spill] sm:$0xff] }
 0x24e   : > { %v3231_v18 = vsel %vm3176_vm2, %v3228_v25, %v3230_v28  ;;  %v3226_v23 = vrot.slane %v3073_v32, 1  ;;  %v3078_v51 = vadd.f32 %v6157_v33, %v9148_v54  ;;  %v8260_v35 = vpop.f32.mrf.mxu0  ;;  %v9154_v44 = vld [vmem:[#allocation5_spill] sm:$0xff]  ;;  %v9156_v32 = vld [vmem:[#allocation6_spill] sm:$0xff] }
 0x24f   : > { %9147 = vst [vmem:[#allocation3_spill] sm:$0xff] %v8254_v61  ;;  %9149 = vst [vmem:[#allocation4_spill] sm:$0xff] %v8260_v35  ;;  %v8263_v14 = vadd.f32 %v3231_v18, %v9150_v9  ;;  %v2905_v46 = vpop.f32.mrf.mxu1  ;;  %v9158_v35 = vld [vmem:[#allocation21_spill] sm:$0xff] }
 0x250   : > { %v3227_v60 = vsel %vm3176_vm2, %v3224_v55, %v3226_v23  ;;  %v3229_v15 = vsel %vm3176_vm2, %v3226_v23, %v3228_v25  ;;  %v3076_v61 = vadd.f32 %v2905_v46, %v9152_v29  ;;  %v8268_v3 = vpop.f32.mrf.mxu0  ;;  %v3236_v55 = vrot.slane %v3078_v51, 1  ;;  %v9160_v46 = vld [vmem:[#allocation58_spill] sm:$0xff] }
 0x251   : > { %9151 = vst [vmem:[#allocation54_spill] sm:$0xff] %v8263_v14  ;;  %9153 = vst [vmem:[#allocation55_spill] sm:$0xff] %v8268_v3  ;;  %v8271_v20 = vadd.f32 %v3227_v60, %v9154_v44  ;;  %v8274_v47 = vadd.f32 %v3229_v15, %v9156_v32  ;;  %v6158_v33 = vpop.f32.mrf.mxu1  ;;  %v9162_v60 = vld [vmem:[#allocation70_spill] sm:$0xff] }
 0x252   : > { %v3232_v54 = vrot.slane %v3076_v61, 1  ;;  %v3079_v18 = vadd.f32 %v6158_v33, %v9158_v35  ;;  %v8277_v9 = vpop.f32.mrf.mxu0 }
 0x253   : > { %9155 = vst [vmem:[#allocation56_spill] sm:$0xff] %v8271_v20  ;;  %9157 = vst [vmem:[#allocation69_spill] sm:$0xff] %v8274_v47  ;;  %v2908_v14 = vpop.f32.mrf.mxu1  ;;  %v9164_v47 = vld [vmem:[#allocation59_spill] sm:$0xff] }
 0x254   : > { %9159 = vst [vmem:[#allocation20_spill] sm:$0xff] %v8277_v9  ;;  %v3233_v25 = vsel %vm3176_vm2, %v3230_v28, %v3232_v54  ;;  %v3238_v23 = vrot.slane %v3079_v18, 1  ;;  %v3077_v29 = vadd.f32 %v2908_v14, %v9160_v46  ;;  %v8281_v3 = vpop.f32.mrf.mxu0  ;;  %v9166_v9 = vld [vmem:[#allocation7_spill] sm:$0xff]  ;;  %v9168_v46 = vld [vmem:[#allocation60_spill] sm:$0xff] }
 0x255   : > { %9161 = vst [vmem:[#allocation30_spill] sm:$0xff] %v8281_v3  ;;  %v8284_v44 = vadd.f32 %v3233_v25, %v9162_v60  ;;  %v6161_v15 = vpop.f32.mrf.mxu1  ;;  %v9170_v60 = vld [vmem:[#allocation62_spill] sm:$0xff] }
 0x256   : > { %v3239_v32 = vsel %vm3176_vm2, %v3236_v55, %v3238_v23  ;;  %v3234_v61 = vrot.slane %v3077_v29, 1  ;;  %v3082_v35 = vadd.f32 %v6161_v15, %v9164_v47  ;;  %v8288_v33 = vpop.f32.mrf.mxu0  ;;  %v9172_v29 = vld [vmem:[#allocation34_spill] sm:$0xff] }
 0x257   : > { %9163 = vst [vmem:[#allocation57_spill] sm:$0xff] %v8284_v44  ;;  %9165 = vst [vmem:[#allocation5_spill] sm:$0xff] %v8288_v33  ;;  %v8291_v51 = vadd.f32 %v3239_v32, %v9166_v9  ;;  %v2921_v28 = vpop.f32.mrf.mxu1  ;;  %v9174_v33 = vld [vmem:[#allocation22_spill] sm:$0xff] }
 0x258   : > { %v3235_v18 = vsel %vm3176_vm2, %v3232_v54, %v3234_v61  ;;  %v3237_v14 = vsel %vm3176_vm2, %v3234_v61, %v3236_v55  ;;  %v3080_v3 = vadd.f32 %v2921_v28, %v9168_v46  ;;  %v8296_v25 = vpop.f32.mrf.mxu0  ;;  %v3244_v54 = vrot.slane %v3082_v35, 1  ;;  %v9176_v28 = vld [vmem:[#allocation61_spill] sm:$0xff] }
 0x259   : > { %9167 = vst [vmem:[#allocation6_spill] sm:$0xff] %v8291_v51  ;;  %9169 = vst [vmem:[#allocation21_spill] sm:$0xff] %v8296_v25  ;;  %v8299_v44 = vadd.f32 %v3235_v18, %v9170_v60  ;;  %v8302_v20 = vadd.f32 %v3237_v14, %v9172_v29  ;;  %v6162_v47 = vpop.f32.mrf.mxu1  ;;  %v9178_v18 = vld [vmem:[#allocation64_spill] sm:$0xff] }
 0x25a   : > { %v3240_v15 = vrot.slane %v3080_v3, 1  ;;  %v3083_v9 = vadd.f32 %v6162_v47, %v9174_v33  ;;  %v8305_v32 = vpop.f32.mrf.mxu0 }
 0x25b   : > { %9171 = vst [vmem:[#allocation58_spill] sm:$0xff] %v8299_v44  ;;  %9173 = vst [vmem:[#allocation70_spill] sm:$0xff] %v8302_v20  ;;  %v2924_v51 = vpop.f32.mrf.mxu1  ;;  %v9180_v20 = vld [vmem:[#allocation23_spill] sm:$0xff] }
 0x25c   : > { %9175 = vst [vmem:[#allocation59_spill] sm:$0xff] %v8305_v32  ;;  %v3241_v55 = vsel %vm3176_vm2, %v3238_v23, %v3240_v15  ;;  %v3246_v61 = vrot.slane %v3083_v9, 1  ;;  %v3081_v46 = vadd.f32 %v2924_v51, %v9176_v28  ;;  %v8309_v25 = vpop.f32.mrf.mxu0  ;;  %v9182_v32 = vld [vmem:[#allocation32_spill] sm:$0xff]  ;;  %v9184_v28 = vld [vmem:[#allocation63_spill] sm:$0xff] }
 0x25d   : > { %9177 = vst [vmem:[#allocation7_spill] sm:$0xff] %v8309_v25  ;;  %v8312_v60 = vadd.f32 %v3241_v55, %v9178_v18  ;;  %v6165_v14 = vpop.f32.mrf.mxu1  ;;  %v9186_v18 = vld [vmem:[#allocation66_spill] sm:$0xff] }
 0x25e   : > { %v3247_v29 = vsel %vm3176_vm2, %v3244_v54, %v3246_v61  ;;  %v3242_v3 = vrot.slane %v3081_v46, 1  ;;  %v3086_v33 = vadd.f32 %v6165_v14, %v9180_v20  ;;  %v8316_v47 = vpop.f32.mrf.mxu0  ;;  %v9188_v46 = vld [vmem:[#allocation31_spill] sm:$0xff] }
 0x25f   : > { %9179 = vst [vmem:[#allocation60_spill] sm:$0xff] %v8312_v60  ;;  %9181 = vst [vmem:[#allocation62_spill] sm:$0xff] %v8316_v47  ;;  %v8319_v35 = vadd.f32 %v3247_v29, %v9182_v32  ;;  %v2937_v23 = vpop.f32.mrf.mxu1  ;;  %v9190_v47 = vld [vmem:[#allocation65_spill] sm:$0xff] }
 0x260   : > { %v3243_v9 = vsel %vm3176_vm2, %v3240_v15, %v3242_v3  ;;  %v3245_v51 = vsel %vm3176_vm2, %v3242_v3, %v3244_v54  ;;  %v3084_v25 = vadd.f32 %v2937_v23, %v9184_v28  ;;  %v8324_v55 = vpop.f32.mrf.mxu0  ;;  %v3252_v15 = vrot.slane %v3086_v33, 1  ;;  %v9192_v23 = vld [vmem:[#allocation67_spill] sm:$0xff] }
 0x261   : > { %9183 = vst [vmem:[#allocation34_spill] sm:$0xff] %v8319_v35  ;;  %9185 = vst [vmem:[#allocation22_spill] sm:$0xff] %v8324_v55  ;;  %v8327_v60 = vadd.f32 %v3243_v9, %v9186_v18  ;;  %v8330_v44 = vadd.f32 %v3245_v51, %v9188_v46  ;;  %v6166_v20 = vpop.f32.mrf.mxu1  ;;  %v9194_v9 = vld [vmem:[#allocation8_spill] sm:$0xff] }
 0x262   : > { %v3248_v14 = vrot.slane %v3084_v25, 1  ;;  %v3087_v32 = vadd.f32 %v6166_v20, %v9190_v47  ;;  %v8333_v29 = vpop.f32.mrf.mxu0 }
 0x263   : > { %9187 = vst [vmem:[#allocation61_spill] sm:$0xff] %v8327_v60  ;;  %9189 = vst [vmem:[#allocation64_spill] sm:$0xff] %v8330_v44  ;;  %v2940_v35 = vpop.f32.mrf.mxu1  ;;  %v9196_v44 = vld [vmem:[#allocation24_spill] sm:$0xff] }
 0x264   : > { %9191 = vst [vmem:[#allocation23_spill] sm:$0xff] %v8333_v29  ;;  %v3249_v54 = vsel %vm3176_vm2, %v3246_v61, %v3248_v14  ;;  %v3254_v3 = vrot.slane %v3087_v32, 1  ;;  %v3085_v28 = vadd.f32 %v2940_v35, %v9192_v23  ;;  %v8337_v55 = vpop.f32.mrf.mxu0  ;;  %v9198_v29 = vld [vmem:[#allocation9_spill] sm:$0xff] }
 0x265   : > { %9193 = vst [vmem:[#allocation32_spill] sm:$0xff] %v8337_v55  ;;  %v8340_v18 = vadd.f32 %v3249_v54, %v9194_v9  ;;  %v6169_v51 = vpop.f32.mrf.mxu1  ;;  %v9200_v23 = vld [vmem:[#allocation25_spill] sm:$0xff] }
 0x266   : > { %v3255_v46 = vsel %vm3176_vm2, %v3252_v15, %v3254_v3  ;;  %v3250_v25 = vrot.slane %v3085_v28, 1  ;;  %v3090_v47 = vadd.f32 %v6169_v51, %v9196_v44  ;;  %v8344_v20 = vpop.f32.mrf.mxu0  ;;  %v9202_v9 = vld [vmem:[#allocation33_spill] sm:$0xff]  ;;  %v9204_v28 = vld [vmem:[#allocation36_spill] sm:$0xff] }
 0x267   : > { %9195 = vst [vmem:[#allocation63_spill] sm:$0xff] %v8340_v18  ;;  %9197 = vst [vmem:[#allocation66_spill] sm:$0xff] %v8344_v20  ;;  %v8347_v33 = vadd.f32 %v3255_v46, %v9198_v29  ;;  %v2953_v61 = vpop.f32.mrf.mxu1  ;;  %v9206_v20 = vld [vmem:[#allocation26_spill] sm:$0xff] }
 0x268   : > { %v3251_v32 = vsel %vm3176_vm2, %v3248_v14, %v3250_v25  ;;  %v3253_v35 = vsel %vm3176_vm2, %v3250_v25, %v3252_v15  ;;  %v3088_v55 = vadd.f32 %v2953_v61, %v9200_v23  ;;  %v8352_v54 = vpop.f32.mrf.mxu0  ;;  %v3260_v14 = vrot.slane %v3090_v47, 1  ;;  %v9208_v61 = vld [vmem:[#allocation27_spill] sm:$0xff] }
 0x269   : > { %9199 = vst [vmem:[#allocation31_spill] sm:$0xff] %v8347_v33  ;;  %9201 = vst [vmem:[#allocation65_spill] sm:$0xff] %v8352_v54  ;;  %v8355_v18 = vadd.f32 %v3251_v32, %v9202_v9  ;;  %v8358_v60 = vadd.f32 %v3253_v35, %v9204_v28  ;;  %v6170_v44 = vpop.f32.mrf.mxu1  ;;  %v9210_v32 = vld [vmem:[#allocation35_spill] sm:$0xff] }
 0x26a   : > { %v3256_v51 = vrot.slane %v3088_v55, 1  ;;  %v3091_v29 = vadd.f32 %v6170_v44, %v9206_v20  ;;  %v8361_v46 = vpop.f32.mrf.mxu0 }
 0x26b   : > { %9203 = vst [vmem:[#allocation67_spill] sm:$0xff] %v8355_v18  ;;  %9205 = vst [vmem:[#allocation8_spill] sm:$0xff] %v8358_v60  ;;  %v2956_v33 = vpop.f32.mrf.mxu1  ;;  %v9212_v60 = vld [vmem:[#allocation28_spill] sm:$0xff] }
 0x26c   : > { %9207 = vst [vmem:[#allocation24_spill] sm:$0xff] %v8361_v46  ;;  %v3257_v15 = vsel %vm3176_vm2, %v3254_v3, %v3256_v51  ;;  %v3262_v25 = vrot.slane %v3091_v29, 1  ;;  %v3089_v23 = vadd.f32 %v2956_v33, %v9208_v61  ;;  %v8365_v54 = vpop.f32.mrf.mxu0  ;;  %v9214_v46 = vld [vmem:[#allocation10_spill] sm:$0xff]  ;;  %v9216_v61 = vld [vmem:[#allocation29_spill] sm:$0xff] }
 0x26d   : > { %9209 = vst [vmem:[#allocation9_spill] sm:$0xff] %v8365_v54  ;;  %v8368_v9 = vadd.f32 %v3257_v15, %v9210_v32  ;;  %v6173_v35 = vpop.f32.mrf.mxu1  ;;  %v9218_v32 = vld [vmem:[#allocation37_spill] sm:$0xff] }
 0x26e   : > { %v3263_v28 = vsel %vm3176_vm2, %v3260_v14, %v3262_v25  ;;  %v3258_v55 = vrot.slane %v3089_v23, 1  ;;  %v3094_v20 = vadd.f32 %v6173_v35, %v9212_v60  ;;  %v8372_v44 = vpop.f32.mrf.mxu0  ;;  %v9220_v23 = vld [vmem:[#allocation38_spill] sm:$0xff] }
 0x26f   : > { %9211 = vst [vmem:[#allocation25_spill] sm:$0xff] %v8368_v9  ;;  %9213 = vst [vmem:[#allocation33_spill] sm:$0xff] %v8372_v44  ;;  %v8375_v47 = vadd.f32 %v3263_v28, %v9214_v46  ;;  %v2969_v3 = vpop.f32.mrf.mxu1  ;;  %v9222_v44 = vld [vmem:[#allocation71_spill] sm:$0xff] }
 0x270   : > { %v3259_v29 = vsel %vm3176_vm2, %v3256_v51, %v3258_v55  ;;  %v3261_v33 = vsel %vm3176_vm2, %v3258_v55, %v3260_v14  ;;  %v3092_v54 = vadd.f32 %v2969_v3, %v9216_v61  ;;  %v8380_v15 = vpop.f32.mrf.mxu0  ;;  %v3268_v51 = vrot.slane %v3094_v20, 1  ;;  %v9224_v3 = vld [vmem:[#allocation72_spill] sm:$0xff] }
 0x271   : > { %9215 = vst [vmem:[#allocation36_spill] sm:$0xff] %v8375_v47  ;;  %9217 = vst [vmem:[#allocation26_spill] sm:$0xff] %v8380_v15  ;;  %v8383_v9 = vadd.f32 %v3259_v29, %v9218_v32  ;;  %v8386_v18 = vadd.f32 %v3261_v33, %v9220_v23  ;;  %v6174_v60 = vpop.f32.mrf.mxu1  ;;  %v9226_v29 = vld [vmem:[#allocation11_spill] sm:$0xff] }
 0x272   : > { %v3264_v35 = vrot.slane %v3092_v54, 1  ;;  %v3095_v46 = vadd.f32 %v6174_v60, %v9222_v44  ;;  %v8389_v28 = vpop.f32.mrf.mxu0 }
 0x273   : > { %9219 = vst [vmem:[#allocation27_spill] sm:$0xff] %v8383_v9  ;;  %9221 = vst [vmem:[#allocation35_spill] sm:$0xff] %v8386_v18  ;;  %v2972_v47 = vpop.f32.mrf.mxu1  ;;  %v9228_v18 = vld [vmem:[#allocation73_spill] sm:$0xff] }
 0x274   : > { %9223 = vst [vmem:[#allocation28_spill] sm:$0xff] %v8389_v28  ;;  %v3265_v14 = vsel %vm3176_vm2, %v3262_v25, %v3264_v35  ;;  %v3270_v55 = vrot.slane %v3095_v46, 1  ;;  %v3093_v61 = vadd.f32 %v2972_v47, %v9224_v3  ;;  %v8393_v15 = vpop.f32.mrf.mxu0  ;;  %v9230_v28 = vld [vmem:[#allocation39_spill] sm:$0xff]  ;;  %v9232_v3 = vld [vmem:[#allocation74_spill] sm:$0xff] }
 0x275   : > { %9225 = vst [vmem:[#allocation10_spill] sm:$0xff] %v8393_v15  ;;  %v8396_v32 = vadd.f32 %v3265_v14, %v9226_v29  ;;  %v6177_v33 = vpop.f32.mrf.mxu1  ;;  %v9234_v29 = vld [vmem:[#allocation40_spill] sm:$0xff] }
 0x276   : > { %v3271_v23 = vsel %vm3176_vm2, %v3268_v51, %v3270_v55  ;;  %v3266_v54 = vrot.slane %v3093_v61, 1  ;;  %v3098_v44 = vadd.f32 %v6177_v33, %v9228_v18  ;;  %v8400_v60 = vpop.f32.mrf.mxu0  ;;  %v9236_v61 = vld [vmem:[#allocation41_spill] sm:$0xff] }
 0x277   : > { %9227 = vst [vmem:[#allocation29_spill] sm:$0xff] %v8396_v32  ;;  %9229 = vst [vmem:[#allocation37_spill] sm:$0xff] %v8400_v60  ;;  %v8403_v20 = vadd.f32 %v3271_v23, %v9230_v28  ;;  %v2985_v25 = vpop.f32.mrf.mxu1  ;;  %v9238_v60 = vld [vmem:[#allocation75_spill] sm:$0xff] }
 0x278   : > { %v3267_v46 = vsel %vm3176_vm2, %v3264_v35, %v3266_v54  ;;  %v3269_v47 = vsel %vm3176_vm2, %v3266_v54, %v3268_v51  ;;  %v3096_v15 = vadd.f32 %v2985_v25, %v9232_v3  ;;  %v8408_v14 = vpop.f32.mrf.mxu0  ;;  %v3276_v35 = vrot.slane %v3098_v44, 1  ;;  %v9240_v25 = vld [vmem:[#allocation76_spill] sm:$0xff] }
 0x279   : > { %9231 = vst [vmem:[#allocation38_spill] sm:$0xff] %v8403_v20  ;;  %9233 = vst [vmem:[#allocation71_spill] sm:$0xff] %v8408_v14  ;;  %v8411_v32 = vadd.f32 %v3267_v46, %v9234_v29  ;;  %v8414_v9 = vadd.f32 %v3269_v47, %v9236_v61  ;;  %v6178_v18 = vpop.f32.mrf.mxu1  ;;  %v9242_v46 = vld [vmem:[#allocation12_spill] sm:$0xff] }
 0x27a   : > { %v3272_v33 = vrot.slane %v3096_v15, 1  ;;  %v3099_v28 = vadd.f32 %v6178_v18, %v9238_v60  ;;  %v8417_v23 = vpop.f32.mrf.mxu0 }
 0x27b   : > { %9235 = vst [vmem:[#allocation72_spill] sm:$0xff] %v8411_v32  ;;  %9237 = vst [vmem:[#allocation11_spill] sm:$0xff] %v8414_v9  ;;  %v2988_v20 = vpop.f32.mrf.mxu1  ;;  %v9244_v9 = vld [vmem:[#allocation77_spill] sm:$0xff] }
 0x27c   : > { %9239 = vst [vmem:[#allocation73_spill] sm:$0xff] %v8417_v23  ;;  %v3273_v51 = vsel %vm3176_vm2, %v3270_v55, %v3272_v33  ;;  %v3278_v54 = vrot.slane %v3099_v28, 1  ;;  %v3097_v3 = vadd.f32 %v2988_v20, %v9240_v25  ;;  %v8421_v14 = vpop.f32.mrf.mxu0  ;;  %v9246_v23 = vld [vmem:[#allocation13_spill] sm:$0xff]  ;;  %v9248_v25 = vld [vmem:[#allocation78_spill] sm:$0xff] }
 0x27d   : > { %9241 = vst [vmem:[#allocation39_spill] sm:$0xff] %v8421_v14  ;;  %v8424_v29 = vadd.f32 %v3273_v51, %v9242_v46  ;;  %v6181_v47 = vpop.f32.mrf.mxu1  ;;  %v9250_v46 = vld [vmem:[#allocation42_spill] sm:$0xff] }
 0x27e   : > { %v3279_v61 = vsel %vm3176_vm2, %v3276_v35, %v3278_v54  ;;  %v3274_v15 = vrot.slane %v3097_v3, 1  ;;  %v3102_v60 = vadd.f32 %v6181_v47, %v9244_v9  ;;  %v8428_v18 = vpop.f32.mrf.mxu0  ;;  %v9252_v3 = vld [vmem:[#allocation44_spill] sm:$0xff] }
 0x27f   : > { %9243 = vst [vmem:[#allocation74_spill] sm:$0xff] %v8424_v29  ;;  %9245 = vst [vmem:[#allocation40_spill] sm:$0xff] %v8428_v18  ;;  %v8431_v44 = vadd.f32 %v3279_v61, %v9246_v23  ;;  %v3001_v55 = vpop.f32.mrf.mxu1  ;;  %v9254_v18 = vld [vmem:[#allocation79_spill] sm:$0xff] }
 0x280   : > { %v3275_v28 = vsel %vm3176_vm2, %v3272_v33, %v3274_v15  ;;  %v3277_v20 = vsel %vm3176_vm2, %v3274_v15, %v3276_v35  ;;  %v3100_v14 = vadd.f32 %v3001_v55, %v9248_v25  ;;  %v8436_v51 = vpop.f32.mrf.mxu0  ;;  %v3284_v33 = vrot.slane %v3102_v60, 1  ;;  %v9256_v55 = vld [vmem:[#allocation80_spill] sm:$0xff] }
 0x281   : > { %9247 = vst [vmem:[#allocation41_spill] sm:$0xff] %v8431_v44  ;;  %9249 = vst [vmem:[#allocation75_spill] sm:$0xff] %v8436_v51  ;;  %v8439_v29 = vadd.f32 %v3275_v28, %v9250_v46  ;;  %v8442_v32 = vadd.f32 %v3277_v20, %v9252_v3  ;;  %v6182_v9 = vpop.f32.mrf.mxu1  ;;  %v9258_v28 = vld [vmem:[#allocation43_spill] sm:$0xff] }
 0x282   : > { %v3280_v47 = vrot.slane %v3100_v14, 1  ;;  %v3103_v23 = vadd.f32 %v6182_v9, %v9254_v18  ;;  %v8445_v61 = vpop.f32.mrf.mxu0 }
 0x283   : > { %9251 = vst [vmem:[#allocation76_spill] sm:$0xff] %v8439_v29  ;;  %9253 = vst [vmem:[#allocation12_spill] sm:$0xff] %v8442_v32  ;;  %v3004_v44 = vpop.f32.mrf.mxu1  ;;  %v9260_v32 = vld [vmem:[#allocation81_spill] sm:$0xff] }
 0x284   : > { %9255 = vst [vmem:[#allocation77_spill] sm:$0xff] %v8445_v61  ;;  %v3281_v35 = vsel %vm3176_vm2, %v3278_v54, %v3280_v47  ;;  %v3286_v15 = vrot.slane %v3103_v23, 1  ;;  %v3101_v25 = vadd.f32 %v3004_v44, %v9256_v55  ;;  %v8449_v51 = vpop.f32.mrf.mxu0  ;;  %v9262_v61 = vld [vmem:[#allocation14_spill] sm:$0xff] }
 0x285   : > { %9257 = vst [vmem:[#allocation13_spill] sm:$0xff] %v8449_v51  ;;  %v8452_v46 = vadd.f32 %v3281_v35, %v9258_v28  ;;  %v6185_v20 = vpop.f32.mrf.mxu1  ;;  %v9264_v55 = vld [vmem:[#allocation82_spill] sm:$0xff]  ;;  %v9266_v28 = vld [vmem:[#allocation45_spill] sm:$0xff] }
 0x286   : > { %v3287_v3 = vsel %vm3176_vm2, %v3284_v33, %v3286_v15  ;;  %v3282_v14 = vrot.slane %v3101_v25, 1  ;;  %v3106_v18 = vadd.f32 %v6185_v20, %v9260_v32  ;;  %v8456_v9 = vpop.f32.mrf.mxu0  ;;  %v9268_v25 = vld [vmem:[#allocation46_spill] sm:$0xff] }
 0x287   : > { %9259 = vst [vmem:[#allocation78_spill] sm:$0xff] %v8452_v46  ;;  %9261 = vst [vmem:[#allocation42_spill] sm:$0xff] %v8456_v9  ;;  %v8459_v60 = vadd.f32 %v3287_v3, %v9262_v61  ;;  %v3017_v54 = vpop.f32.mrf.mxu1  ;;  %v9270_v9 = vld [vmem:[#allocation83_spill] sm:$0xff] }
 0x288   : > { %v3283_v23 = vsel %vm3176_vm2, %v3280_v47, %v3282_v14  ;;  %v3285_v44 = vsel %vm3176_vm2, %v3282_v14, %v3284_v33  ;;  %v3104_v51 = vadd.f32 %v3017_v54, %v9264_v55  ;;  %v8464_v35 = vpop.f32.mrf.mxu0  ;;  %v3292_v47 = vrot.slane %v3106_v18, 1  ;;  %v9272_v54 = vld [vmem:[#allocation84_spill] sm:$0xff] }
 0x289   : > { %9263 = vst [vmem:[#allocation44_spill] sm:$0xff] %v8459_v60  ;;  %9265 = vst [vmem:[#allocation79_spill] sm:$0xff] %v8464_v35  ;;  %v8467_v46 = vadd.f32 %v3283_v23, %v9266_v28  ;;  %v8470_v29 = vadd.f32 %v3285_v44, %v9268_v25  ;;  %v6186_v32 = vpop.f32.mrf.mxu1  ;;  %v9274_v23 = vld [vmem:[#allocation15_spill] sm:$0xff] }
 0x28a   : > { %v3288_v20 = vrot.slane %v3104_v51, 1  ;;  %v3107_v61 = vadd.f32 %v6186_v32, %v9270_v9  ;;  %v8473_v3 = vpop.f32.mrf.mxu0 }
 0x28b   : > { %9267 = vst [vmem:[#allocation80_spill] sm:$0xff] %v8467_v46  ;;  %9269 = vst [vmem:[#allocation43_spill] sm:$0xff] %v8470_v29  ;;  %v3020_v60 = vpop.f32.mrf.mxu1  ;;  %v9276_v29 = vld [vmem:[#allocation85_spill] sm:$0xff]  ;;  %v9296_v46 = vld [vmem:[#allocation50_spill] sm:$0xff] }
 0x28c   : > { %9271 = vst [vmem:[#allocation81_spill] sm:$0xff] %v8473_v3  ;;  %v3289_v33 = vsel %vm3176_vm2, %v3286_v15, %v3288_v20  ;;  %v3294_v14 = vrot.slane %v3107_v61, 1  ;;  %v3105_v55 = vadd.f32 %v3020_v60, %v9272_v54  ;;  %v8477_v35 = vpop.f32.mrf.mxu0  ;;  %v9278_v3 = vld [vmem:[#allocation47_spill] sm:$0xff] }
 0x28d   : > { %9273 = vst [vmem:[#allocation14_spill] sm:$0xff] %v8477_v35  ;;  %v8480_v28 = vadd.f32 %v3289_v33, %v9274_v23  ;;  %v6189_v44 = vpop.f32.mrf.mxu1  ;;  %v9281_v23 = vld [vmem:[#allocation48_spill] sm:$0xff] }
 0x28e   : > { %v3295_v25 = vsel %vm3176_vm2, %v3292_v47, %v3294_v14  ;;  %v3290_v51 = vrot.slane %v3105_v55, 1  ;;  %v3110_v9 = vadd.f32 %v6189_v44, %v9276_v29  ;;  %v8484_v32 = vpop.f32.mrf.mxu0  ;;  %v9283_v55 = vld [vmem:[#allocation49_spill] sm:$0xff] }
 0x28f   : > { %9275 = vst [vmem:[#allocation82_spill] sm:$0xff] %v8480_v28  ;;  %9277 = vst [vmem:[#allocation45_spill] sm:$0xff] %v8484_v32  ;;  %v8487_v18 = vadd.f32 %v3295_v25, %v9278_v3  ;;  %v3033_v15 = vpop.f32.mrf.mxu1  ;;  %v9287_v32 = vld [vmem:[#allocation16_spill] sm:$0xff] }
 0x290   : > { %v3291_v61 = vsel %vm3176_vm2, %v3288_v20, %v3290_v51  ;;  %v3293_v60 = vsel %vm3176_vm2, %v3290_v51, %v3292_v47  ;;  %v3108_v54 = vadd.f32 %v3033_v15, %v8005_v27  ;;  %v8492_v33 = vpop.f32.mrf.mxu0  ;;  %v3300_v20 = vrot.slane %v3110_v9, 1  ;;  %v9286_v27 = vld [vmem:[#allocation86_spill] sm:$0xff] }
 0x291   : > { %9279 = vst [vmem:[#allocation46_spill] sm:$0xff] %v8487_v18  ;;  %9280 = vst [vmem:[#allocation83_spill] sm:$0xff] %v8492_v33  ;;  %v8495_v28 = vadd.f32 %v3291_v61, %v9281_v23  ;;  %v8498_v35 = vadd.f32 %v3293_v60, %v9283_v55  ;;  %v6190_v29 = vpop.f32.mrf.mxu1 }
 0x292   : > { %v3296_v44 = vrot.slane %v3108_v54, 1  ;;  %v3111_v3 = vadd.f32 %v6190_v29, %v8007_v38  ;;  %v8501_v25 = vpop.f32.mrf.mxu0  ;;  %v9289_v54 = vrot.slane %v8025_v62, 1  ;;  %v9290_v29 = vld [vmem:[#allocation87_spill] sm:$0xff] }
 0x293   : > { %9282 = vst [vmem:[#allocation84_spill] sm:$0xff] %v8495_v28  ;;  %9284 = vst [vmem:[#allocation15_spill] sm:$0xff] %v8498_v35  ;;  %v3036_v18 = vpop.f32.mrf.mxu1  ;;  %v9291_v35 = vld [vmem:[#allocation17_spill] sm:$0xff] }
 0x294   : > { %9285 = vst [vmem:[#allocation85_spill] sm:$0xff] %v8501_v25  ;;  %v3297_v47 = vsel %vm3176_vm2, %v3294_v14, %v3296_v44  ;;  %v3302_v51 = vrot.slane %v3111_v3, 1  ;;  %v3109_v15 = vadd.f32 %v3036_v18, %v9286_v27  ;;  %v6327_v33 = vpop.f32.mrf.mxu0  ;;  %v9293_v3 = vld [vmem:[#allocation51_spill] sm:$0xff] }
 0x295   : > { %v8506_v61 = vadd.f32 %v3297_v47, %v9287_v32  ;;  %v6261_v23 = vpop.f32.mrf.mxu1 }
 0x296   : > { %v3303_v60 = vsel %vm3176_vm2, %v3300_v20, %v3302_v51  ;;  %v3369_v38 = vsel %vm3176_vm2, %v3302_v51, %v9289_v54  ;;  %v3298_v55 = vrot.slane %v3109_v15, 1  ;;  %v3776_v25 = vadd.f32 %v6261_v23, %v9290_v29  ;;  %v4061_v9 = vpop.f32.mrf.mxu0  ;;  %v9298_v15 = vld [vmem:[#allocation52_spill] sm:$0xff] }
 0x297   : > { %9288 = vst [vmem:[#allocation47_spill] sm:$0xff] %v8506_v61  ;;  %v8514_v14 = vadd.f32 %v3303_v60, %v9291_v35  ;;  %v8517_v18 = vadd.f32 %v3369_v38, %v9293_v3  ;;  %v3767_v27 = vpop.f32.mrf.mxu1  ;;  %v9295_v61 = vld [vmem:[#allocation88_spill] sm:$0xff]  ;;  %v9300_v60 = vld [vmem:[#allocation89_spill] sm:$0xff] }
 0x298   : > { %v3299_v32 = vsel %vm3176_vm2, %v3296_v44, %v3298_v55  ;;  %v3301_v47 = vsel %vm3176_vm2, %v3298_v55, %v3300_v20  ;;  %v3768_v28 = vadd.f32 %v3767_v27, %v9295_v61  ;;  %v6328_v62 = vpop.f32.mrf.mxu0  ;;  %v4318_v35 = vadd.f32 %v6327_v33, %v3776_v25  ;;  %v9301_v20 = vld [vmem:[#allocation90_spill] sm:$0xff] }
 0x299   : > { %9292 = vst [vmem:[#allocation48_spill] sm:$0xff] %v8514_v14  ;;  %9294 = vst [vmem:[#allocation49_spill] sm:$0xff] %v8517_v18  ;;  %v8523_v51 = vadd.f32 %v3299_v32, %v9296_v46  ;;  %v8526_v23 = vadd.f32 %v3301_v47, %v9298_v15  ;;  %v6262_v54 = vpop.f32.mrf.mxu1  ;;  %v9302_v47 = vld [vmem:[#allocation91_spill] sm:$0xff] }
 0x29a   : > { %v3779_v38 = vadd.f32 %v6262_v54, %v9300_v60  ;;  %v4064_v29 = vpop.f32.mrf.mxu0  ;;  %v8529_v18 = vadd.f32 %v4061_v9, %v3768_v28  ;;  %v4448_v46 = vrot.slane %v4318_v35, 2  ;;  %v8539_v28 = vld [vmem:[%s8870_s2] ss:$0 sm:$0xff]  ;;  %v9303_v60 = vld [vmem:[#allocation92_spill] sm:$0xff] }
 0x29b   : > { %9297 = vst [vmem:[#allocation86_spill] sm:$0xff] %v8523_v51  ;;  %9299 = vst [vmem:[#allocation16_spill] sm:$0xff] %v8526_v23  ;;  %v3770_v3 = vpop.f32.mrf.mxu1 }
 0x29c   : > { %v4319_v44 = vadd.f32 %v6328_v62, %v3779_v38  ;;  %v3771_v55 = vadd.f32 %v3770_v3, %v9301_v20  ;;  %v6331_v61 = vpop.f32.mrf.mxu0  ;;  %v8906_v25 = vrot.slane %v8529_v18, 2 }
 0x29d   : > { %v6265_v27 = vpop.f32.mrf.mxu1 }
 0x29e   : > { %v4450_v32 = vrot.slane %v4319_v44, 2  ;;  %v4317_v51 = vadd.f32 %v4064_v29, %v3771_v55  ;;  %v3792_v15 = vadd.f32 %v6265_v27, %v9302_v47  ;;  %v4077_v23 = vpop.f32.mrf.mxu0 }
 0x29f   : > { %v3783_v33 = vpop.f32.mrf.mxu1 }
 0x2a0   : > { %v4451_v54 = vsel %vm4444_vm3, %v4448_v46, %v4450_v32  ;;  %v4446_v9 = vrot.slane %v4317_v51, 2  ;;  %v3784_v62 = vadd.f32 %v3783_v33, %v8044_v1  ;;  %v6332_v35 = vpop.f32.mrf.mxu0  ;;  %v4322_v20 = vadd.f32 %v6331_v61, %v3792_v15 }
 0x2a1   : > { %v4640_v38 = vadd.f32 %v4451_v54, %v9303_v60  ;;  %v6266_v29 = vpop.f32.mrf.mxu1 }
 0x2a2   : > { %v4447_v3 = vsel %vm4444_vm3, %v8906_v25, %v4446_v9  ;;  %v4449_v44 = vsel %vm4444_vm3, %v4446_v9, %v4448_v46  ;;  %v4320_v51 = vadd.f32 %v4077_v23, %v3784_v62  ;;  %v4080_v55 = vpop.f32.mrf.mxu0  ;;  %v3795_v33 = vadd.f32 %v6266_v29, %v8056_v39 }
 0x2a3   : > { %v4711_v1 = vadd.f32 %v8539_v28, %v4640_v38  ;;  %v4638_v27 = vadd.f32 %v4447_v3, %v8059_v58  ;;  %v4639_v47 = vadd.f32 %v4449_v44, %v8062_v49  ;;  %v3786_v54 = vpop.f32.mrf.mxu1  ;;  %v4456_v39 = vrot.slane %v4322_v20, 2 }
 0x2a4   : > { %v4452_v60 = vrot.slane %v4320_v51, 2  ;;  %v3787_v14 = vadd.f32 %v3786_v54, %v8065_v59  ;;  %v6335_v25 = vpop.f32.mrf.mxu0  ;;  %v4323_v46 = vadd.f32 %v6332_v35, %v3795_v33  ;;  %v9304_v33 = vld [vmem:[#allocation93_spill] sm:$0xff] }
 0x2a5   : > { %4775 = vst [vmem:[%s8546_s12 + $0x10] sm:$0xff] %v4711_v1  ;;  %v4709_v61 = vadd.f32 %v8539_v28, %v4638_v27  ;;  %v4710_v23 = vadd.f32 %v8539_v28, %v4639_v47  ;;  %v6269_v15 = vpop.f32.mrf.mxu1 }
 0x2a6   : > { %v4453_v58 = vsel %vm4444_vm3, %v4450_v32, %v4452_v60  ;;  %v4321_v9 = vadd.f32 %v4080_v55, %v3787_v14  ;;  %v3808_v49 = vadd.f32 %v6269_v15, %v8069_v36  ;;  %v4093_v62 = vpop.f32.mrf.mxu0  ;;  %v4458_v38 = vrot.slane %v4323_v46, 2 }
 0x2a7   : > { %4773 = vst [vmem:[%s8546_s12] sm:$0xff] %v4709_v61  ;;  %4774 = vst [vmem:[%s8546_s12 + $0x8] sm:$0xff] %v4710_v23  ;;  %v4641_v59 = vadd.f32 %v4453_v58, %v8074_v37  ;;  %v3799_v29 = vpop.f32.mrf.mxu1 }
 0x2a8   : > { %v4454_v3 = vrot.slane %v4321_v9, 2  ;;  %v3800_v44 = vadd.f32 %v3799_v29, %v8082_v30  ;;  %v6336_v51 = vpop.f32.mrf.mxu0  ;;  %v4459_v32 = vsel %vm4444_vm3, %v4456_v39, %v4458_v38  ;;  %v4326_v20 = vadd.f32 %v6335_v25, %v3808_v49 }
 0x2a9   : > { %v4712_v35 = vadd.f32 %v8539_v28, %v4641_v59  ;;  %v6270_v14 = vpop.f32.mrf.mxu1  ;;  %v4644_v36 = vadd.f32 %v4459_v32, %v8087_v57 }
 0x2aa   : > { %v4455_v55 = vsel %vm4444_vm3, %v4452_v60, %v4454_v3  ;;  %v4457_v1 = vsel %vm4444_vm3, %v4454_v3, %v4456_v39  ;;  %v4096_v37 = vpop.f32.mrf.mxu0  ;;  %v4324_v47 = vadd.f32 %v4093_v62, %v3800_v44  ;;  %v3811_v54 = vadd.f32 %v6270_v14, %v9304_v33 }
 0x2ab   : > { %4776 = vst [vmem:[%s8546_s12 + $0x18] sm:$0xff] %v4712_v35  ;;  %v4642_v27 = vadd.f32 %v4455_v55, %v8095_v22  ;;  %v4643_v30 = vadd.f32 %v4457_v1, %v8098_v43  ;;  %v3802_v61 = vpop.f32.mrf.mxu1  ;;  %v4715_v57 = vadd.f32 %v8539_v28, %v4644_v36  ;;  %v4464_v49 = vrot.slane %v4326_v20, 2 }
 0x2ac   : > { %v3803_v60 = vadd.f32 %v3802_v61, %v8101_v19  ;;  %v6339_v23 = vpop.f32.mrf.mxu0  ;;  %v4460_v15 = vrot.slane %v4324_v47, 2  ;;  %v4327_v58 = vadd.f32 %v6336_v51, %v3811_v54 }
 0x2ad   : > { %v4713_v25 = vadd.f32 %v8539_v28, %v4642_v27  ;;  %v4714_v46 = vadd.f32 %v8539_v28, %v4643_v30  ;;  %v6273_v22 = vpop.f32.mrf.mxu1  ;;  %4779 = vst [vmem:[%s8546_s12 + $0x30] sm:$0xff] %v4715_v57 }
 0x2ae   : > { %v4325_v9 = vadd.f32 %v4096_v37, %v3803_v60  ;;  %v4109_v43 = vpop.f32.mrf.mxu0  ;;  %v4461_v62 = vsel %vm4444_vm3, %v4458_v38, %v4460_v15  ;;  %v4466_v39 = vrot.slane %v4327_v58, 2  ;;  %v3824_v3 = vadd.f32 %v6273_v22, %v8105_v17 }
 0x2af   : > { %4777 = vst [vmem:[%s8546_s12 + $0x20] sm:$0xff] %v4713_v25  ;;  %4778 = vst [vmem:[%s8546_s12 + $0x28] sm:$0xff] %v4714_v46  ;;  %v3815_v59 = vpop.f32.mrf.mxu1  ;;  %v4645_v19 = vadd.f32 %v4461_v62, %v8110_v2 }
 0x2b0   : > { %v4462_v29 = vrot.slane %v4325_v9, 2  ;;  %v3816_v44 = vadd.f32 %v3815_v59, %v8118_v48  ;;  %v6340_v51 = vpop.f32.mrf.mxu0  ;;  %v4467_v35 = vsel %vm4444_vm3, %v4464_v49, %v4466_v39  ;;  %v4330_v27 = vadd.f32 %v6339_v23, %v3824_v3 }
 0x2b1   : > { %v6274_v32 = vpop.f32.mrf.mxu1  ;;  %v4716_v14 = vadd.f32 %v8539_v28, %v4645_v19  ;;  %v4648_v36 = vadd.f32 %v4467_v35, %v8123_v5 }
 0x2b2   : > { %v4463_v38 = vsel %vm4444_vm3, %v4460_v15, %v4462_v29  ;;  %v4465_v55 = vsel %vm4444_vm3, %v4462_v29, %v4464_v49  ;;  %v4112_v2 = vpop.f32.mrf.mxu0  ;;  %v4328_v20 = vadd.f32 %v4109_v43, %v3816_v44  ;;  %v3827_v5 = vadd.f32 %v6274_v32, %v8128_v8 }
 0x2b3   : > { %v4646_v1 = vadd.f32 %v4463_v38, %v8131_v26  ;;  %v4647_v17 = vadd.f32 %v4465_v55, %v8134_v7  ;;  %v3818_v48 = vpop.f32.mrf.mxu1  ;;  %4780 = vst [vmem:[%s8546_s12 + $0x38] sm:$0xff] %v4716_v14  ;;  %v4719_v37 = vadd.f32 %v8539_v28, %v4648_v36  ;;  %v4472_v46 = vrot.slane %v4330_v27, 2 }
 0x2b4   : > { %v3819_v30 = vadd.f32 %v3818_v48, %v8137_v12  ;;  %v6343_v47 = vpop.f32.mrf.mxu0  ;;  %v4468_v26 = vrot.slane %v4328_v20, 2  ;;  %v4331_v7 = vadd.f32 %v6340_v51, %v3827_v5 }
 0x2b5   : > { %v4717_v33 = vadd.f32 %v8539_v28, %v4646_v1  ;;  %v4718_v54 = vadd.f32 %v8539_v28, %v4647_v17  ;;  %v6277_v61 = vpop.f32.mrf.mxu1  ;;  %4783 = vst [vmem:[%s8546_s12 + $0x50] sm:$0xff] %v4719_v37 }
 0x2b6   : > { %v4329_v57 = vadd.f32 %v4112_v2, %v3819_v30  ;;  %v4125_v60 = vpop.f32.mrf.mxu0  ;;  %v4469_v25 = vsel %vm4444_vm3, %v4466_v39, %v4468_v26  ;;  %v3840_v23 = vadd.f32 %v6277_v61, %v8141_v0  ;;  %v4474_v15 = vrot.slane %v4331_v7, 2 }
 0x2b7   : > { %4781 = vst [vmem:[%s8546_s12 + $0x40] sm:$0xff] %v4717_v33  ;;  %4782 = vst [vmem:[%s8546_s12 + $0x48] sm:$0xff] %v4718_v54  ;;  %v3831_v8 = vpop.f32.mrf.mxu1  ;;  %v4649_v12 = vadd.f32 %v4469_v25, %v8146_v13 }
 0x2b8   : > { %v4470_v58 = vrot.slane %v4329_v57, 2  ;;  %v6344_v22 = vpop.f32.mrf.mxu0  ;;  %v3832_v9 = vadd.f32 %v3831_v8, %v8154_v40  ;;  %v4475_v62 = vsel %vm4444_vm3, %v4472_v46, %v4474_v15  ;;  %v4334_v3 = vadd.f32 %v6343_v47, %v3840_v23 }
 0x2b9   : > { %v6278_v43 = vpop.f32.mrf.mxu1  ;;  %v4720_v49 = vadd.f32 %v8539_v28, %v4649_v12  ;;  %v4652_v19 = vadd.f32 %v4475_v62, %v8159_v6 }
 0x2ba   : > { %v4471_v59 = vsel %vm4444_vm3, %v4468_v26, %v4470_v58  ;;  %v4473_v39 = vsel %vm4444_vm3, %v4470_v58, %v4472_v46  ;;  %v4128_v0 = vpop.f32.mrf.mxu0  ;;  %v4332_v44 = vadd.f32 %v4125_v60, %v3832_v9  ;;  %v3843_v51 = vadd.f32 %v6278_v43, %v8164_v31 }
 0x2bb   : > { %v4650_v13 = vadd.f32 %v4471_v59, %v8167_v63  ;;  %v4651_v29 = vadd.f32 %v4473_v39, %v8170_v52  ;;  %v3834_v40 = vpop.f32.mrf.mxu1  ;;  %4784 = vst [vmem:[%s8546_s12 + $0x58] sm:$0xff] %v4720_v49  ;;  %v4723_v14 = vadd.f32 %v8539_v28, %v4652_v19  ;;  %v4480_v1 = vrot.slane %v4334_v3, 2 }
 0x2bc   : > { %v3835_v35 = vadd.f32 %v3834_v40, %v8173_v11  ;;  %v6347_v32 = vpop.f32.mrf.mxu0  ;;  %v4476_v52 = vrot.slane %v4332_v44, 2  ;;  %v4335_v38 = vadd.f32 %v6344_v22, %v3843_v51 }
 0x2bd   : > { %v4721_v6 = vadd.f32 %v8539_v28, %v4650_v13  ;;  %v4722_v63 = vadd.f32 %v8539_v28, %v4651_v29  ;;  %v6281_v36 = vpop.f32.mrf.mxu1  ;;  %4787 = vst [vmem:[%s8546_s12 + $0x70] sm:$0xff] %v4723_v14  ;;  %v9306_v14 = vld [vmem:[#allocation18_spill] sm:$0xff] }
 0x2be   : > { %v4333_v55 = vadd.f32 %v4128_v0, %v3835_v35  ;;  %v4141_v2 = vpop.f32.mrf.mxu0  ;;  %v4477_v31 = vsel %vm4444_vm3, %v4474_v15, %v4476_v52  ;;  %v4482_v11 = vrot.slane %v4335_v38, 2  ;;  %v3856_v48 = vadd.f32 %v6281_v36, %v8177_v42  ;;  %v9305_v35 = vld [vmem:[#allocation53_spill] sm:$0xff] }
 0x2bf   : > { %4785 = vst [vmem:[%s8546_s12 + $0x60] sm:$0xff] %v4721_v6  ;;  %4786 = vst [vmem:[%s8546_s12 + $0x68] sm:$0xff] %v4722_v63  ;;  %v3847_v17 = vpop.f32.mrf.mxu1  ;;  %v4653_v27 = vadd.f32 %v4477_v31, %v8182_v53  ;;  %v9307_v63 = vld [vmem:[#allocation68_spill] sm:$0xff] }
 0x2c0   : > { %v4478_v20 = vrot.slane %v4333_v55, 2  ;;  %v6348_v37 = vpop.f32.mrf.mxu0  ;;  %v3848_v5 = vadd.f32 %v3847_v17, %v8190_v21  ;;  %v4483_v47 = vsel %vm4444_vm3, %v4480_v1, %v4482_v11  ;;  %v4338_v21 = vadd.f32 %v6347_v32, %v3856_v48 }
 0x2c1   : > { %v6282_v30 = vpop.f32.mrf.mxu1  ;;  %v4724_v61 = vadd.f32 %v8539_v28, %v4653_v27  ;;  %v4656_v7 = vadd.f32 %v4483_v47, %v8195_v45 }
 0x2c2   : > { %v4479_v33 = vsel %vm4444_vm3, %v4476_v52, %v4478_v20  ;;  %v4481_v54 = vsel %vm4444_vm3, %v4478_v20, %v4480_v1  ;;  %v4144_v26 = vpop.f32.mrf.mxu0  ;;  %v4336_v60 = vadd.f32 %v4141_v2, %v3848_v5  ;;  %v3859_v25 = vadd.f32 %v6282_v30, %v8200_v41  ;;  %v9308_v52 = vld [vmem:[#allocation2_spill] sm:$0xff] }
 0x2c3   : > { %v4654_v42 = vadd.f32 %v4479_v33, %v8203_v4  ;;  %v4655_v57 = vadd.f32 %v4481_v54, %v8206_v56  ;;  %v3850_v53 = vpop.f32.mrf.mxu1  ;;  %4788 = vst [vmem:[%s8546_s12 + $0x78] sm:$0xff] %v4724_v61  ;;  %v4727_v46 = vadd.f32 %v8539_v28, %v4656_v7  ;;  %v9309_v33 = vld [vmem:[#allocation19_spill] sm:$0xff] }
 0x2c4   : > { %v3851_v23 = vadd.f32 %v3850_v53, %v8209_v34  ;;  %v6351_v8 = vpop.f32.mrf.mxu0  ;;  %v4484_v56 = vrot.slane %v4336_v60, 2  ;;  %v4339_v15 = vadd.f32 %v6348_v37, %v3859_v25  ;;  %v4488_v34 = vrot.slane %v4338_v21, 2  ;;  %v9310_v61 = vld [vmem:[#allocation3_spill] sm:$0xff] }
 0x2c5   : > { %v4725_v45 = vadd.f32 %v8539_v28, %v4654_v42  ;;  %v4726_v4 = vadd.f32 %v8539_v28, %v4655_v57  ;;  %v6285_v12 = vpop.f32.mrf.mxu1  ;;  %4791 = vst [vmem:[%s8546_s12 + $0x90] sm:$0xff] %v4727_v46  ;;  %v9311_v42 = vld [vmem:[#allocation4_spill] sm:$0xff]  ;;  %v9312_v46 = vld [vmem:[#allocation54_spill] sm:$0xff] }
 0x2c6   : > { %v4337_v58 = vadd.f32 %v4144_v26, %v3851_v23  ;;  %v3872_v22 = vadd.f32 %v6285_v12, %v8213_v16  ;;  %v4157_v9 = vpop.f32.mrf.mxu0  ;;  %v4485_v43 = vsel %vm4444_vm3, %v4482_v11, %v4484_v56  ;;  %v4490_v49 = vrot.slane %v4339_v15, 2 }
 0x2c7   : > { %4789 = vst [vmem:[%s8546_s12 + $0x80] sm:$0xff] %v4725_v45  ;;  %4790 = vst [vmem:[%s8546_s12 + $0x88] sm:$0xff] %v4726_v4  ;;  %v3863_v41 = vpop.f32.mrf.mxu1  ;;  %v4657_v39 = vadd.f32 %v4485_v43, %v8218_v24  ;;  %v9313_v4 = vld [vmem:[#allocation56_spill] sm:$0xff] }
 0x2c8   : > { %v4486_v62 = vrot.slane %v4337_v58, 2  ;;  %v6352_v59 = vpop.f32.mrf.mxu0  ;;  %v3864_v0 = vadd.f32 %v3863_v41, %v8226_v10  ;;  %v4491_v13 = vsel %vm4444_vm3, %v4488_v34, %v4490_v49  ;;  %v4342_v3 = vadd.f32 %v6351_v8, %v3872_v22  ;;  %v9315_v41 = vld [vmem:[#allocation55_spill] sm:$0xff]  ;;  %v9316_v43 = vld [vmem:[#allocation20_spill] sm:$0xff] }
 0x2c9   : > { %v6286_v19 = vpop.f32.mrf.mxu1  ;;  %v4728_v44 = vadd.f32 %v8539_v28, %v4657_v39  ;;  %v4660_v51 = vadd.f32 %v4491_v13, %v8231_v50 }
 0x2ca   : > { %v4487_v16 = vsel %vm4444_vm3, %v4484_v56, %v4486_v62  ;;  %v4489_v29 = vsel %vm4444_vm3, %v4486_v62, %v4488_v34  ;;  %v4160_v40 = vpop.f32.mrf.mxu0  ;;  %v4340_v6 = vadd.f32 %v4157_v9, %v3864_v0  ;;  %v3875_v36 = vadd.f32 %v6286_v19, %v9307_v63  ;;  %v9314_v56 = vld [vmem:[#allocation69_spill] sm:$0xff] }
 0x2cb   : > { %v4658_v32 = vadd.f32 %v4487_v16, %v9305_v35  ;;  %v4659_v24 = vadd.f32 %v4489_v29, %v9306_v14  ;;  %v3866_v10 = vpop.f32.mrf.mxu1  ;;  %4792 = vst [vmem:[%s8546_s12 + $0x98] sm:$0xff] %v4728_v44  ;;  %v4731_v2 = vadd.f32 %v8539_v28, %v4660_v51  ;;  %v4496_v37 = vrot.slane %v4342_v3, 2  ;;  %v9317_v3 = vld [vmem:[#allocation30_spill] sm:$0xff] }
 0x2cc   : > { %v3867_v38 = vadd.f32 %v3866_v10, %v9308_v52  ;;  %v6355_v55 = vpop.f32.mrf.mxu0  ;;  %v4492_v31 = vrot.slane %v4340_v6, 2  ;;  %v4343_v11 = vadd.f32 %v6352_v59, %v3875_v36  ;;  %v9318_v6 = vld [vmem:[#allocation57_spill] sm:$0xff] }
 0x2cd   : > { %v4729_v1 = vadd.f32 %v8539_v28, %v4658_v32  ;;  %v4730_v50 = vadd.f32 %v8539_v28, %v4659_v24  ;;  %v6289_v17 = vpop.f32.mrf.mxu1  ;;  %4795 = vst [vmem:[%s8546_s12 + $0xb0] sm:$0xff] %v4731_v2  ;;  %v9319_v36 = vld [vmem:[#allocation5_spill] sm:$0xff] }
 0x2ce   : > { %v4341_v20 = vadd.f32 %v4160_v40, %v3867_v38  ;;  %v4173_v48 = vpop.f32.mrf.mxu0  ;;  %v4493_v5 = vsel %vm4444_vm3, %v4490_v49, %v4492_v31  ;;  %v4498_v30 = vrot.slane %v4343_v11, 2  ;;  %v3888_v54 = vadd.f32 %v6289_v17, %v9309_v33  ;;  %v9320_v11 = vld [vmem:[#allocation6_spill] sm:$0xff]  ;;  %v9323_v33 = vld [vmem:[#allocation21_spill] sm:$0xff] }
 0x2cf   : > { %4793 = vst [vmem:[%s8546_s12 + $0xa0] sm:$0xff] %v4729_v1  ;;  %4794 = vst [vmem:[%s8546_s12 + $0xa8] sm:$0xff] %v4730_v50  ;;  %v3879_v27 = vpop.f32.mrf.mxu1  ;;  %v4661_v7 = vadd.f32 %v4493_v5, %v9310_v61 }
 0x2d0   : > { %v4494_v47 = vrot.slane %v4341_v20, 2  ;;  %v6356_v26 = vpop.f32.mrf.mxu0  ;;  %v3880_v57 = vadd.f32 %v3879_v27, %v9311_v42  ;;  %v4499_v21 = vsel %vm4444_vm3, %v4496_v37, %v4498_v30  ;;  %v4346_v22 = vadd.f32 %v6355_v55, %v3888_v54  ;;  %v9322_v27 = vld [vmem:[#allocation70_spill] sm:$0xff] }
 0x2d1   : > { %v6290_v53 = vpop.f32.mrf.mxu1  ;;  %v4732_v8 = vadd.f32 %v8539_v28, %v4661_v7  ;;  %v4664_v45 = vadd.f32 %v4499_v21, %v9312_v46 }
 0x2d2   : > { %v4495_v60 = vsel %vm4444_vm3, %v4492_v31, %v4494_v47  ;;  %v4497_v25 = vsel %vm4444_vm3, %v4494_v47, %v4496_v37  ;;  %v4176_v23 = vpop.f32.mrf.mxu0  ;;  %v4344_v9 = vadd.f32 %v4173_v48, %v3880_v57  ;;  %v3891_v34 = vadd.f32 %v6290_v53, %v9315_v41  ;;  %v9321_v48 = vld [vmem:[#allocation58_spill] sm:$0xff] }
 0x2d3   : > { %v4662_v12 = vadd.f32 %v4495_v60, %v9313_v4  ;;  %v4663_v15 = vadd.f32 %v4497_v25, %v9314_v56  ;;  %v3882_v58 = vpop.f32.mrf.mxu1  ;;  %4796 = vst [vmem:[%s8546_s12 + $0xb8] sm:$0xff] %v4732_v8  ;;  %v4735_v59 = vadd.f32 %v8539_v28, %v4664_v45  ;;  %v4504_v35 = vrot.slane %v4346_v22, 2 }
 0x2d4   : > { %v3883_v49 = vadd.f32 %v3882_v58, %v9316_v43  ;;  %v6359_v62 = vpop.f32.mrf.mxu0  ;;  %v4500_v13 = vrot.slane %v4344_v9, 2  ;;  %v4347_v16 = vadd.f32 %v6356_v26, %v3891_v34  ;;  %v9324_v26 = vld [vmem:[#allocation59_spill] sm:$0xff]  ;;  %v9326_v9 = vld [vmem:[#allocation60_spill] sm:$0xff]  ;;  %v9327_v34 = vld [vmem:[#allocation62_spill] sm:$0xff] }
 0x2d5   : > { %v4733_v39 = vadd.f32 %v8539_v28, %v4662_v12  ;;  %v4734_v0 = vadd.f32 %v8539_v28, %v4663_v15  ;;  %v6293_v19 = vpop.f32.mrf.mxu1  ;;  %4799 = vst [vmem:[%s8546_s12 + $0xd0] sm:$0xff] %v4735_v59  ;;  %v9325_v15 = vld [vmem:[#allocation7_spill] sm:$0xff] }
 0x2d6   : > { %v4345_v29 = vadd.f32 %v4176_v23, %v3883_v49  ;;  %v3904_v40 = vadd.f32 %v6293_v19, %v9317_v3  ;;  %v4189_v44 = vpop.f32.mrf.mxu0  ;;  %v4501_v32 = vsel %vm4444_vm3, %v4498_v30, %v4500_v13  ;;  %v4506_v14 = vrot.slane %v4347_v16, 2 }
 0x2d7   : > { %4797 = vst [vmem:[%s8546_s12 + $0xc0] sm:$0xff] %v4733_v39  ;;  %4798 = vst [vmem:[%s8546_s12 + $0xc8] sm:$0xff] %v4734_v0  ;;  %v3895_v51 = vpop.f32.mrf.mxu1  ;;  %v4665_v63 = vadd.f32 %v4501_v32, %v9318_v6 }
 0x2d8   : > { %v4502_v24 = vrot.slane %v4345_v29, 2  ;;  %v6360_v10 = vpop.f32.mrf.mxu0  ;;  %v3896_v52 = vadd.f32 %v3895_v51, %v9319_v36  ;;  %v4507_v55 = vsel %vm4444_vm3, %v4504_v35, %v4506_v14  ;;  %v4350_v50 = vadd.f32 %v6359_v62, %v3904_v40  ;;  %v9329_v29 = vld [vmem:[#allocation61_spill] sm:$0xff]  ;;  %v9330_v40 = vld [vmem:[#allocation64_spill] sm:$0xff] }
 0x2d9   : > { %v6294_v38 = vpop.f32.mrf.mxu1  ;;  %v4736_v31 = vadd.f32 %v8539_v28, %v4665_v63  ;;  %v4668_v20 = vadd.f32 %v4507_v55, %v9320_v11 }
 0x2da   : > { %v4503_v2 = vsel %vm4444_vm3, %v4500_v13, %v4502_v24  ;;  %v4505_v1 = vsel %vm4444_vm3, %v4502_v24, %v4504_v35  ;;  %v4192_v17 = vpop.f32.mrf.mxu0  ;;  %v4348_v47 = vadd.f32 %v4189_v44, %v3896_v52  ;;  %v3907_v54 = vadd.f32 %v6294_v38, %v9323_v33  ;;  %v9328_v13 = vld [vmem:[#allocation34_spill] sm:$0xff] }
 0x2db   : > { %v4666_v37 = vadd.f32 %v4503_v2, %v9321_v48  ;;  %v4667_v5 = vadd.f32 %v4505_v1, %v9322_v27  ;;  %v3898_v30 = vpop.f32.mrf.mxu1  ;;  %4800 = vst [vmem:[%s8546_s12 + $0xd8] sm:$0xff] %v4736_v31  ;;  %v4739_v42 = vadd.f32 %v8539_v28, %v4668_v20  ;;  %v4512_v46 = vrot.slane %v4350_v50, 2 }
 0x2dc   : > { %v3899_v61 = vadd.f32 %v3898_v30, %v9324_v26  ;;  %v6363_v7 = vpop.f32.mrf.mxu0  ;;  %v4508_v60 = vrot.slane %v4348_v47, 2  ;;  %v4351_v25 = vadd.f32 %v6360_v10, %v3907_v54  ;;  %v9332_v10 = vld [vmem:[#allocation23_spill] sm:$0xff]  ;;  %v9335_v54 = vld [vmem:[#allocation66_spill] sm:$0xff] }
 0x2dd   : > { %v4737_v57 = vadd.f32 %v8539_v28, %v4666_v37  ;;  %v4738_v53 = vadd.f32 %v8539_v28, %v4667_v5  ;;  %v6297_v21 = vpop.f32.mrf.mxu1  ;;  %4803 = vst [vmem:[%s8546_s12 + $0xf0] sm:$0xff] %v4739_v42  ;;  %v9334_v47 = vld [vmem:[#allocation63_spill] sm:$0xff] }
 0x2de   : > { %v4349_v23 = vadd.f32 %v4192_v17, %v3899_v61  ;;  %v4205_v8 = vpop.f32.mrf.mxu0  ;;  %v4509_v4 = vsel %vm4444_vm3, %v4506_v14, %v4508_v60  ;;  %v4514_v12 = vrot.slane %v4351_v25, 2  ;;  %v3920_v58 = vadd.f32 %v6297_v21, %v9325_v15  ;;  %v9331_v14 = vld [vmem:[#allocation22_spill] sm:$0xff]  ;;  %v9333_v17 = vld [vmem:[#allocation32_spill] sm:$0xff]  ;;  %v9336_v25 = vld [vmem:[#allocation31_spill] sm:$0xff] }
 0x2df   : > { %4801 = vst [vmem:[%s8546_s12 + $0xe0] sm:$0xff] %v4737_v57  ;;  %4802 = vst [vmem:[%s8546_s12 + $0xe8] sm:$0xff] %v4738_v53  ;;  %v3911_v45 = vpop.f32.mrf.mxu1  ;;  %v4669_v41 = vadd.f32 %v4509_v4, %v9326_v9  ;;  %v9339_v15 = vld [vmem:[#allocation65_spill] sm:$0xff] }
 0x2e0   : > { %v4510_v56 = vrot.slane %v4349_v23, 2  ;;  %v6364_v22 = vpop.f32.mrf.mxu0  ;;  %v3912_v43 = vadd.f32 %v3911_v45, %v9327_v34  ;;  %v4515_v62 = vsel %vm4444_vm3, %v4512_v46, %v4514_v12  ;;  %v4354_v35 = vadd.f32 %v6363_v7, %v3920_v58  ;;  %v9338_v45 = vld [vmem:[#allocation8_spill] sm:$0xff] }
 0x2e1   : > { %v6298_v49 = vpop.f32.mrf.mxu1  ;;  %v4740_v19 = vadd.f32 %v8539_v28, %v4669_v41  ;;  %v4672_v16 = vadd.f32 %v4515_v62, %v9328_v13 }
 0x2e2   : > { %v4511_v59 = vsel %vm4444_vm3, %v4508_v60, %v4510_v56  ;;  %v4513_v39 = vsel %vm4444_vm3, %v4510_v56, %v4512_v46  ;;  %v4208_v0 = vpop.f32.mrf.mxu0  ;;  %v4352_v32 = vadd.f32 %v4205_v8, %v3912_v43  ;;  %v3923_v24 = vadd.f32 %v6298_v49, %v9331_v14  ;;  %v9337_v8 = vld [vmem:[#allocation67_spill] sm:$0xff] }
 0x2e3   : > { %v4670_v3 = vadd.f32 %v4511_v59, %v9329_v29  ;;  %v4671_v44 = vadd.f32 %v4513_v39, %v9330_v40  ;;  %v3914_v51 = vpop.f32.mrf.mxu1  ;;  %4804 = vst [vmem:[%s8546_s12 + $0xf8] sm:$0xff] %v4740_v19  ;;  %v4743_v36 = vadd.f32 %v8539_v28, %v4672_v16  ;;  %v4520_v48 = vrot.slane %v4354_v35, 2 }
 0x2e4   : > { %v3915_v6 = vadd.f32 %v3914_v51, %v9332_v10  ;;  %v6367_v63 = vpop.f32.mrf.mxu0  ;;  %v4516_v2 = vrot.slane %v4352_v32, 2  ;;  %v4355_v1 = vadd.f32 %v6364_v22, %v3923_v24  ;;  %v9340_v22 = vld [vmem:[#allocation24_spill] sm:$0xff]  ;;  %v9342_v32 = vld [vmem:[#allocation25_spill] sm:$0xff] }
 0x2e5   : > { %v4741_v52 = vadd.f32 %v8539_v28, %v4670_v3  ;;  %v4742_v38 = vadd.f32 %v8539_v28, %v4671_v44  ;;  %v6301_v55 = vpop.f32.mrf.mxu1  ;;  %4807 = vst [vmem:[%s8546_s12 + $0x110] sm:$0xff] %v4743_v36  ;;  %v9341_v44 = vld [vmem:[#allocation9_spill] sm:$0xff] }
 0x2e6   : > { %v4353_v50 = vadd.f32 %v4208_v0, %v3915_v6  ;;  %v3936_v31 = vadd.f32 %v6301_v55, %v9333_v17  ;;  %v4221_v11 = vpop.f32.mrf.mxu0  ;;  %v4517_v37 = vsel %vm4444_vm3, %v4514_v12, %v4516_v2  ;;  %v4522_v27 = vrot.slane %v4355_v1, 2  ;;  %v9343_v24 = vld [vmem:[#allocation33_spill] sm:$0xff] }
 0x2e7   : > { %4805 = vst [vmem:[%s8546_s12 + $0x100] sm:$0xff] %v4741_v52  ;;  %4806 = vst [vmem:[%s8546_s12 + $0x108] sm:$0xff] %v4742_v38  ;;  %v3927_v20 = vpop.f32.mrf.mxu1  ;;  %v4673_v33 = vadd.f32 %v4517_v37, %v9334_v47 }
 0x2e8   : > { %v4518_v5 = vrot.slane %v4353_v50, 2  ;;  %v6368_v30 = vpop.f32.mrf.mxu0  ;;  %v3928_v26 = vadd.f32 %v3927_v20, %v9335_v54  ;;  %v4523_v7 = vsel %vm4444_vm3, %v4520_v48, %v4522_v27  ;;  %v4358_v53 = vadd.f32 %v6367_v63, %v3936_v31  ;;  %v9345_v50 = vld [vmem:[#allocation27_spill] sm:$0xff] }
 0x2e9   : > { %v6302_v61 = vpop.f32.mrf.mxu1  ;;  %v4744_v60 = vadd.f32 %v8539_v28, %v4673_v33  ;;  %v4676_v23 = vadd.f32 %v4523_v7, %v9336_v25  ;;  %v9346_v31 = vld [vmem:[#allocation35_spill] sm:$0xff] }
 0x2ea   : > { %v4519_v42 = vsel %vm4444_vm3, %v4516_v2, %v4518_v5  ;;  %v4521_v57 = vsel %vm4444_vm3, %v4518_v5, %v4520_v48  ;;  %v4224_v21 = vpop.f32.mrf.mxu0  ;;  %v4356_v56 = vadd.f32 %v4221_v11, %v3928_v26  ;;  %v3939_v58 = vadd.f32 %v6302_v61, %v9339_v15  ;;  %v9344_v2 = vld [vmem:[#allocation36_spill] sm:$0xff] }
 0x2eb   : > { %v4674_v46 = vadd.f32 %v4519_v42, %v9337_v8  ;;  %v4675_v4 = vadd.f32 %v4521_v57, %v9338_v45  ;;  %v3930_v12 = vpop.f32.mrf.mxu1  ;;  %4808 = vst [vmem:[%s8546_s12 + $0x118] sm:$0xff] %v4744_v60  ;;  %v4747_v34 = vadd.f32 %v8539_v28, %v4676_v23  ;;  %v4528_v13 = vrot.slane %v4358_v53, 2 }
 0x2ec   : > { %v3931_v9 = vadd.f32 %v3930_v12, %v9340_v22  ;;  %v6371_v41 = vpop.f32.mrf.mxu0  ;;  %v4524_v59 = vrot.slane %v4356_v56, 2  ;;  %v4359_v39 = vadd.f32 %v6368_v30, %v3939_v58  ;;  %v9348_v30 = vld [vmem:[#allocation28_spill] sm:$0xff]  ;;  %v9350_v56 = vld [vmem:[#allocation29_spill] sm:$0xff] }
 0x2ed   : > { %v4745_v43 = vadd.f32 %v8539_v28, %v4674_v46  ;;  %v4746_v49 = vadd.f32 %v8539_v28, %v4675_v4  ;;  %v6305_v62 = vpop.f32.mrf.mxu1  ;;  %4811 = vst [vmem:[%s8546_s12 + $0x130] sm:$0xff] %v4747_v34  ;;  %v9351_v58 = vld [vmem:[#allocation37_spill] sm:$0xff] }
 0x2ee   : > { %v4357_v0 = vadd.f32 %v4224_v21, %v3931_v9  ;;  %v4237_v19 = vpop.f32.mrf.mxu0  ;;  %v4525_v29 = vsel %vm4444_vm3, %v4522_v27, %v4524_v59  ;;  %v4530_v3 = vrot.slane %v4359_v39, 2  ;;  %v3952_v51 = vadd.f32 %v6305_v62, %v9341_v44  ;;  %v9347_v27 = vld [vmem:[#allocation26_spill] sm:$0xff]  ;;  %v9355_v44 = vld [vmem:[#allocation71_spill] sm:$0xff] }
 0x2ef   : > { %4809 = vst [vmem:[%s8546_s12 + $0x120] sm:$0xff] %v4745_v43  ;;  %4810 = vst [vmem:[%s8546_s12 + $0x128] sm:$0xff] %v4746_v49  ;;  %v3943_v16 = vpop.f32.mrf.mxu1  ;;  %v4677_v14 = vadd.f32 %v4525_v29, %v9342_v32  ;;  %v9349_v21 = vld [vmem:[#allocation10_spill] sm:$0xff] }
 0x2f0   : > { %v4526_v40 = vrot.slane %v4357_v0, 2  ;;  %v6372_v35 = vpop.f32.mrf.mxu0  ;;  %v3944_v10 = vadd.f32 %v3943_v16, %v9343_v24  ;;  %v4531_v63 = vsel %vm4444_vm3, %v4528_v13, %v4530_v3  ;;  %v4362_v48 = vadd.f32 %v6371_v41, %v3952_v51  ;;  %v9352_v39 = vld [vmem:[#allocation38_spill] sm:$0xff]  ;;  %v9354_v16 = vld [vmem:[#allocation11_spill] sm:$0xff] }
 0x2f1   : > { %v6306_v6 = vpop.f32.mrf.mxu1  ;;  %v4748_v55 = vadd.f32 %v8539_v28, %v4677_v14  ;;  %v4680_v1 = vadd.f32 %v4531_v63, %v9344_v2 }
 0x2f2   : > { %v4527_v36 = vsel %vm4444_vm3, %v4524_v59, %v4526_v40  ;;  %v4529_v52 = vsel %vm4444_vm3, %v4526_v40, %v4528_v13  ;;  %v4240_v38 = vpop.f32.mrf.mxu0  ;;  %v4360_v37 = vadd.f32 %v4237_v19, %v3944_v10  ;;  %v3955_v5 = vadd.f32 %v6306_v6, %v9347_v27  ;;  %v9353_v19 = vld [vmem:[#allocation72_spill] sm:$0xff] }
 0x2f3   : > { %v4678_v17 = vadd.f32 %v4527_v36, %v9345_v50  ;;  %v4679_v11 = vadd.f32 %v4529_v52, %v9346_v31  ;;  %v3946_v20 = vpop.f32.mrf.mxu1  ;;  %4812 = vst [vmem:[%s8546_s12 + $0x138] sm:$0xff] %v4748_v55  ;;  %v4751_v54 = vadd.f32 %v8539_v28, %v4680_v1  ;;  %v4536_v8 = vrot.slane %v4362_v48, 2 }
 0x2f4   : > { %v3947_v47 = vadd.f32 %v3946_v20, %v9348_v30  ;;  %v6375_v33 = vpop.f32.mrf.mxu0  ;;  %v4532_v42 = vrot.slane %v4360_v37, 2  ;;  %v4363_v57 = vadd.f32 %v6372_v35, %v3955_v5  ;;  %v9356_v35 = vld [vmem:[#allocation73_spill] sm:$0xff]  ;;  %v9358_v37 = vld [vmem:[#allocation74_spill] sm:$0xff]  ;;  %v9359_v5 = vld [vmem:[#allocation40_spill] sm:$0xff] }
 0x2f5   : > { %v4749_v26 = vadd.f32 %v8539_v28, %v4678_v17  ;;  %v4750_v61 = vadd.f32 %v8539_v28, %v4679_v11  ;;  %v6309_v7 = vpop.f32.mrf.mxu1  ;;  %4815 = vst [vmem:[%s8546_s12 + $0x150] sm:$0xff] %v4751_v54  ;;  %v9357_v11 = vld [vmem:[#allocation39_spill] sm:$0xff] }
 0x2f6   : > { %v4361_v53 = vadd.f32 %v4240_v38, %v3947_v47  ;;  %v3968_v60 = vadd.f32 %v6309_v7, %v9349_v21  ;;  %v4253_v25 = vpop.f32.mrf.mxu0  ;;  %v4533_v46 = vsel %vm4444_vm3, %v4530_v3, %v4532_v42  ;;  %v4538_v45 = vrot.slane %v4363_v57, 2 }
 0x2f7   : > { %4813 = vst [vmem:[%s8546_s12 + $0x140] sm:$0xff] %v4749_v26  ;;  %4814 = vst [vmem:[%s8546_s12 + $0x148] sm:$0xff] %v4750_v61  ;;  %v3959_v23 = vpop.f32.mrf.mxu1  ;;  %v4681_v15 = vadd.f32 %v4533_v46, %v9350_v56 }
 0x2f8   : > { %v4534_v4 = vrot.slane %v4361_v53, 2  ;;  %v6376_v12 = vpop.f32.mrf.mxu0  ;;  %v3960_v22 = vadd.f32 %v3959_v23, %v9351_v58  ;;  %v4539_v41 = vsel %vm4444_vm3, %v4536_v8, %v4538_v45  ;;  %v4366_v49 = vadd.f32 %v6375_v33, %v3968_v60  ;;  %v9361_v53 = vld [vmem:[#allocation76_spill] sm:$0xff] }
 0x2f9   : > { %v6310_v9 = vpop.f32.mrf.mxu1  ;;  %v4752_v59 = vadd.f32 %v8539_v28, %v4681_v15  ;;  %v4684_v0 = vadd.f32 %v4539_v41, %v9352_v39  ;;  %v9362_v60 = vld [vmem:[#allocation12_spill] sm:$0xff] }
 0x2fa   : > { %v4535_v34 = vsel %vm4444_vm3, %v4532_v42, %v4534_v4  ;;  %v4537_v43 = vsel %vm4444_vm3, %v4534_v4, %v4536_v8  ;;  %v4256_v62 = vpop.f32.mrf.mxu0  ;;  %v4364_v40 = vadd.f32 %v4253_v25, %v3960_v22  ;;  %v3971_v51 = vadd.f32 %v6310_v9, %v9355_v44  ;;  %v9360_v42 = vld [vmem:[#allocation41_spill] sm:$0xff] }
 0x2fb   : > { %v4682_v13 = vadd.f32 %v4535_v34, %v9353_v19  ;;  %v4683_v29 = vadd.f32 %v4537_v43, %v9354_v16  ;;  %v3962_v3 = vpop.f32.mrf.mxu1  ;;  %4816 = vst [vmem:[%s8546_s12 + $0x158] sm:$0xff] %v4752_v59  ;;  %v4755_v24 = vadd.f32 %v8539_v28, %v4684_v0  ;;  %v4544_v2 = vrot.slane %v4366_v49, 2 }
 0x2fc   : > { %v3963_v32 = vadd.f32 %v3962_v3, %v9356_v35  ;;  %v6379_v14 = vpop.f32.mrf.mxu0  ;;  %v4540_v36 = vrot.slane %v4364_v40, 2  ;;  %v4367_v52 = vadd.f32 %v6376_v12, %v3971_v51  ;;  %v9364_v12 = vld [vmem:[#allocation77_spill] sm:$0xff]  ;;  %v9366_v40 = vld [vmem:[#allocation78_spill] sm:$0xff] }
 0x2fd   : > { %v4753_v10 = vadd.f32 %v8539_v28, %v4682_v13  ;;  %v4754_v6 = vadd.f32 %v8539_v28, %v4683_v29  ;;  %v6313_v63 = vpop.f32.mrf.mxu1  ;;  %4819 = vst [vmem:[%s8546_s12 + $0x170] sm:$0xff] %v4755_v24  ;;  %v9367_v51 = vld [vmem:[#allocation42_spill] sm:$0xff] }
 0x2fe   : > { %v4365_v38 = vadd.f32 %v4256_v62, %v3963_v32  ;;  %v4269_v55 = vpop.f32.mrf.mxu0  ;;  %v4541_v50 = vsel %vm4444_vm3, %v4538_v45, %v4540_v36  ;;  %v4546_v17 = vrot.slane %v4367_v52, 2  ;;  %v3984_v20 = vadd.f32 %v6313_v63, %v9357_v11  ;;  %v9363_v45 = vld [vmem:[#allocation75_spill] sm:$0xff]  ;;  %v9365_v62 = vld [vmem:[#allocation13_spill] sm:$0xff]  ;;  %v9368_v52 = vld [vmem:[#allocation44_spill] sm:$0xff] }
 0x2ff   : > { %4817 = vst [vmem:[%s8546_s12 + $0x160] sm:$0xff] %v4753_v10  ;;  %4818 = vst [vmem:[%s8546_s12 + $0x168] sm:$0xff] %v4754_v6  ;;  %v3975_v1 = vpop.f32.mrf.mxu1  ;;  %v4685_v27 = vadd.f32 %v4541_v50, %v9358_v37  ;;  %v9371_v11 = vld [vmem:[#allocation79_spill] sm:$0xff] }
 0x300   : > { %v4542_v31 = vrot.slane %v4365_v38, 2  ;;  %v6380_v48 = vpop.f32.mrf.mxu0  ;;  %v3976_v30 = vadd.f32 %v3975_v1, %v9359_v5  ;;  %v4547_v33 = vsel %vm4444_vm3, %v4544_v2, %v4546_v17  ;;  %v4370_v8 = vadd.f32 %v6379_v14, %v3984_v20  ;;  %v9370_v1 = vld [vmem:[#allocation43_spill] sm:$0xff] }
 0x301   : > { %v6314_v47 = vpop.f32.mrf.mxu1  ;;  %v4756_v7 = vadd.f32 %v8539_v28, %v4685_v27  ;;  %v4688_v57 = vadd.f32 %v4547_v33, %v9360_v42 }
 0x302   : > { %v4543_v54 = vsel %vm4444_vm3, %v4540_v36, %v4542_v31  ;;  %v4545_v26 = vsel %vm4444_vm3, %v4542_v31, %v4544_v2  ;;  %v4272_v61 = vpop.f32.mrf.mxu0  ;;  %v4368_v46 = vadd.f32 %v4269_v55, %v3976_v30  ;;  %v3987_v4 = vadd.f32 %v6314_v47, %v9363_v45  ;;  %v9369_v55 = vld [vmem:[#allocation80_spill] sm:$0xff]  ;;  %v9375_v45 = vld [vmem:[#allocation45_spill] sm:$0xff] }
 0x303   : > { %v4686_v21 = vadd.f32 %v4543_v54, %v9361_v53  ;;  %v4687_v25 = vadd.f32 %v4545_v26, %v9362_v60  ;;  %v3978_v23 = vpop.f32.mrf.mxu1  ;;  %4820 = vst [vmem:[%s8546_s12 + $0x178] sm:$0xff] %v4756_v7  ;;  %v4759_v58 = vadd.f32 %v8539_v28, %v4688_v57  ;;  %v4552_v19 = vrot.slane %v4370_v8, 2  ;;  %v9374_v8 = vld [vmem:[#allocation82_spill] sm:$0xff] }
 0x304   : > { %v3979_v56 = vadd.f32 %v3978_v23, %v9364_v12  ;;  %v6383_v15 = vpop.f32.mrf.mxu0  ;;  %v4548_v34 = vrot.slane %v4368_v46, 2  ;;  %v4371_v43 = vadd.f32 %v6380_v48, %v3987_v4  ;;  %v9372_v48 = vld [vmem:[#allocation81_spill] sm:$0xff] }
 0x305   : > { %v4757_v22 = vadd.f32 %v8539_v28, %v4686_v21  ;;  %v4758_v9 = vadd.f32 %v8539_v28, %v4687_v25  ;;  %v6317_v41 = vpop.f32.mrf.mxu1  ;;  %4823 = vst [vmem:[%s8546_s12 + $0x190] sm:$0xff] %v4759_v58  ;;  %v9373_v25 = vld [vmem:[#allocation14_spill] sm:$0xff] }
 0x306   : > { %v4369_v49 = vadd.f32 %v4272_v61, %v3979_v56  ;;  %v4000_v59 = vadd.f32 %v6317_v41, %v9365_v62  ;;  %v4285_v39 = vpop.f32.mrf.mxu0  ;;  %v4549_v13 = vsel %vm4444_vm3, %v4546_v17, %v4548_v34  ;;  %v4554_v16 = vrot.slane %v4371_v43, 2  ;;  %v9376_v41 = vld [vmem:[#allocation46_spill] sm:$0xff]  ;;  %v9377_v43 = vld [vmem:[#allocation84_spill] sm:$0xff]  ;;  %v9378_v62 = vld [vmem:[#allocation15_spill] sm:$0xff] }
 0x307   : > { %4821 = vst [vmem:[%s8546_s12 + $0x180] sm:$0xff] %v4757_v22  ;;  %4822 = vst [vmem:[%s8546_s12 + $0x188] sm:$0xff] %v4758_v9  ;;  %v3991_v0 = vpop.f32.mrf.mxu1  ;;  %v4689_v44 = vadd.f32 %v4549_v13, %v9366_v40  ;;  %v9379_v13 = vld [vmem:[#allocation83_spill] sm:$0xff] }
 0x308   : > { %v4550_v29 = vrot.slane %v4369_v49, 2  ;;  %v6384_v3 = vpop.f32.mrf.mxu0  ;;  %v3992_v35 = vadd.f32 %v3991_v0, %v9367_v51  ;;  %v4555_v14 = vsel %vm4444_vm3, %v4552_v19, %v4554_v16  ;;  %v4374_v6 = vadd.f32 %v6383_v15, %v4000_v59 }
 0x309   : > { %v6318_v32 = vpop.f32.mrf.mxu1  ;;  %v4760_v36 = vadd.f32 %v8539_v28, %v4689_v44  ;;  %v4692_v38 = vadd.f32 %v4555_v14, %v9368_v52  ;;  %v9381_v52 = vld [vmem:[#allocation47_spill] sm:$0xff] }
 0x30a   : > { %v4551_v24 = vsel %vm4444_vm3, %v4548_v34, %v4550_v29  ;;  %v4553_v10 = vsel %vm4444_vm3, %v4550_v29, %v4552_v19  ;;  %v4288_v63 = vpop.f32.mrf.mxu0  ;;  %v4372_v31 = vadd.f32 %v4285_v39, %v3992_v35  ;;  %v4003_v20 = vadd.f32 %v6318_v32, %v9371_v11  ;;  %v9380_v29 = vld [vmem:[#allocation85_spill] sm:$0xff]  ;;  %v9383_v11 = vld [vmem:[#allocation48_spill] sm:$0xff] }
 0x30b   : > { %v4690_v2 = vadd.f32 %v4551_v24, %v9369_v55  ;;  %v4691_v50 = vadd.f32 %v4553_v10, %v9370_v1  ;;  %v3994_v17 = vpop.f32.mrf.mxu1  ;;  %4824 = vst [vmem:[%s8546_s12 + $0x198] sm:$0xff] %v4760_v36  ;;  %v4763_v5 = vadd.f32 %v8539_v28, %v4692_v38  ;;  %v4560_v42 = vrot.slane %v4374_v6, 2 }
 0x30c   : > { %v3995_v37 = vadd.f32 %v3994_v17, %v9372_v48  ;;  %v6387_v27 = vpop.f32.mrf.mxu0  ;;  %v4556_v54 = vrot.slane %v4372_v31, 2  ;;  %v4375_v26 = vadd.f32 %v6384_v3, %v4003_v20  ;;  %v9384_v48 = vld [vmem:[#allocation49_spill] sm:$0xff] }
 0x30d   : > { %v4761_v30 = vadd.f32 %v8539_v28, %v4690_v2  ;;  %v4762_v47 = vadd.f32 %v8539_v28, %v4691_v50  ;;  %v6321_v33 = vpop.f32.mrf.mxu1  ;;  %4827 = vst [vmem:[%s8546_s12 + $0x1b0] sm:$0xff] %v4763_v5  ;;  %v9382_v2 = vrot.slane %v8529_v18, 2 }
 0x30e   : > { %v4373_v61 = vadd.f32 %v4288_v63, %v3995_v37  ;;  %v4301_v7 = vpop.f32.mrf.mxu0  ;;  %v4557_v53 = vsel %vm4444_vm3, %v4554_v16, %v4556_v54  ;;  %v4562_v21 = vrot.slane %v4375_v26, 2  ;;  %v4016_v23 = vadd.f32 %v6321_v33, %v9373_v25 }
 0x30f   : > { %4825 = vst [vmem:[%s8546_s12 + $0x1a0] sm:$0xff] %v4761_v30  ;;  %4826 = vst [vmem:[%s8546_s12 + $0x1a8] sm:$0xff] %v4762_v47  ;;  %v4007_v57 = vpop.f32.mrf.mxu1  ;;  %v4693_v46 = vadd.f32 %v4557_v53, %v9374_v8  ;;  %v9386_v30 = vld [vmem:[#allocation16_spill] sm:$0xff] }
 0x310   : > { %v4558_v60 = vrot.slane %v4373_v61, 2  ;;  %v4008_v4 = vadd.f32 %v4007_v57, %v9375_v45  ;;  %v6388_v56 = vpop.f32.mrf.mxu0  ;;  %v4563_v15 = vsel %vm4444_vm3, %v4560_v42, %v4562_v21  ;;  %v4378_v0 = vadd.f32 %v6387_v27, %v4016_v23  ;;  %v9385_v27 = vld [vmem:[#allocation86_spill] sm:$0xff] }
 0x311   : > { %v6322_v12 = vpop.f32.mrf.mxu1  ;;  %v4764_v9 = vadd.f32 %v8539_v28, %v4693_v46  ;;  %v4696_v34 = vadd.f32 %v4563_v15, %v9376_v41  ;;  %v6618_v28 = vld [vmem:[%s8870_s2] ss:$0 sm:$0xff] }
 0x312   : > { %v4559_v58 = vsel %vm4444_vm3, %v4556_v54, %v4558_v60  ;;  %v4561_v22 = vsel %vm4444_vm3, %v4558_v60, %v4560_v42  ;;  %v4376_v19 = vadd.f32 %v4301_v7, %v4008_v4  ;;  %v4019_v16 = vadd.f32 %v6322_v12, %v9379_v13  ;;  %v4304_v35 = vpop.f32.mrf.mxu0 }
 0x313   : > { %v4694_v49 = vadd.f32 %v4559_v58, %v9377_v43  ;;  %v4695_v59 = vadd.f32 %v4561_v22, %v9378_v62  ;;  %v4010_v39 = vpop.f32.mrf.mxu1  ;;  %4828 = vst [vmem:[%s8546_s12 + $0x1b8] sm:$0xff] %v4764_v9  ;;  %v4767_v40 = vadd.f32 %v6618_v28, %v4696_v34  ;;  %v4568_v10 = vrot.slane %v4378_v0, 2 }
 0x314   : > { %v4011_v3 = vadd.f32 %v4010_v39, %v9380_v29  ;;  %v4564_v32 = vrot.slane %v4376_v19, 2  ;;  %v4379_v14 = vadd.f32 %v6388_v56, %v4019_v16 }
 0x315   : > { %v4765_v44 = vadd.f32 %v6618_v28, %v4694_v49  ;;  %v4766_v51 = vadd.f32 %v6618_v28, %v4695_v59  ;;  %4831 = vst [vmem:[%s8546_s12 + $0x1d0] sm:$0xff] %v4767_v40 }
 0x316   : > { %v4377_v24 = vadd.f32 %v4304_v35, %v4011_v3  ;;  %v4565_v6 = vsel %vm4444_vm3, %v4562_v21, %v4564_v32  ;;  %v4570_v63 = vrot.slane %v4379_v14, 2 }
 0x317   : > { %4829 = vst [vmem:[%s8546_s12 + $0x1c0] sm:$0xff] %v4765_v44  ;;  %4830 = vst [vmem:[%s8546_s12 + $0x1c8] sm:$0xff] %v4766_v51  ;;  %v4697_v38 = vadd.f32 %v4565_v6, %v9381_v52 }
 0x318   : > { %v4566_v36 = vrot.slane %v4377_v24, 2  ;;  %v4571_v55 = vsel %vm4444_vm3, %v4568_v10, %v4570_v63  ;;  %v4637_v1 = vsel %vm4444_vm3, %v4570_v63, %v9382_v2 }
 0x319   : > { %v4768_v31 = vadd.f32 %v6618_v28, %v4697_v38  ;;  %v4700_v20 = vadd.f32 %v4571_v55, %v9383_v11  ;;  %v4701_v37 = vadd.f32 %v4637_v1, %v9384_v48 }
 0x31a   : > { %v4567_v50 = vsel %vm4444_vm3, %v4564_v32, %v4566_v36  ;;  %v4569_v17 = vsel %vm4444_vm3, %v4566_v36, %v4568_v10 }
 0x31b   : > { %v4698_v5 = vadd.f32 %v4567_v50, %v9385_v27  ;;  %v4699_v47 = vadd.f32 %v4569_v17, %v9386_v30  ;;  %4832 = vst [vmem:[%s8546_s12 + $0x1d8] sm:$0xff] %v4768_v31  ;;  %v4771_v33 = vadd.f32 %v6618_v28, %v4700_v20  ;;  %v4772_v18 = vadd.f32 %v6618_v28, %v4701_v37 }
 0x31d   : > { %v4769_v54 = vadd.f32 %v6618_v28, %v4698_v5  ;;  %v4770_v26 = vadd.f32 %v6618_v28, %v4699_v47  ;;  %4835 = vst [vmem:[%s8546_s12 + $0x1f0] sm:$0xff] %v4771_v33  ;;  %4836 = vst [vmem:[%s8546_s12 + $0x1f8] sm:$0xff] %v4772_v18 }
 0x31f   : > { %4833 = vst [vmem:[%s8546_s12 + $0x1e0] sm:$0xff] %v4769_v54  ;;  %4834 = vst [vmem:[%s8546_s12 + $0x1e8] sm:$0xff] %v4770_v26 }
 0x320 PF: > { %s13_s14 = sadd.s32 1, %s6641_s14   ;;  %s9387_s12 = smov %s6637_s13 }
 0x321   : > { %p10_p5 = scmp.ge.s32.totalorder %s13_s14, 4   ;;  %s9388_s13 = smov %s9390_s15 }
 0x323   :  { %12 = sbr.rel (!%p10_p5) target bundleno = 2 (0x2), region = 79 }

</bundles_post_ra>
